<compile_context>
chip_gen: v7x
topology: tpu7x:2x2x1
jax: 0.10.0
libtpu: 0.0.40
codegen_flags: <defaults>
</compile_context>

<pallas_src>
import jax
import jax.numpy as jnp
from jax import lax
from jax.experimental import pallas as pl
from jax.experimental.pallas import tpu as pltpu

EPS = 1e-5
_HIGHEST = lax.Precision.HIGHEST


# ---------------- in-kernel fused compute ----------------

def _upsample_relu_conv(x_ref, uh_ref, uwt_ref, w_ref, b_ref):
    """x_ref: (C_in, H, W), uh_ref: (2H, H), uwt_ref: (W, 2W),
    w_ref: (C_in, C_out, 1, 1), b_ref: (C_out, 1, 1).
    Returns y = conv1x1(relu(bilinear_up2(x))) + bias, shape (C_out, 2H, 2W)."""
    uh = uh_ref[...]
    uwt = uwt_ref[...]
    c_in = x_ref.shape[0]
    y = None
    for c in range(c_in):                       # static unroll over input channels
        xc = x_ref[c]                                              # (H, W)
        xw = jnp.dot(xc, uwt, precision=_HIGHEST,
                     preferred_element_type=jnp.float32)           # (H, 2W)
        uc = jnp.dot(uh, xw, precision=_HIGHEST,
                     preferred_element_type=jnp.float32)           # (2H, 2W)
        uc = jnp.maximum(uc, 0.0)                                  # ReLU (pre-conv)
        term = w_ref[c] * uc[None, :, :]                           # (C_out, 2H, 2W)
        y = term if y is None else y + term
    return y + b_ref[...]


def _stats_kernel(x_ref, uh_ref, uwt_ref, w_ref, b_ref, sum_ref, sq_ref):
    y = _upsample_relu_conv(x_ref, uh_ref, uwt_ref, w_ref, b_ref)
    sum_ref[...] = jnp.sum(jnp.sum(y, axis=2, keepdims=True), axis=1, keepdims=True)
    sq_ref[...] = jnp.sum(jnp.sum(y * y, axis=2, keepdims=True), axis=1, keepdims=True)


def _norm_kernel(x_ref, uh_ref, uwt_ref, w_ref, b_ref,
                 mean_ref, scale_ref, beta_ref, o_ref):
    y = _upsample_relu_conv(x_ref, uh_ref, uwt_ref, w_ref, b_ref)
    o_ref[...] = (y - mean_ref[...]) * scale_ref[...] + beta_ref[...]


# ---------------- JAX wrapper ----------------

def _bilinear_up2_matrix(n):
    """(2n, n) matrix implementing PyTorch Upsample(scale_factor=2,
    mode='bilinear', align_corners=False) along one axis."""
    o = jnp.arange(2 * n)
    src = jnp.maximum((o + 0.5) / 2.0 - 0.5, 0.0)
    i0 = jnp.floor(src).astype(jnp.int32)
    i1 = jnp.minimum(i0 + 1, n - 1)
    lam = src - i0.astype(jnp.float32)
    m = jnp.zeros((2 * n, n), jnp.float32)
    m = m.at[o, i0].add(1.0 - lam)
    m = m.at[o, i1].add(lam)
    return m


@jax.jit
def factorized_increase_forward(x, weight, bias, gamma, beta):
    """x: (N, C_in, H, W) NCHW -> (N, C_out, 2H, 2W) NCHW."""
    N, C_in, H, W = x.shape
    C_out = weight.shape[0]
    H2, W2 = 2 * H, 2 * W

    x = x.astype(jnp.float32)
    uh = _bilinear_up2_matrix(H)                                   # (2H, H)
    uwt = _bilinear_up2_matrix(W).T                                # (W, 2W)
    w_k = weight.reshape(C_out, C_in).T.reshape(C_in, C_out, 1, 1).astype(jnp.float32)
    b_k = bias.reshape(C_out, 1, 1).astype(jnp.float32)

    common_in_specs = [
        pl.BlockSpec((None, C_in, H, W), lambda n: (n, 0, 0, 0)),   # x: one sample/step
        pl.BlockSpec((H2, H), lambda n: (0, 0)),                    # U_H
        pl.BlockSpec((W, W2), lambda n: (0, 0)),                    # U_W^T
        pl.BlockSpec((C_in, C_out, 1, 1), lambda n: (0, 0, 0, 0)),  # conv weight
        pl.BlockSpec((C_out, 1, 1), lambda n: (0, 0, 0)),           # conv bias
    ]
    cparams = pltpu.CompilerParams(dimension_semantics=("parallel",))

    # Pass 1: fused upsample+ReLU+conv, reduced to per-sample channel moments.
    sums, sqs = pl.pallas_call(
        _stats_kernel,
        out_shape=(jax.ShapeDtypeStruct((N, C_out, 1, 1), jnp.float32),
                   jax.ShapeDtypeStruct((N, C_out, 1, 1), jnp.float32)),
        grid=(N,),
        in_specs=common_in_specs,
        out_specs=(pl.BlockSpec((None, C_out, 1, 1), lambda n: (n, 0, 0, 0)),
                   pl.BlockSpec((None, C_out, 1, 1), lambda n: (n, 0, 0, 0))),
        compiler_params=cparams,
    )(x, uh, uwt, w_k, b_k)

    # Tiny cross-sample reduction + training-mode BN statistics in plain JAX.
    count = N * H2 * W2
    mean = jnp.sum(sums, axis=0) / count                    # (C_out, 1, 1)
    var = jnp.sum(sqs, axis=0) / count - mean * mean        # biased variance
    scale = gamma.reshape(C_out, 1, 1).astype(jnp.float32) * lax.rsqrt(var + EPS)
    beta_k = beta.reshape(C_out, 1, 1).astype(jnp.float32)

    # Pass 2: recompute y and normalize; output written once, directly NCHW.
    out = pl.pallas_call(
        _norm_kernel,
        out_shape=jax.ShapeDtypeStruct((N, C_out, H2, W2), jnp.float32),
        grid=(N,),
        in_specs=common_in_specs + [
            pl.BlockSpec((C_out, 1, 1), lambda n: (0, 0, 0)),   # mean
            pl.BlockSpec((C_out, 1, 1), lambda n: (0, 0, 0)),   # gamma * rsqrt(var+eps)
            pl.BlockSpec((C_out, 1, 1), lambda n: (0, 0, 0)),   # beta
        ],
        out_specs=pl.BlockSpec((None, C_out, H2, W2), lambda n: (n, 0, 0, 0)),
        compiler_params=cparams,
    )(x, uh, uwt, w_k, b_k, mean, scale, beta_k)
    return out


# ---------------- pure-JAX reference (PyTorch semantics) ----------------

def _upsample_bilinear2x_ref(x):
    def up_axis(v, size, axis):
        o = jnp.arange(2 * size)
        src = jnp.maximum((o + 0.5) / 2.0 - 0.5, 0.0)
        i0 = jnp.floor(src).astype(jnp.int32)
        i1 = jnp.minimum(i0 + 1, size - 1)
        lam = src - i0.astype(jnp.float32)
        v0 = jnp.take(v, i0, axis=axis)
        v1 = jnp.take(v, i1, axis=axis)
        shape = [1] * v.ndim
        shape[axis] = 2 * size
        lam = lam.reshape(shape)
        return v0 * (1.0 - lam) + v1 * lam

    _, _, H, W = x.shape
    x = up_axis(x, H, 2)
    x = up_axis(x, W, 3)
    return x


def reference_forward(x, weight, bias, gamma, beta):
    C_out, C_in = weight.shape[:2]
    u = jnp.maximum(_upsample_bilinear2x_ref(x), 0.0)
    y = jnp.einsum('nchw,oc->nohw', u, weight.reshape(C_out, C_in),
                   precision=_HIGHEST)
    y = y + bias.reshape(1, -1, 1, 1)
    mean = jnp.mean(y, axis=(0, 2, 3), keepdims=True)
    var = jnp.mean((y - mean) ** 2, axis=(0, 2, 3), keepdims=True)
    yn = (y - mean) * lax.rsqrt(var + EPS)
    return yn * gamma.reshape(1, -1, 1, 1) + beta.reshape(1, -1, 1, 1)


if __name__ == "__main__":
    # FactorizedIncrease(in_channel=4, out_channel=8) on a (2, 4, 16, 16) input.
    N, C_in, C_out, H, W = 2, 4, 8, 16, 16

    key = jax.random.PRNGKey(0)
    kx, kw, kb, kg, kbe = jax.random.split(key, 5)
    x = jax.random.normal(kx, (N, C_in, H, W), dtype=jnp.float32)
    weight = jax.random.normal(kw, (C_out, C_in, 1, 1), dtype=jnp.float32) * 0.2
    bias = jax.random.normal(kb, (C_out,), dtype=jnp.float32) * 0.1
    gamma = 1.0 + 0.1 * jax.random.normal(kg, (C_out,), dtype=jnp.float32)
    beta = 0.1 * jax.random.normal(kbe, (C_out,), dtype=jnp.float32)

    out = factorized_increase_forward(x, weight, bias, gamma, beta)
    out = jax.block_until_ready(out)

    ref = reference_forward(x, weight, bias, gamma, beta)
    assert out.shape == (N, C_out, 2 * H, 2 * W), out.shape
    assert jnp.allclose(out, ref, atol=1e-4, rtol=1e-4), \
        float(jnp.max(jnp.abs(out - ref)))
    print("KERNEL_OK")
</pallas_src>

<mosaic_0001>
module attributes {stable_mosaic.version = 11 : i64} {
  func.func private @main(%arg0: i32) attributes {dimension_semantics = [#tpu.dimension_semantics<core_parallel>], iteration_bounds = array<i64: 2>, tpu.core_type = #tpu.core_type<sc_scalar_subcore>, window_params = []} {
    return
  }
}

module attributes {stable_mosaic.version = 11 : i64} {
  func.func private @main(%arg0: i32) attributes {dimension_semantics = [#tpu.dimension_semantics<core_parallel>], iteration_bounds = array<i64: 2>, tpu.core_type = #tpu.core_type<sc_scalar_subcore>, window_params = []} {
    return
  }
}

module attributes {stable_mosaic.version = 11 : i64} {
  func.func @_stats_kernel(%arg0: i32, %arg1: memref<1x4x16x16xf32, #tpu.memory_space<vmem>>, %arg2: memref<32x16xf32, #tpu.memory_space<vmem>>, %arg3: memref<16x32xf32, #tpu.memory_space<vmem>>, %arg4: memref<4x8x1x1xf32, #tpu.memory_space<vmem>>, %arg5: memref<8x1x1xf32, #tpu.memory_space<vmem>>, %arg6: memref<1x8x1x1xf32, #tpu.memory_space<vmem>>, %arg7: memref<1x8x1x1xf32, #tpu.memory_space<vmem>>) attributes {dimension_semantics = [#tpu.dimension_semantics<parallel>], iteration_bounds = array<i64: 2>, scalar_prefetch = 0 : i64, scratch_operands = 0 : i64, tpu.core_type = #tpu.core_type<tc>, window_params = [{transform_indices = @transform_0, window_bounds = array<i64: 1, 4, 16, 16>}, {pipeline_mode = #tpu.pipeline_mode<synchronous>, transform_indices = @transform_1, window_bounds = array<i64: 32, 16>}, {pipeline_mode = #tpu.pipeline_mode<synchronous>, transform_indices = @transform_2, window_bounds = array<i64: 16, 32>}, {pipeline_mode = #tpu.pipeline_mode<synchronous>, transform_indices = @transform_3, window_bounds = array<i64: 4, 8, 1, 1>}, {pipeline_mode = #tpu.pipeline_mode<synchronous>, transform_indices = @transform_4, window_bounds = array<i64: 8, 1, 1>}, {transform_indices = @transform_5, window_bounds = array<i64: 1, 8, 1, 1>}, {transform_indices = @transform_6, window_bounds = array<i64: 1, 8, 1, 1>}]} {
    %c0 = arith.constant 0 : index
    %c0_0 = arith.constant 0 : index
    %0 = vector.load %arg2[%c0, %c0_0] : memref<32x16xf32, #tpu.memory_space<vmem>>, vector<32x16xf32>
    %c0_1 = arith.constant 0 : index
    %c0_2 = arith.constant 0 : index
    %1 = vector.load %arg3[%c0_1, %c0_2] : memref<16x32xf32, #tpu.memory_space<vmem>>, vector<16x32xf32>
    %c0_3 = arith.constant 0 : index
    %c0_4 = arith.constant 0 : index
    %c0_5 = arith.constant 0 : index
    %c0_6 = arith.constant 0 : index
    %2 = vector.load %arg1[%c0_3, %c0_4, %c0_5, %c0_6] : memref<1x4x16x16xf32, #tpu.memory_space<vmem>>, vector<1x1x16x16xf32>
    %3 = vector.shape_cast %2 : vector<1x1x16x16xf32> to vector<16x16xf32>
    %cst = arith.constant dense<0.000000e+00> : vector<16x32xf32>
    %4 = tpu.matmul %3, %1, %cst {dimension_numbers = #tpu.dot_dimension_numbers<[1], [0], [0], [1], [0, 0, 1, 1], [], []>, precision = #tpu.contract_precision<fp32>} : vector<16x16xf32>, vector<16x32xf32>, vector<16x32xf32> -> vector<16x32xf32>
    %cst_7 = arith.constant dense<0.000000e+00> : vector<32x32xf32>
    %5 = tpu.matmul %0, %4, %cst_7 {dimension_numbers = #tpu.dot_dimension_numbers<[1], [0], [0], [1], [0, 0, 1, 1], [], []>, precision = #tpu.contract_precision<fp32>} : vector<32x16xf32>, vector<16x32xf32>, vector<32x32xf32> -> vector<32x32xf32>
    %cst_8 = arith.constant 0.000000e+00 : f32
    %6 = vector.broadcast %cst_8 : f32 to vector<32x32xf32>
    %7 = arith.maximumf %5, %6 : vector<32x32xf32>
    %c0_9 = arith.constant 0 : index
    %c0_10 = arith.constant 0 : index
    %c0_11 = arith.constant 0 : index
    %c0_12 = arith.constant 0 : index
    %8 = vector.load %arg4[%c0_9, %c0_10, %c0_11, %c0_12] : memref<4x8x1x1xf32, #tpu.memory_space<vmem>>, vector<1x8x1x1xf32>
    %9 = vector.shape_cast %8 : vector<1x8x1x1xf32> to vector<8x1x1xf32>
    %10 = vector.shape_cast %7 : vector<32x32xf32> to vector<1x32x32xf32>
    %11 = vector.broadcast %9 : vector<8x1x1xf32> to vector<8x32x32xf32>
    %12 = vector.broadcast %10 : vector<1x32x32xf32> to vector<8x32x32xf32>
    %13 = arith.mulf %11, %12 : vector<8x32x32xf32>
    %c0_13 = arith.constant 0 : index
    %c1 = arith.constant 1 : index
    %c0_14 = arith.constant 0 : index
    %c0_15 = arith.constant 0 : index
    %14 = vector.load %arg1[%c0_13, %c1, %c0_14, %c0_15] : memref<1x4x16x16xf32, #tpu.memory_space<vmem>>, vector<1x1x16x16xf32>
    %15 = vector.shape_cast %14 : vector<1x1x16x16xf32> to vector<16x16xf32>
    %cst_16 = arith.constant dense<0.000000e+00> : vector<16x32xf32>
    %16 = tpu.matmul %15, %1, %cst_16 {dimension_numbers = #tpu.dot_dimension_numbers<[1], [0], [0], [1], [0, 0, 1, 1], [], []>, precision = #tpu.contract_precision<fp32>} : vector<16x16xf32>, vector<16x32xf32>, vector<16x32xf32> -> vector<16x32xf32>
    %cst_17 = arith.constant dense<0.000000e+00> : vector<32x32xf32>
    %17 = tpu.matmul %0, %16, %cst_17 {dimension_numbers = #tpu.dot_dimension_numbers<[1], [0], [0], [1], [0, 0, 1, 1], [], []>, precision = #tpu.contract_precision<fp32>} : vector<32x16xf32>, vector<16x32xf32>, vector<32x32xf32> -> vector<32x32xf32>
    %cst_18 = arith.constant 0.000000e+00 : f32
    %18 = vector.broadcast %cst_18 : f32 to vector<32x32xf32>
    %19 = arith.maximumf %17, %18 : vector<32x32xf32>
    %c1_19 = arith.constant 1 : index
    %c0_20 = arith.constant 0 : index
    %c0_21 = arith.constant 0 : index
    %c0_22 = arith.constant 0 : index
    %20 = vector.load %arg4[%c1_19, %c0_20, %c0_21, %c0_22] : memref<4x8x1x1xf32, #tpu.memory_space<vmem>>, vector<1x8x1x1xf32>
    %21 = vector.shape_cast %20 : vector<1x8x1x1xf32> to vector<8x1x1xf32>
    %22 = vector.shape_cast %19 : vector<32x32xf32> to vector<1x32x32xf32>
    %23 = vector.broadcast %21 : vector<8x1x1xf32> to vector<8x32x32xf32>
    %24 = vector.broadcast %22 : vector<1x32x32xf32> to vector<8x32x32xf32>
    %25 = arith.mulf %23, %24 : vector<8x32x32xf32>
    %26 = arith.addf %13, %25 : vector<8x32x32xf32>
    %c0_23 = arith.constant 0 : index
    %c2 = arith.constant 2 : index
    %c0_24 = arith.constant 0 : index
    %c0_25 = arith.constant 0 : index
    %27 = vector.load %arg1[%c0_23, %c2, %c0_24, %c0_25] : memref<1x4x16x16xf32, #tpu.memory_space<vmem>>, vector<1x1x16x16xf32>
    %28 = vector.shape_cast %27 : vector<1x1x16x16xf32> to vector<16x16xf32>
    %cst_26 = arith.constant dense<0.000000e+00> : vector<16x32xf32>
    %29 = tpu.matmul %28, %1, %cst_26 {dimension_numbers = #tpu.dot_dimension_numbers<[1], [0], [0], [1], [0, 0, 1, 1], [], []>, precision = #tpu.contract_precision<fp32>} : vector<16x16xf32>, vector<16x32xf32>, vector<16x32xf32> -> vector<16x32xf32>
    %cst_27 = arith.constant dense<0.000000e+00> : vector<32x32xf32>
    %30 = tpu.matmul %0, %29, %cst_27 {dimension_numbers = #tpu.dot_dimension_numbers<[1], [0], [0], [1], [0, 0, 1, 1], [], []>, precision = #tpu.contract_precision<fp32>} : vector<32x16xf32>, vector<16x32xf32>, vector<32x32xf32> -> vector<32x32xf32>
    %cst_28 = arith.constant 0.000000e+00 : f32
    %31 = vector.broadcast %cst_28 : f32 to vector<32x32xf32>
    %32 = arith.maximumf %30, %31 : vector<32x32xf32>
    %c2_29 = arith.constant 2 : index
    %c0_30 = arith.constant 0 : index
    %c0_31 = arith.constant 0 : index
    %c0_32 = arith.constant 0 : index
    %33 = vector.load %arg4[%c2_29, %c0_30, %c0_31, %c0_32] : memref<4x8x1x1xf32, #tpu.memory_space<vmem>>, vector<1x8x1x1xf32>
    %34 = vector.shape_cast %33 : vector<1x8x1x1xf32> to vector<8x1x1xf32>
    %35 = vector.shape_cast %32 : vector<32x32xf32> to vector<1x32x32xf32>
    %36 = vector.broadcast %34 : vector<8x1x1xf32> to vector<8x32x32xf32>
    %37 = vector.broadcast %35 : vector<1x32x32xf32> to vector<8x32x32xf32>
    %38 = arith.mulf %36, %37 : vector<8x32x32xf32>
    %39 = arith.addf %26, %38 : vector<8x32x32xf32>
    %c0_33 = arith.constant 0 : index
    %c3 = arith.constant 3 : index
    %c0_34 = arith.constant 0 : index
    %c0_35 = arith.constant 0 : index
    %40 = vector.load %arg1[%c0_33, %c3, %c0_34, %c0_35] : memref<1x4x16x16xf32, #tpu.memory_space<vmem>>, vector<1x1x16x16xf32>
    %41 = vector.shape_cast %40 : vector<1x1x16x16xf32> to vector<16x16xf32>
    %cst_36 = arith.constant dense<0.000000e+00> : vector<16x32xf32>
    %42 = tpu.matmul %41, %1, %cst_36 {dimension_numbers = #tpu.dot_dimension_numbers<[1], [0], [0], [1], [0, 0, 1, 1], [], []>, precision = #tpu.contract_precision<fp32>} : vector<16x16xf32>, vector<16x32xf32>, vector<16x32xf32> -> vector<16x32xf32>
    %cst_37 = arith.constant dense<0.000000e+00> : vector<32x32xf32>
    %43 = tpu.matmul %0, %42, %cst_37 {dimension_numbers = #tpu.dot_dimension_numbers<[1], [0], [0], [1], [0, 0, 1, 1], [], []>, precision = #tpu.contract_precision<fp32>} : vector<32x16xf32>, vector<16x32xf32>, vector<32x32xf32> -> vector<32x32xf32>
    %cst_38 = arith.constant 0.000000e+00 : f32
    %44 = vector.broadcast %cst_38 : f32 to vector<32x32xf32>
    %45 = arith.maximumf %43, %44 : vector<32x32xf32>
    %c3_39 = arith.constant 3 : index
    %c0_40 = arith.constant 0 : index
    %c0_41 = arith.constant 0 : index
    %c0_42 = arith.constant 0 : index
    %46 = vector.load %arg4[%c3_39, %c0_40, %c0_41, %c0_42] : memref<4x8x1x1xf32, #tpu.memory_space<vmem>>, vector<1x8x1x1xf32>
    %47 = vector.shape_cast %46 : vector<1x8x1x1xf32> to vector<8x1x1xf32>
    %48 = vector.shape_cast %45 : vector<32x32xf32> to vector<1x32x32xf32>
    %49 = vector.broadcast %47 : vector<8x1x1xf32> to vector<8x32x32xf32>
    %50 = vector.broadcast %48 : vector<1x32x32xf32> to vector<8x32x32xf32>
    %51 = arith.mulf %49, %50 : vector<8x32x32xf32>
    %52 = arith.addf %39, %51 : vector<8x32x32xf32>
    %c0_43 = arith.constant 0 : index
    %c0_44 = arith.constant 0 : index
    %c0_45 = arith.constant 0 : index
    %53 = vector.load %arg5[%c0_43, %c0_44, %c0_45] : memref<8x1x1xf32, #tpu.memory_space<vmem>>, vector<8x1x1xf32>
    %54 = vector.broadcast %53 : vector<8x1x1xf32> to vector<8x32x32xf32>
    %55 = arith.addf %52, %54 : vector<8x32x32xf32>
    %cst_46 = arith.constant dense<0.000000e+00> : vector<8x32xf32>
    %56 = vector.multi_reduction <add>, %55, %cst_46 [2] : vector<8x32x32xf32> to vector<8x32xf32>
    %57 = vector.shape_cast %56 : vector<8x32xf32> to vector<8x32x1xf32>
    %cst_47 = arith.constant dense<0.000000e+00> : vector<8x1xf32>
    %58 = vector.multi_reduction <add>, %57, %cst_47 [1] : vector<8x32x1xf32> to vector<8x1xf32>
    %59 = vector.shape_cast %58 : vector<8x1xf32> to vector<8x1x1xf32>
    %c0_48 = arith.constant 0 : index
    %c0_49 = arith.constant 0 : index
    %c0_50 = arith.constant 0 : index
    %c0_51 = arith.constant 0 : index
    %60 = vector.load %arg6[%c0_48, %c0_49, %c0_50, %c0_51] : memref<1x8x1x1xf32, #tpu.memory_space<vmem>>, vector<1x8x1x1xf32>
    %61 = vector.shape_cast %60 : vector<1x8x1x1xf32> to vector<8x1x1xf32>
    %62 = vector.shape_cast %59 : vector<8x1x1xf32> to vector<1x8x1x1xf32>
    tpu.vector_store %arg6[%c0_48, %c0_49, %c0_50, %c0_51], %62 {strides = array<i32>} : memref<1x8x1x1xf32, #tpu.memory_space<vmem>>, vector<1x8x1x1xf32>,
    %63 = arith.mulf %55, %55 : vector<8x32x32xf32>
    %cst_52 = arith.constant dense<0.000000e+00> : vector<8x32xf32>
    %64 = vector.multi_reduction <add>, %63, %cst_52 [2] : vector<8x32x32xf32> to vector<8x32xf32>
    %65 = vector.shape_cast %64 : vector<8x32xf32> to vector<8x32x1xf32>
    %cst_53 = arith.constant dense<0.000000e+00> : vector<8x1xf32>
    %66 = vector.multi_reduction <add>, %65, %cst_53 [1] : vector<8x32x1xf32> to vector<8x1xf32>
    %67 = vector.shape_cast %66 : vector<8x1xf32> to vector<8x1x1xf32>
    %c0_54 = arith.constant 0 : index
    %c0_55 = arith.constant 0 : index
    %c0_56 = arith.constant 0 : index
    %c0_57 = arith.constant 0 : index
    %68 = vector.load %arg7[%c0_54, %c0_55, %c0_56, %c0_57] : memref<1x8x1x1xf32, #tpu.memory_space<vmem>>, vector<1x8x1x1xf32>
    %69 = vector.shape_cast %68 : vector<1x8x1x1xf32> to vector<8x1x1xf32>
    %70 = vector.shape_cast %67 : vector<8x1x1xf32> to vector<1x8x1x1xf32>
    tpu.vector_store %arg7[%c0_54, %c0_55, %c0_56, %c0_57], %70 {strides = array<i32>} : memref<1x8x1x1xf32, #tpu.memory_space<vmem>>, vector<1x8x1x1xf32>,
    return
  }
  func.func @transform_0(%arg0: i32) -> (i32, i32, i32, i32) {
    %c0_i32 = arith.constant 0 : i32
    %c0_i32_0 = arith.constant 0 : i32
    %c0_i32_1 = arith.constant 0 : i32
    %c0_i32_2 = arith.constant 0 : i32
    return %arg0, %c0_i32, %c0_i32_0, %c0_i32_1 : i32, i32, i32, i32
  }
  func.func @transform_1(%arg0: i32) -> (i32, i32) {
    %c0_i32 = arith.constant 0 : i32
    %c0_i32_0 = arith.constant 0 : i32
    %c0_i32_1 = arith.constant 0 : i32
    return %c0_i32, %c0_i32_0 : i32, i32
  }
  func.func @transform_2(%arg0: i32) -> (i32, i32) {
    %c0_i32 = arith.constant 0 : i32
    %c0_i32_0 = arith.constant 0 : i32
    %c0_i32_1 = arith.constant 0 : i32
    return %c0_i32, %c0_i32_0 : i32, i32
  }
  func.func @transform_3(%arg0: i32) -> (i32, i32, i32, i32) {
    %c0_i32 = arith.constant 0 : i32
    %c0_i32_0 = arith.constant 0 : i32
    %c0_i32_1 = arith.constant 0 : i32
    %c0_i32_2 = arith.constant 0 : i32
    %c0_i32_3 = arith.constant 0 : i32
    return %c0_i32, %c0_i32_0, %c0_i32_1, %c0_i32_2 : i32, i32, i32, i32
  }
  func.func @transform_4(%arg0: i32) -> (i32, i32, i32) {
    %c0_i32 = arith.constant 0 : i32
    %c0_i32_0 = arith.constant 0 : i32
    %c0_i32_1 = arith.constant 0 : i32
    %c0_i32_2 = arith.constant 0 : i32
    return %c0_i32, %c0_i32_0, %c0_i32_1 : i32, i32, i32
  }
  func.func @transform_5(%arg0: i32) -> (i32, i32, i32, i32) {
    %c0_i32 = arith.constant 0 : i32
    %c0_i32_0 = arith.constant 0 : i32
    %c0_i32_1 = arith.constant 0 : i32
    %c0_i32_2 = arith.constant 0 : i32
    return %arg0, %c0_i32, %c0_i32_0, %c0_i32_1 : i32, i32, i32, i32
  }
  func.func @transform_6(%arg0: i32) -> (i32, i32, i32, i32) {
    %c0_i32 = arith.constant 0 : i32
    %c0_i32_0 = arith.constant 0 : i32
    %c0_i32_1 = arith.constant 0 : i32
    %c0_i32_2 = arith.constant 0 : i32
    return %arg0, %c0_i32, %c0_i32_0, %c0_i32_1 : i32, i32, i32, i32
  }
}

module attributes {stable_mosaic.version = 11 : i64} {
  func.func @_norm_kernel(%arg0: i32, %arg1: memref<1x4x16x16xf32, #tpu.memory_space<vmem>>, %arg2: memref<32x16xf32, #tpu.memory_space<vmem>>, %arg3: memref<16x32xf32, #tpu.memory_space<vmem>>, %arg4: memref<4x8x1x1xf32, #tpu.memory_space<vmem>>, %arg5: memref<8x1x1xf32, #tpu.memory_space<vmem>>, %arg6: memref<8x1x1xf32, #tpu.memory_space<vmem>>, %arg7: memref<8x1x1xf32, #tpu.memory_space<vmem>>, %arg8: memref<8x1x1xf32, #tpu.memory_space<vmem>>, %arg9: memref<1x8x32x32xf32, #tpu.memory_space<vmem>>) attributes {dimension_semantics = [#tpu.dimension_semantics<parallel>], iteration_bounds = array<i64: 2>, scalar_prefetch = 0 : i64, scratch_operands = 0 : i64, tpu.core_type = #tpu.core_type<tc>, window_params = [{transform_indices = @transform_0, window_bounds = array<i64: 1, 4, 16, 16>}, {pipeline_mode = #tpu.pipeline_mode<synchronous>, transform_indices = @transform_1, window_bounds = array<i64: 32, 16>}, {pipeline_mode = #tpu.pipeline_mode<synchronous>, transform_indices = @transform_2, window_bounds = array<i64: 16, 32>}, {pipeline_mode = #tpu.pipeline_mode<synchronous>, transform_indices = @transform_3, window_bounds = array<i64: 4, 8, 1, 1>}, {pipeline_mode = #tpu.pipeline_mode<synchronous>, transform_indices = @transform_4, window_bounds = array<i64: 8, 1, 1>}, {pipeline_mode = #tpu.pipeline_mode<synchronous>, transform_indices = @transform_5, window_bounds = array<i64: 8, 1, 1>}, {pipeline_mode = #tpu.pipeline_mode<synchronous>, transform_indices = @transform_6, window_bounds = array<i64: 8, 1, 1>}, {pipeline_mode = #tpu.pipeline_mode<synchronous>, transform_indices = @transform_7, window_bounds = array<i64: 8, 1, 1>}, {transform_indices = @transform_8, window_bounds = array<i64: 1, 8, 32, 32>}]} {
    %c0 = arith.constant 0 : index
    %c0_0 = arith.constant 0 : index
    %0 = vector.load %arg2[%c0, %c0_0] : memref<32x16xf32, #tpu.memory_space<vmem>>, vector<32x16xf32>
    %c0_1 = arith.constant 0 : index
    %c0_2 = arith.constant 0 : index
    %1 = vector.load %arg3[%c0_1, %c0_2] : memref<16x32xf32, #tpu.memory_space<vmem>>, vector<16x32xf32>
    %c0_3 = arith.constant 0 : index
    %c0_4 = arith.constant 0 : index
    %c0_5 = arith.constant 0 : index
    %c0_6 = arith.constant 0 : index
    %2 = vector.load %arg1[%c0_3, %c0_4, %c0_5, %c0_6] : memref<1x4x16x16xf32, #tpu.memory_space<vmem>>, vector<1x1x16x16xf32>
    %3 = vector.shape_cast %2 : vector<1x1x16x16xf32> to vector<16x16xf32>
    %cst = arith.constant dense<0.000000e+00> : vector<16x32xf32>
    %4 = tpu.matmul %3, %1, %cst {dimension_numbers = #tpu.dot_dimension_numbers<[1], [0], [0], [1], [0, 0, 1, 1], [], []>, precision = #tpu.contract_precision<fp32>} : vector<16x16xf32>, vector<16x32xf32>, vector<16x32xf32> -> vector<16x32xf32>
    %cst_7 = arith.constant dense<0.000000e+00> : vector<32x32xf32>
    %5 = tpu.matmul %0, %4, %cst_7 {dimension_numbers = #tpu.dot_dimension_numbers<[1], [0], [0], [1], [0, 0, 1, 1], [], []>, precision = #tpu.contract_precision<fp32>} : vector<32x16xf32>, vector<16x32xf32>, vector<32x32xf32> -> vector<32x32xf32>
    %cst_8 = arith.constant 0.000000e+00 : f32
    %6 = vector.broadcast %cst_8 : f32 to vector<32x32xf32>
    %7 = arith.maximumf %5, %6 : vector<32x32xf32>
    %c0_9 = arith.constant 0 : index
    %c0_10 = arith.constant 0 : index
    %c0_11 = arith.constant 0 : index
    %c0_12 = arith.constant 0 : index
    %8 = vector.load %arg4[%c0_9, %c0_10, %c0_11, %c0_12] : memref<4x8x1x1xf32, #tpu.memory_space<vmem>>, vector<1x8x1x1xf32>
    %9 = vector.shape_cast %8 : vector<1x8x1x1xf32> to vector<8x1x1xf32>
    %10 = vector.shape_cast %7 : vector<32x32xf32> to vector<1x32x32xf32>
    %11 = vector.broadcast %9 : vector<8x1x1xf32> to vector<8x32x32xf32>
    %12 = vector.broadcast %10 : vector<1x32x32xf32> to vector<8x32x32xf32>
    %13 = arith.mulf %11, %12 : vector<8x32x32xf32>
    %c0_13 = arith.constant 0 : index
    %c1 = arith.constant 1 : index
    %c0_14 = arith.constant 0 : index
    %c0_15 = arith.constant 0 : index
    %14 = vector.load %arg1[%c0_13, %c1, %c0_14, %c0_15] : memref<1x4x16x16xf32, #tpu.memory_space<vmem>>, vector<1x1x16x16xf32>
    %15 = vector.shape_cast %14 : vector<1x1x16x16xf32> to vector<16x16xf32>
    %cst_16 = arith.constant dense<0.000000e+00> : vector<16x32xf32>
    %16 = tpu.matmul %15, %1, %cst_16 {dimension_numbers = #tpu.dot_dimension_numbers<[1], [0], [0], [1], [0, 0, 1, 1], [], []>, precision = #tpu.contract_precision<fp32>} : vector<16x16xf32>, vector<16x32xf32>, vector<16x32xf32> -> vector<16x32xf32>
    %cst_17 = arith.constant dense<0.000000e+00> : vector<32x32xf32>
    %17 = tpu.matmul %0, %16, %cst_17 {dimension_numbers = #tpu.dot_dimension_numbers<[1], [0], [0], [1], [0, 0, 1, 1], [], []>, precision = #tpu.contract_precision<fp32>} : vector<32x16xf32>, vector<16x32xf32>, vector<32x32xf32> -> vector<32x32xf32>
    %cst_18 = arith.constant 0.000000e+00 : f32
    %18 = vector.broadcast %cst_18 : f32 to vector<32x32xf32>
    %19 = arith.maximumf %17, %18 : vector<32x32xf32>
    %c1_19 = arith.constant 1 : index
    %c0_20 = arith.constant 0 : index
    %c0_21 = arith.constant 0 : index
    %c0_22 = arith.constant 0 : index
    %20 = vector.load %arg4[%c1_19, %c0_20, %c0_21, %c0_22] : memref<4x8x1x1xf32, #tpu.memory_space<vmem>>, vector<1x8x1x1xf32>
    %21 = vector.shape_cast %20 : vector<1x8x1x1xf32> to vector<8x1x1xf32>
    %22 = vector.shape_cast %19 : vector<32x32xf32> to vector<1x32x32xf32>
    %23 = vector.broadcast %21 : vector<8x1x1xf32> to vector<8x32x32xf32>
    %24 = vector.broadcast %22 : vector<1x32x32xf32> to vector<8x32x32xf32>
    %25 = arith.mulf %23, %24 : vector<8x32x32xf32>
    %26 = arith.addf %13, %25 : vector<8x32x32xf32>
    %c0_23 = arith.constant 0 : index
    %c2 = arith.constant 2 : index
    %c0_24 = arith.constant 0 : index
    %c0_25 = arith.constant 0 : index
    %27 = vector.load %arg1[%c0_23, %c2, %c0_24, %c0_25] : memref<1x4x16x16xf32, #tpu.memory_space<vmem>>, vector<1x1x16x16xf32>
    %28 = vector.shape_cast %27 : vector<1x1x16x16xf32> to vector<16x16xf32>
    %cst_26 = arith.constant dense<0.000000e+00> : vector<16x32xf32>
    %29 = tpu.matmul %28, %1, %cst_26 {dimension_numbers = #tpu.dot_dimension_numbers<[1], [0], [0], [1], [0, 0, 1, 1], [], []>, precision = #tpu.contract_precision<fp32>} : vector<16x16xf32>, vector<16x32xf32>, vector<16x32xf32> -> vector<16x32xf32>
    %cst_27 = arith.constant dense<0.000000e+00> : vector<32x32xf32>
    %30 = tpu.matmul %0, %29, %cst_27 {dimension_numbers = #tpu.dot_dimension_numbers<[1], [0], [0], [1], [0, 0, 1, 1], [], []>, precision = #tpu.contract_precision<fp32>} : vector<32x16xf32>, vector<16x32xf32>, vector<32x32xf32> -> vector<32x32xf32>
    %cst_28 = arith.constant 0.000000e+00 : f32
    %31 = vector.broadcast %cst_28 : f32 to vector<32x32xf32>
    %32 = arith.maximumf %30, %31 : vector<32x32xf32>
    %c2_29 = arith.constant 2 : index
    %c0_30 = arith.constant 0 : index
    %c0_31 = arith.constant 0 : index
    %c0_32 = arith.constant 0 : index
    %33 = vector.load %arg4[%c2_29, %c0_30, %c0_31, %c0_32] : memref<4x8x1x1xf32, #tpu.memory_space<vmem>>, vector<1x8x1x1xf32>
    %34 = vector.shape_cast %33 : vector<1x8x1x1xf32> to vector<8x1x1xf32>
    %35 = vector.shape_cast %32 : vector<32x32xf32> to vector<1x32x32xf32>
    %36 = vector.broadcast %34 : vector<8x1x1xf32> to vector<8x32x32xf32>
    %37 = vector.broadcast %35 : vector<1x32x32xf32> to vector<8x32x32xf32>
    %38 = arith.mulf %36, %37 : vector<8x32x32xf32>
    %39 = arith.addf %26, %38 : vector<8x32x32xf32>
    %c0_33 = arith.constant 0 : index
    %c3 = arith.constant 3 : index
    %c0_34 = arith.constant 0 : index
    %c0_35 = arith.constant 0 : index
    %40 = vector.load %arg1[%c0_33, %c3, %c0_34, %c0_35] : memref<1x4x16x16xf32, #tpu.memory_space<vmem>>, vector<1x1x16x16xf32>
    %41 = vector.shape_cast %40 : vector<1x1x16x16xf32> to vector<16x16xf32>
    %cst_36 = arith.constant dense<0.000000e+00> : vector<16x32xf32>
    %42 = tpu.matmul %41, %1, %cst_36 {dimension_numbers = #tpu.dot_dimension_numbers<[1], [0], [0], [1], [0, 0, 1, 1], [], []>, precision = #tpu.contract_precision<fp32>} : vector<16x16xf32>, vector<16x32xf32>, vector<16x32xf32> -> vector<16x32xf32>
    %cst_37 = arith.constant dense<0.000000e+00> : vector<32x32xf32>
    %43 = tpu.matmul %0, %42, %cst_37 {dimension_numbers = #tpu.dot_dimension_numbers<[1], [0], [0], [1], [0, 0, 1, 1], [], []>, precision = #tpu.contract_precision<fp32>} : vector<32x16xf32>, vector<16x32xf32>, vector<32x32xf32> -> vector<32x32xf32>
    %cst_38 = arith.constant 0.000000e+00 : f32
    %44 = vector.broadcast %cst_38 : f32 to vector<32x32xf32>
    %45 = arith.maximumf %43, %44 : vector<32x32xf32>
    %c3_39 = arith.constant 3 : index
    %c0_40 = arith.constant 0 : index
    %c0_41 = arith.constant 0 : index
    %c0_42 = arith.constant 0 : index
    %46 = vector.load %arg4[%c3_39, %c0_40, %c0_41, %c0_42] : memref<4x8x1x1xf32, #tpu.memory_space<vmem>>, vector<1x8x1x1xf32>
    %47 = vector.shape_cast %46 : vector<1x8x1x1xf32> to vector<8x1x1xf32>
    %48 = vector.shape_cast %45 : vector<32x32xf32> to vector<1x32x32xf32>
    %49 = vector.broadcast %47 : vector<8x1x1xf32> to vector<8x32x32xf32>
    %50 = vector.broadcast %48 : vector<1x32x32xf32> to vector<8x32x32xf32>
    %51 = arith.mulf %49, %50 : vector<8x32x32xf32>
    %52 = arith.addf %39, %51 : vector<8x32x32xf32>
    %c0_43 = arith.constant 0 : index
    %c0_44 = arith.constant 0 : index
    %c0_45 = arith.constant 0 : index
    %53 = vector.load %arg5[%c0_43, %c0_44, %c0_45] : memref<8x1x1xf32, #tpu.memory_space<vmem>>, vector<8x1x1xf32>
    %54 = vector.broadcast %53 : vector<8x1x1xf32> to vector<8x32x32xf32>
    %55 = arith.addf %52, %54 : vector<8x32x32xf32>
    %c0_46 = arith.constant 0 : index
    %c0_47 = arith.constant 0 : index
    %c0_48 = arith.constant 0 : index
    %56 = vector.load %arg6[%c0_46, %c0_47, %c0_48] : memref<8x1x1xf32, #tpu.memory_space<vmem>>, vector<8x1x1xf32>
    %57 = vector.broadcast %56 : vector<8x1x1xf32> to vector<8x32x32xf32>
    %58 = arith.subf %55, %57 : vector<8x32x32xf32>
    %c0_49 = arith.constant 0 : index
    %c0_50 = arith.constant 0 : index
    %c0_51 = arith.constant 0 : index
    %59 = vector.load %arg7[%c0_49, %c0_50, %c0_51] : memref<8x1x1xf32, #tpu.memory_space<vmem>>, vector<8x1x1xf32>
    %60 = vector.broadcast %59 : vector<8x1x1xf32> to vector<8x32x32xf32>
    %61 = arith.mulf %58, %60 : vector<8x32x32xf32>
    %c0_52 = arith.constant 0 : index
    %c0_53 = arith.constant 0 : index
    %c0_54 = arith.constant 0 : index
    %62 = vector.load %arg8[%c0_52, %c0_53, %c0_54] : memref<8x1x1xf32, #tpu.memory_space<vmem>>, vector<8x1x1xf32>
    %63 = vector.broadcast %62 : vector<8x1x1xf32> to vector<8x32x32xf32>
    %64 = arith.addf %61, %63 : vector<8x32x32xf32>
    %c0_55 = arith.constant 0 : index
    %c0_56 = arith.constant 0 : index
    %c0_57 = arith.constant 0 : index
    %c0_58 = arith.constant 0 : index
    %65 = vector.load %arg9[%c0_55, %c0_56, %c0_57, %c0_58] : memref<1x8x32x32xf32, #tpu.memory_space<vmem>>, vector<1x8x32x32xf32>
    %66 = vector.shape_cast %65 : vector<1x8x32x32xf32> to vector<8x32x32xf32>
    %67 = vector.shape_cast %64 : vector<8x32x32xf32> to vector<1x8x32x32xf32>
    tpu.vector_store %arg9[%c0_55, %c0_56, %c0_57, %c0_58], %67 {strides = array<i32>} : memref<1x8x32x32xf32, #tpu.memory_space<vmem>>, vector<1x8x32x32xf32>,
    return
  }
  func.func @transform_0(%arg0: i32) -> (i32, i32, i32, i32) {
    %c0_i32 = arith.constant 0 : i32
    %c0_i32_0 = arith.constant 0 : i32
    %c0_i32_1 = arith.constant 0 : i32
    %c0_i32_2 = arith.constant 0 : i32
    return %arg0, %c0_i32, %c0_i32_0, %c0_i32_1 : i32, i32, i32, i32
  }
  func.func @transform_1(%arg0: i32) -> (i32, i32) {
    %c0_i32 = arith.constant 0 : i32
    %c0_i32_0 = arith.constant 0 : i32
    %c0_i32_1 = arith.constant 0 : i32
    return %c0_i32, %c0_i32_0 : i32, i32
  }
  func.func @transform_2(%arg0: i32) -> (i32, i32) {
    %c0_i32 = arith.constant 0 : i32
    %c0_i32_0 = arith.constant 0 : i32
    %c0_i32_1 = arith.constant 0 : i32
    return %c0_i32, %c0_i32_0 : i32, i32
  }
  func.func @transform_3(%arg0: i32) -> (i32, i32, i32, i32) {
    %c0_i32 = arith.constant 0 : i32
    %c0_i32_0 = arith.constant 0 : i32
    %c0_i32_1 = arith.constant 0 : i32
    %c0_i32_2 = arith.constant 0 : i32
    %c0_i32_3 = arith.constant 0 : i32
    return %c0_i32, %c0_i32_0, %c0_i32_1, %c0_i32_2 : i32, i32, i32, i32
  }
  func.func @transform_4(%arg0: i32) -> (i32, i32, i32) {
    %c0_i32 = arith.constant 0 : i32
    %c0_i32_0 = arith.constant 0 : i32
    %c0_i32_1 = arith.constant 0 : i32
    %c0_i32_2 = arith.constant 0 : i32
    return %c0_i32, %c0_i32_0, %c0_i32_1 : i32, i32, i32
  }
  func.func @transform_5(%arg0: i32) -> (i32, i32, i32) {
    %c0_i32 = arith.constant 0 : i32
    %c0_i32_0 = arith.constant 0 : i32
    %c0_i32_1 = arith.constant 0 : i32
    %c0_i32_2 = arith.constant 0 : i32
    return %c0_i32, %c0_i32_0, %c0_i32_1 : i32, i32, i32
  }
  func.func @transform_6(%arg0: i32) -> (i32, i32, i32) {
    %c0_i32 = arith.constant 0 : i32
    %c0_i32_0 = arith.constant 0 : i32
    %c0_i32_1 = arith.constant 0 : i32
    %c0_i32_2 = arith.constant 0 : i32
    return %c0_i32, %c0_i32_0, %c0_i32_1 : i32, i32, i32
  }
  func.func @transform_7(%arg0: i32) -> (i32, i32, i32) {
    %c0_i32 = arith.constant 0 : i32
    %c0_i32_0 = arith.constant 0 : i32
    %c0_i32_1 = arith.constant 0 : i32
    %c0_i32_2 = arith.constant 0 : i32
    return %c0_i32, %c0_i32_0, %c0_i32_1 : i32, i32, i32
  }
  func.func @transform_8(%arg0: i32) -> (i32, i32, i32, i32) {
    %c0_i32 = arith.constant 0 : i32
    %c0_i32_0 = arith.constant 0 : i32
    %c0_i32_1 = arith.constant 0 : i32
    %c0_i32_2 = arith.constant 0 : i32
    return %arg0, %c0_i32, %c0_i32_0, %c0_i32_1 : i32, i32, i32, i32
  }
}

</mosaic_0001>

<bundles_post_ra>
// kernel: factorized_increase_forward.3
= control target key start
LH: loop header
LB: loop body
LE: loop exit
PB: predicated region body
PF: predicated region fallthrough
CT: control target
= control target key end

     0   :  { %13 = vsyncpa [#allocation3], 0  ;;  %s8286_s0 = inlined_call_operand.vmem [shape: f32[2,4,16,16], index: 0, kind: input, shape index: {}]   ;;  %s8287_s1 = inlined_call_operand.vmem [shape: f32[32,16], index: 1, kind: input, shape index: {}]   ;;  %s8288_s2 = inlined_call_operand.vmem [shape: f32[16,32], index: 2, kind: input, shape index: {}]   ;;  %s8289_s3 = inlined_call_operand.vmem [shape: f32[4,8,1,1], index: 3, kind: input, shape index: {}]   ;;  %s8290_s4 = inlined_call_operand.vmem [shape: f32[8,1,1], index: 4, kind: input, shape index: {}]   ;;  %s8291_s5 = inlined_call_operand.vmem [shape: f32[8,1,1], index: 5, kind: input, shape index: {}]   ;;  %s8292_s6 = inlined_call_operand.vmem [shape: f32[8,1,1], index: 6, kind: input, shape index: {}]   ;;  %s8293_s7 = inlined_call_operand.vmem [shape: f32[8,1,1], index: 7, kind: input, shape index: {}]   ;;  %s8294_s8 = inlined_call_operand.hbm [shape: f32[2,8,32,32], index: 8, kind: output, shape index: {}]  }
   0x1   :  { %15 = vsyncpa [#allocation3 + $0x1], 0  ;;  %s7063_s27 = smov 0   ;;  %s7065_s28 = smov 0  }
   0x2   :  { %s7067_s29 = smov 0   ;;  %s7069_s30 = smov 0  }
   0x3 LB: > { %s7084_s9 = sadd.s32 4294967295, %s7012_s30   ;;  %s5838_s10 = sadd.s32 4294967294, %s7012_s30   ;;  %s7012_s30 = sphi %s7069_s30, %s8560_s30   ;;  %s7008_s29 = sphi %s7067_s29, %s8559_s29   ;;  %s7004_s28 = sphi %s7065_s28, %s8558_s28   ;;  %s7000_s27 = sphi %s7063_s27, %s8557_s27  }
   0x4   : > { %s7088_s11 = sadd.s32 1, %s7012_s30   ;;  %s201_s12 = sadd.s32 1, %s7008_s29 }
   0x5   : > { %s198_s13 = ssub.s32 %s7012_s30, %s7088_s11  ;;  %p211_p0 = scmp.ne.s32.totalorder %s7008_s29, %s7004_s28 }
   0x6   : > { %p199_p1 = scmp.eq.s32.totalorder %s198_s13, 0  ;;  %p212_p2 = scmp.eq.s32.totalorder %s7084_s9, 1 }
   0x7   : > { %p217_p3 = scmp.ne.s32.totalorder %s7004_s28, %s7000_s27  ;;  %p218_p4 = scmp.eq.s32.totalorder %s5838_s10, 1 }
   0x8   : > { %s7099_s14 = scalar_select %p199_p1, %s7008_s29, %s201_s12  }
   0x9   : > { %p7101_p5 = por %p212_p2, %p211_p0  ;;  %p7105_p6 = por %p218_p4, %p217_p3 }
   0xa   : > { %p5841_p7 = scmp.ge.s32.totalorder %s7012_s30, 1  ;;  %p265_p8 = scmp.lt.s32.totalorder %s7012_s30, 3 }
   0xc   : > { %p266_p9 = pnand %p5841_p7, %p265_p8 }
   0xe   : > { %269 = sbr.rel (%p266_p9) target bundleno = 972 (0x3cc), region = 52 }
  0x15   : > { %v308_v0 = vld [vmem:[%s8288_s2] sm:$0xff]  ;;  %v309_v1 = vld [vmem:[%s8288_s2 + $0x8] sm:$0xff]  ;;  %p299_p10 = scmp.lt.s32.totalorder %s7084_s9, 1  ;;  %vm312_vm0 = vcmask 130048   ;;  %v306_v52 = vld [vmem:[%s8287_s1 + $0x10] sm:$0xff]  ;;  %vm5729_vm1 = vcmask 261120  }
  0x16   : > { %v320_v2 = vand.u32 4294901760, %v308_v0  ;;  %v323_v3 = vand.u32 4294901760, %v309_v1  ;;  %v304_v44 = vld [vmem:[%s8287_s1] sm:$0xff]  ;;  %v305_v51 = vld [vmem:[%s8287_s1 + $0x8] sm:$0xff]  ;;  %v828_v54 = vsel %vm312_vm0, %v306_v52, 0  ;;  %v307_v55 = vld [vmem:[%s8287_s1 + $0x18] sm:$0xff] }
  0x17   : > { %s300_s21 = scalar_select %p299_p10, %s7084_s9, 1  ;;  %v822_v45 = vsel %vm312_vm0, %v304_v44, 0  ;;  %v825_v53 = vsel %vm312_vm0, %v305_v51, 0  ;;  %v7195_v57 = vand.u32 4294901760, %v828_v54  ;;  %v831_v58 = vsel %vm312_vm0, %v307_v55, 0 }
  0x18   : > { %v7119_v4 = vpack.c.bf16 %v323_v3, %v320_v2  ;;  %v408_v5 = vsub.f32 %v308_v0, %v320_v2  ;;  %v415_v6 = vsub.f32 %v309_v1, %v323_v3  ;;  %v7168_v46 = vand.u32 4294901760, %v822_v45  ;;  %v5847_v61 = vld [vmem:[%s8289_s3 + $0x2] ss:$0 sm:$0xff]  ;;  %v5845_v62 = vld [vmem:[%s8289_s3] ss:$0 sm:$0xff]  ;;  %s5945_s24 = sshll.u32 %s7084_s9, 12 }
  0x19   : > { %s5944_s22 = sshll.u32 %s300_s21, 6  ;;  %v7193_v56 = vand.u32 4294901760, %v825_v53  ;;  %8377 = vst [vmem:[#allocation9_spill] sm:$0xff] %v7195_v57  ;;  %v7201_v60 = vand.u32 4294901760, %v831_v58  ;;  %v7210_v63 = vsub.f32 %v828_v54, %v7195_v57  ;;  %v7014_v0 = vmov 0   ;;  %s296_s21 = sand.u32 1, %s7004_s28  }
  0x1a   : > { %6595 = vmatprep.subr.bf16.mxu0 %v7119_v4  ;;  %s7125_s25 = scalar_lea.vmem %s8286_s0, %s5944_s22  ;;  %v409_v7 = vand.u32 4294901760, %v408_v5  ;;  %v416_v8 = vand.u32 4294901760, %v415_v6  ;;  %v7135_v28 = vpack.c.bf16 %v415_v6, %v408_v5  ;;  %8373 = vst [vmem:[#allocation5_spill] sm:$0xff] %v7168_v46  ;;  %v7171_v47 = vsub.f32 %v822_v45, %v7168_v46  ;;  %6949 = vset.pattern.permute.xlu1 %v7014_v0  ;;  %v5848_v1 = vld [vmem:[%s8289_s3 + $0x3] ss:$0 sm:$0xff]  ;;  %s7919_s22 = sshll.u32 %s296_s21, 8 }
  0x1b   : > { %6597 = vmatpush3.bf16.msra.mxu0 %v7119_v4  ;;  %v310_v9 = vld [vmem:[%s7125_s25] sm:$0xff]  ;;  %v311_v10 = vld [vmem:[%s7125_s25 + $0x8] sm:$0xff]  ;;  %v5853_v30 = vld [vmem:[%s7125_s25 + $0x10] sm:$0xff]  ;;  %8376 = vst [vmem:[#allocation8_spill] sm:$0xff] %v7193_v56  ;;  %v7199_v59 = vsub.f32 %v825_v53, %v7193_v56  ;;  %6948 = vset.pattern.permute.xlu0 %v7014_v0  ;;  %s7958_s23 = scalar_lea.vmem [#allocation2], %s7919_s22  ;;  %s8219_s12 = scalar_lea.hbm %s8294_s8, %s5945_s24 }
  0x1c   : > { %v314_v11 = vsel %vm312_vm0, %v310_v9, 0  ;;  %v317_v12 = vsel %vm312_vm0, %v311_v10, 0  ;;  %v410_v13 = vsub.f32 %v408_v5, %v409_v7  ;;  %v417_v14 = vsub.f32 %v415_v6, %v416_v8  ;;  %v5854_v32 = vld [vmem:[%s7125_s25 + $0x18] sm:$0xff]  ;;  %8374 = vst [vmem:[#allocation6_spill] sm:$0xff] %v7171_v47  ;;  %8379 = vst [vmem:[#allocation11_spill] sm:$0xff] %v7201_v60  ;;  %1482 = vperm.xlu1 %6949, %v5847_v61   ;;  %v5889_v0 = vld [vmem:[%s7125_s25 + $0x30] sm:$0xff] }
  0x1d   : > { %v386_v15 = vand.u32 4294901760, %v314_v11  ;;  %v396_v16 = vand.u32 4294901760, %v317_v12  ;;  %v7141_v29 = vpack.c.bf16 %v416_v8, %v409_v7  ;;  %v1541_v31 = vsel %vm312_vm0, %v5853_v30, 0  ;;  %8378 = vst [vmem:[#allocation10_spill] sm:$0xff] %v7199_v59  ;;  %8380 = vst [vmem:[#allocation12_spill] sm:$0xff] %v7210_v63  ;;  %1474 = vperm.xlu0 %6948, %v5845_v62   ;;  %s5776_s26 = sshll.u32 %s7958_s23, 4  ;;  %s8221_s26 = int_to_ptr.vmem [resolvable:$true] %s5776_s26 }
  0x1e   : > { %v411_v17 = vand.u32 4294901760, %v410_v13  ;;  %v418_v18 = vand.u32 4294901760, %v417_v14  ;;  %v1613_v33 = vand.u32 4294901760, %v1541_v31  ;;  %v1544_v34 = vsel %vm312_vm0, %v5854_v32, 0  ;;  %v5846_v2 = vld [vmem:[%s8289_s3 + $0x1] ss:$0 sm:$0xff] }
  0x1f   : > { %v387_v19 = vsub.f32 %v314_v11, %v386_v15  ;;  %v397_v20 = vsub.f32 %v317_v12, %v396_v16  ;;  %v1623_v35 = vand.u32 4294901760, %v1544_v34  ;;  %v7174_v48 = vand.u32 4294901760, %v7171_v47  ;;  %v5850_v10 = vld [vmem:[%s8289_s3 + $0x5] ss:$0 sm:$0xff]  ;;  %v5849_v11 = vld [vmem:[%s8289_s3 + $0x4] ss:$0 sm:$0xff] }
  0x20   : > { %v7132_v21 = vpack.c.bf16 %v418_v18, %v411_v17  ;;  %v1614_v36 = vsub.f32 %v1541_v31, %v1613_v33  ;;  %v7219_v3 = vand.u32 4294901760, %v7199_v59  ;;  %v7222_v5 = vsub.f32 %v831_v58, %v7201_v60  ;;  %1486 = vperm.xlu1 %6949, %v5848_v1   ;;  %v5869_v44 = vld [vmem:[%s8289_s3 + $0xe] ss:$0 sm:$0xff]  ;;  %s8245_s13 = scalar_lea.sflag [#allocation3], %s296_s21  ;;  %s7015_s17 = smov [#allocation2]  }
  0x21   : > { %v388_v22 = vand.u32 4294901760, %v387_v19  ;;  %v398_v23 = vand.u32 4294901760, %v397_v20  ;;  %v1624_v37 = vsub.f32 %v1544_v34, %v1623_v35  ;;  %8375 = vst [vmem:[#allocation7_spill] sm:$0xff] %v7174_v48  ;;  %v903_v49 = vsub.f32 %v7171_v47, %v7174_v48  ;;  %1478 = vperm.xlu0 %6948, %v5846_v2   ;;  %v5864_v34 = vld [vmem:[%s8289_s3 + $0x9] ss:$0 sm:$0xff]  ;;  %s6954_s18 = sshll.u32 %s7015_s17, 4  ;;  %s6955_s18 = int_to_ptr.vmem [resolvable:$false] %s6954_s18 }
  0x22   : > { %6599 = vmatprep.subr.bf16.mxu0 %v7132_v21  ;;  %v1615_v38 = vand.u32 4294901760, %v1614_v36  ;;  %8381 = vst [vmem:[#allocation13_spill] sm:$0xff] %v7219_v3  ;;  %8382 = vst [vmem:[#allocation14_spill] sm:$0xff] %v7222_v5  ;;  %v7225_v6 = vand.u32 4294901760, %v7210_v63  ;;  %v913_v13 = vsub.f32 %v7199_v59, %v7219_v3  ;;  %v7236_v14 = vand.u32 4294901760, %v7222_v5  ;;  %s6956_s19 = scalar_lea.vmem %s6955_s18, 8192  ;;  %p6957_p0 = scmp.lt.s32.totalorder %s8221_s26, %s6955_s18 }
  0x23   : > { %v389_v24 = vsub.f32 %v387_v19, %v388_v22  ;;  %v399_v25 = vsub.f32 %v397_v20, %v398_v23  ;;  %v1625_v39 = vand.u32 4294901760, %v1624_v37  ;;  %v7179_v50 = vand.u32 4294901760, %v903_v49 }
  0x24   : > { %v1616_v40 = vsub.f32 %v1614_v36, %v1615_v38  ;;  %8383 = vst [vmem:[#allocation15_spill] sm:$0xff] %v7225_v6  ;;  %8384 = vst [vmem:[#allocation16_spill] sm:$0xff] %v7236_v14  ;;  %1494 = vperm.xlu1 %6949, %v5850_v10   ;;  %v5890_v10 = vld [vmem:[%s7125_s25 + $0x38] sm:$0xff] }
  0x25   : > { %v390_v26 = vand.u32 4294901760, %v389_v24  ;;  %v400_v27 = vand.u32 4294901760, %v399_v25  ;;  %v1626_v41 = vsub.f32 %v1624_v37, %v1625_v39  ;;  %6232 = vmatprep.mubr.f32.mxu1 %v7179_v50  ;;  %1490 = vperm.xlu0 %6948, %v5849_v11   ;;  %v7249_v24 = vand.u32 4294901760, %v913_v13  ;;  %v5871_v11 = vld [vmem:[%s7125_s25 + $0x20] sm:$0xff] }
  0x26   : > { %v1617_v42 = vand.u32 4294901760, %v1616_v40  ;;  %v933_v25 = vsub.f32 %v7222_v5, %v7236_v14  ;;  %v5865_v40 = vld [vmem:[%s8289_s3 + $0xa] ss:$0 sm:$0xff] }
  0x27   : > { %6190 = vmatprep.mubr.f32.mxu0 %v390_v26  ;;  %v1627_v43 = vand.u32 4294901760, %v1626_v41  ;;  %8385 = vst [vmem:[#allocation17_spill] sm:$0xff] %v7249_v24  ;;  %v5868_v41 = vld [vmem:[%s8289_s3 + $0xd] ss:$0 sm:$0xff] }
  0x28   : > { %6191 = vmatmul.mubr.f32.vlgmr.msra.gmra.mrb[0].mxu0 %v400_v27 }
  0x29   : > { %6601 = vmatpush3.bf16.msra.mxu0 %v7132_v21  ;;  %6197 = vmatprep.mubr.f32.mxu0 %v386_v15 }
  0x2a   : > { %6603 = vmatprep.subr.bf16.mxu0 %v7135_v28 }
  0x30   : > { %6198 = vmatmul.mubr.f32.vlgmr.msra.gmra.mrb[0].mxu0 %v396_v16 }
  0x31   : > { %6605 = vmatpush3.bf16.msra.mxu0 %v7135_v28  ;;  %6204 = vmatprep.mubr.f32.mxu0 %v387_v19 }
  0x32   : > { %6607 = vmatprep.subr.bf16.mxu0 %v7119_v4 }
  0x38   : > { %6205 = vmatmul.mubr.f32.vlgmr.msra.gmra.mrb[0].mxu0 %v397_v20  ;;  %v5852_v20 = vld [vmem:[%s8289_s3 + $0x7] ss:$0 sm:$0xff] }
  0x39   : > { %6609 = vmatpush3.bf16.msra.mxu0 %v7119_v4  ;;  %6211 = vmatprep.mubr.f32.mxu0 %v388_v22  ;;  %v5851_v22 = vld [vmem:[%s8289_s3 + $0x6] ss:$0 sm:$0xff] }
  0x3a   : > { %6611 = vmatprep.subr.bf16.mxu0 %v7141_v29  ;;  %1502 = vperm.xlu1 %6949, %v5852_v20  }
  0x3b   : > { %1498 = vperm.xlu0 %6948, %v5851_v22  }
  0x3e   : > { %2694 = vperm.xlu1 %6949, %v5864_v34  }
  0x40   : > { %6212 = vmatmul.mubr.f32.vlgmr.msra.gmra.mrb[0].mxu0 %v398_v23 }
  0x41   : > { %6613 = vmatpush3.bf16.msra.mxu0 %v7141_v29  ;;  %6218 = vmatprep.mubr.f32.mxu0 %v386_v15 }
  0x42   : > { %6615 = vmatprep.subr.bf16.mxu0 %v7119_v4 }
  0x48   : > { %6219 = vmatmul.mubr.f32.vlgmr.msra.gmra.mrb[0].mxu0 %v396_v16 }
  0x49   : > { %6617 = vmatpush3.bf16.msra.mxu0 %v7119_v4  ;;  %6225 = vmatprep.mubr.f32.mxu0 %v386_v15 }
  0x4a   : > { %6643 = vmatprep.subr.bf16.mxu0 %v7119_v4 }
  0x50   : > { %6226 = vmatmul.mubr.f32.vlgmr.msra.gmra.mrb[0].mxu0 %v396_v16  ;;  %v923_v16 = vsub.f32 %v7210_v63, %v7225_v6 }
  0x51   : > { %6645 = vmatpush3.bf16.msra.mxu0 %v7119_v4  ;;  %6292 = vmatprep.mubr.f32.mxu0 %v1617_v42  ;;  %v5867_v42 = vld [vmem:[%s8289_s3 + $0xc] ss:$0 sm:$0xff] }
  0x52   : > { %6647 = vmatprep.subr.bf16.mxu0 %v7132_v21  ;;  %v7254_v30 = vand.u32 4294901760, %v923_v16  ;;  %v4040_v16 = vsel %vm312_vm0, %v5890_v10, 0  ;;  %v5911_v10 = vld [vmem:[%s8290_s4 + $0x4] ss:$0 sm:$0xff] }
  0x54   : > { %6293 = vmatmul.mubr.f32.vlgmr.msra.gmra.mrb[2].mxu0 %v1627_v43  ;;  %8386 = vst [vmem:[#allocation18_spill] sm:$0xff] %v7254_v30  ;;  %v5870_v43 = vld [vmem:[%s8289_s3 + $0xf] ss:$0 sm:$0xff] }
  0x55   : > { %6649 = vmatpush3.bf16.msra.mxu0 %v7132_v21  ;;  %6299 = vmatprep.mubr.f32.mxu0 %v1613_v33 }
  0x56   : > { %6651 = vmatprep.subr.bf16.mxu0 %v7135_v28 }
  0x5c   : > { %6300 = vmatmul.mubr.f32.vlgmr.msra.gmra.mrb[2].mxu0 %v1623_v35 }
  0x5d   : > { %6653 = vmatpush3.bf16.msra.mxu0 %v7135_v28  ;;  %6306 = vmatprep.mubr.f32.mxu0 %v1614_v36  ;;  %v7263_v36 = vand.u32 4294901760, %v933_v25 }
  0x5e   : > { %6655 = vmatprep.subr.bf16.mxu0 %v7119_v4 }
  0x5f   : > { %8387 = vst [vmem:[#allocation19_spill] sm:$0xff] %v7263_v36 }
  0x64   : > { %6307 = vmatmul.mubr.f32.vlgmr.msra.gmra.mrb[2].mxu0 %v1624_v37 }
  0x65   : > { %6657 = vmatpush3.bf16.msra.mxu0 %v7119_v4  ;;  %6313 = vmatprep.mubr.f32.mxu0 %v1615_v38 }
  0x66   : > { %6659 = vmatprep.subr.bf16.mxu0 %v7141_v29 }
  0x6c   : > { %6314 = vmatmul.mubr.f32.vlgmr.msra.gmra.mrb[2].mxu0 %v1625_v39  ;;  %v5866_v39 = vld [vmem:[%s8289_s3 + $0xb] ss:$0 sm:$0xff] }
  0x6d   : > { %6661 = vmatpush3.bf16.msra.mxu0 %v7141_v29  ;;  %6320 = vmatprep.mubr.f32.mxu0 %v1613_v33 }
  0x6e   : > { %6663 = vmatprep.subr.bf16.mxu0 %v7119_v4  ;;  %2702 = vperm.xlu1 %6949, %v5866_v39  }
  0x72   : > { %2710 = vperm.xlu1 %6949, %v5868_v41  }
  0x74   : > { %6321 = vmatmul.mubr.f32.vlgmr.msra.gmra.mrb[2].mxu0 %v1623_v35 }
  0x75   : > { %6665 = vmatpush3.bf16.msra.mxu0 %v7119_v4  ;;  %6327 = vmatprep.mubr.f32.mxu0 %v1613_v33 }
  0x76   : > { %2718 = vperm.xlu1 %6949, %v5870_v43  }
  0x7c   : > { %6328 = vmatmul.mubr.f32.vlgmr.msra.gmra.mrb[2].mxu0 %v1623_v35  ;;  %v5863_v35 = vld [vmem:[%s8289_s3 + $0x8] ss:$0 sm:$0xff] }
  0x7d   : > { %6364 = vmatprep.mubr.f32.mxu0 %v7174_v48  ;;  %2690 = vperm.xlu0 %6948, %v5863_v35  }
  0x81   : > { %2698 = vperm.xlu0 %6948, %v5865_v40  }
  0x85   : > { %2706 = vperm.xlu0 %6948, %v5867_v42  }
  0x89   : > { %2714 = vperm.xlu0 %6948, %v5869_v44  }
 0x123   : > { %v6227_v7 = vpop.f32.mrb[0].mxu0 }
 0x124   : > { %v837_v8 = vand.u32 4294901760, %v6227_v7  ;;  %v811_v9 = vpop.f32.mrb[1].mxu0 }
 0x125   : > { %v834_v12 = vand.u32 4294901760, %v811_v9 }
 0x126   : > { %v949_v15 = vsub.f32 %v6227_v7, %v837_v8 }
 0x127   : > { %v7240_v17 = vpack.c.bf16 %v837_v8, %v834_v12  ;;  %v942_v18 = vsub.f32 %v811_v9, %v834_v12  ;;  %v4037_v9 = vsel %vm312_vm0, %v5889_v0, 0  ;;  %v5905_v0 = vld [vmem:[%s8289_s3 + $0x1e] ss:$0 sm:$0xff] }
 0x128   : > { %v950_v19 = vand.u32 4294901760, %v949_v15 }
 0x129   : > { %v943_v23 = vand.u32 4294901760, %v942_v18  ;;  %6619 = vmatprep.subr.bf16.mxu1 %v7240_v17  ;;  %v6626_v26 = vpack.c.bf16 %v949_v15, %v942_v18 }
 0x12a   : > { %v951_v27 = vsub.f32 %v949_v15, %v950_v19  ;;  %6621 = vmatpush3.bf16.msra.mxu1 %v7240_v17  ;;  %v7316_v15 = vand.u32 4294901760, %v4037_v9 }
 0x12b   : > { %v944_v31 = vsub.f32 %v942_v18, %v943_v23  ;;  %v6634_v32 = vpack.c.bf16 %v950_v19, %v943_v23  ;;  %v5872_v18 = vld [vmem:[%s7125_s25 + $0x28] sm:$0xff]  ;;  %v7323_v19 = vand.u32 4294901760, %v4040_v16  ;;  %s6950_s25 = scalar_lea.vmem %s8221_s26, 4096 }
 0x12c   : > { %v952_v33 = vand.u32 4294901760, %v951_v27  ;;  %v2792_v22 = vsel %vm312_vm0, %v5872_v18, 0  ;;  %v4110_v23 = vsub.f32 %v4037_v9, %v7316_v15  ;;  %v5912_v9 = vld [vmem:[%s8290_s4 + $0x5] ss:$0 sm:$0xff]  ;;  %p6951_p11 = scmp.ne.s32.totalorder %s8221_s26, %s6950_s25  ;;  %p6958_p1 = scmp.lt.s32.totalorder %s6956_s19, %s6950_s25 }
 0x12d   : > { %6233 = vmatmul.mubr.f32.vlgmr.msra.gmra.mrb[0].mxu1 %v7249_v24  ;;  %v945_v37 = vand.u32 4294901760, %v944_v31  ;;  %v7332_v25 = vand.u32 4294901760, %v2792_v22  ;;  %v5920_v18 = vld [vmem:[%s8291_s5 + $0x5] ss:$0 sm:$0xff] }
 0x12e   : > { %6235 = vmatprep.mubr.f32.mxu1 %v7254_v30  ;;  %v4111_v31 = vand.u32 4294901760, %v4110_v23  ;;  %p6952_p12 = pnand %p6951_p11, %p7101_p5  ;;  %p6959_p2 = por %p6958_p1, %p6957_p0 }
 0x12f   : > { %v6622_v38 = vpack.c.bf16 %v952_v33, %v945_v37 }
 0x130   : > { %v4112_v35 = vsub.f32 %v4110_v23, %v4111_v31  ;;  %p6953_p13 = pneg %p6952_p12 }
 0x131   : > { %6236 = vmatmul.mubr.f32.gmra.mrb[2].mxu1 %v7263_v36  ;;  %6623 = vmatprep.subr.bf16.mxu1 %v6622_v38 }
 0x132   : > { %6625 = vmatpush3.bf16.msra.mxu1 %v6622_v38  ;;  %6242 = vmatprep.mubr.f32.mxu1 %v7168_v46  ;;  %v4113_v40 = vand.u32 4294901760, %v4112_v35  ;;  %v5932_v35 = vld [vmem:[%s8293_s7 + $0x1] ss:$0 sm:$0xff]  ;;  %p6960_p3 = pnand %p6959_p2, %p6953_p13 }
 0x133   : > { %6627 = vmatprep.subr.bf16.mxu1 %v6626_v26 }
 0x135   : > { %6243 = vmatmul.mubr.f32.vlgmr.msra.gmra.mrb[0].mxu1 %v7193_v56 }
 0x136   : > { %6629 = vmatpush3.bf16.msra.mxu1 %v6626_v26  ;;  %6245 = vmatprep.mubr.f32.mxu1 %v7195_v57  ;;  %v4120_v26 = vsub.f32 %v4040_v16, %v7323_v19  ;;  %v5918_v16 = vld [vmem:[%s8291_s5 + $0x3] ss:$0 sm:$0xff] }
 0x137   : > { %6631 = vmatprep.subr.bf16.mxu1 %v7240_v17 }
 0x138   : > { %v4121_v33 = vand.u32 4294901760, %v4120_v26 }
 0x139   : > { %6246 = vmatmul.mubr.f32.gmra.mrb[2].mxu1 %v7201_v60 }
 0x13a   : > { %6252 = vmatprep.mubr.f32.mxu1 %v7171_v47  ;;  %v4122_v38 = vsub.f32 %v4120_v26, %v4121_v33 }
 0x13c   : > { %v4123_v42 = vand.u32 4294901760, %v4122_v38  ;;  %v5934_v38 = vld [vmem:[%s8293_s7 + $0x3] ss:$0 sm:$0xff] }
 0x13d   : > { %6253 = vmatmul.mubr.f32.vlgmr.msra.gmra.mrb[0].mxu1 %v7199_v59 }
 0x13e   : > { %6633 = vmatpush3.bf16.msra.mxu1 %v7240_v17  ;;  %6255 = vmatprep.mubr.f32.mxu1 %v7210_v63 }
 0x13f   : > { %6635 = vmatprep.subr.bf16.mxu1 %v6634_v32 }
 0x141   : > { %6256 = vmatmul.mubr.f32.gmra.mrb[2].mxu1 %v7222_v5 }
 0x142   : > { %6262 = vmatprep.mubr.f32.mxu1 %v7174_v48 }
 0x145   : > { %6263 = vmatmul.mubr.f32.vlgmr.msra.gmra.mrb[0].mxu1 %v7219_v3 }
 0x146   : > { %6637 = vmatpush3.bf16.msra.mxu1 %v6634_v32  ;;  %6265 = vmatprep.mubr.f32.mxu1 %v7225_v6  ;;  %v2872_v32 = vsub.f32 %v2792_v22, %v7332_v25  ;;  %v5921_v22 = vld [vmem:[%s8291_s5 + $0x6] ss:$0 sm:$0xff] }
 0x147   : > { %6639 = vmatprep.subr.bf16.mxu1 %v7240_v17 }
 0x148   : > { %v2873_v37 = vand.u32 4294901760, %v2872_v32 }
 0x149   : > { %6266 = vmatmul.mubr.f32.gmra.mrb[2].mxu1 %v7236_v14 }
 0x14a   : > { %6272 = vmatprep.mubr.f32.mxu1 %v7168_v46  ;;  %v2874_v41 = vsub.f32 %v2872_v32, %v2873_v37 }
 0x14c   : > { %v2875_v44 = vand.u32 4294901760, %v2874_v41  ;;  %v5935_v41 = vld [vmem:[%s8293_s7 + $0x4] ss:$0 sm:$0xff] }
 0x14d   : > { %6273 = vmatmul.mubr.f32.vlgmr.msra.gmra.mrb[0].mxu1 %v7193_v56 }
 0x14e   : > { %6641 = vmatpush3.bf16.msra.mxu1 %v7240_v17  ;;  %6275 = vmatprep.mubr.f32.mxu1 %v7195_v57  ;;  %v2789_v17 = vsel %vm312_vm0, %v5871_v11, 0  ;;  %v5914_v11 = vld [vmem:[%s8290_s4 + $0x7] ss:$0 sm:$0xff] }
 0x14f   : > { %v6329_v45 = vpop.f32.mrb[2].mxu0  ;;  %v7325_v20 = vand.u32 4294901760, %v2789_v17 }
 0x150   : > { %v2052_v49 = vand.u32 4294901760, %v6329_v45  ;;  %v2038_v51 = vpop.f32.mrb[3].mxu0 }
 0x151   : > { %v2049_v52 = vand.u32 4294901760, %v2038_v51  ;;  %6276 = vmatmul.mubr.f32.gmra.mrb[2].mxu1 %v7201_v60  ;;  %v2862_v27 = vsub.f32 %v2789_v17, %v7325_v20  ;;  %v5917_v17 = vld [vmem:[%s8291_s5 + $0x2] ss:$0 sm:$0xff] }
 0x152   : > { %v2164_v53 = vsub.f32 %v6329_v45, %v2052_v49  ;;  %6282 = vmatprep.mubr.f32.mxu1 %v7168_v46  ;;  %v5885_v45 = vld [vmem:[%s8289_s3 + $0x14] ss:$0 sm:$0xff] }
 0x153   : > { %v6666_v54 = vpack.c.bf16 %v2052_v49, %v2049_v52  ;;  %v2157_v55 = vsub.f32 %v2038_v51, %v2049_v52  ;;  %v2863_v34 = vand.u32 4294901760, %v2862_v27  ;;  %v5888_v49 = vld [vmem:[%s8289_s3 + $0x17] ss:$0 sm:$0xff]  ;;  %v5887_v51 = vld [vmem:[%s8289_s3 + $0x16] ss:$0 sm:$0xff] }
 0x154   : > { %v2165_v58 = vand.u32 4294901760, %v2164_v53  ;;  %v5900_v52 = vld [vmem:[%s8289_s3 + $0x19] ss:$0 sm:$0xff] }
 0x155   : > { %6283 = vmatmul.mubr.f32.vlgmr.msra.gmra.mrb[0].mxu1 %v7193_v56  ;;  %6667 = vmatprep.subr.bf16.mxu1 %v6666_v54  ;;  %v2158_v61 = vand.u32 4294901760, %v2157_v55  ;;  %v6674_v62 = vpack.c.bf16 %v2164_v53, %v2157_v55  ;;  %v2864_v39 = vsub.f32 %v2862_v27, %v2863_v34 }
 0x156   : > { %6679 = vmatprep.subr.bf16.mxu0 %v6666_v54  ;;  %6669 = vmatpush3.bf16.msra.mxu1 %v6666_v54  ;;  %v2166_v1 = vsub.f32 %v2164_v53, %v2165_v58  ;;  %v5899_v53 = vld [vmem:[%s8289_s3 + $0x18] ss:$0 sm:$0xff] }
 0x157   : > { %6681 = vmatpush3.bf16.msra.mxu0 %v6666_v54  ;;  %6285 = vmatprep.mubr.f32.mxu1 %v7195_v57  ;;  %v6682_v2 = vpack.c.bf16 %v2165_v58, %v2158_v61  ;;  %v2159_v7 = vsub.f32 %v2157_v55, %v2158_v61  ;;  %v2865_v43 = vand.u32 4294901760, %v2864_v39  ;;  %v5901_v55 = vld [vmem:[%s8289_s3 + $0x1a] ss:$0 sm:$0xff]  ;;  %v5904_v58 = vld [vmem:[%s8289_s3 + $0x1d] ss:$0 sm:$0xff] }
 0x158   : > { %v2167_v8 = vand.u32 4294901760, %v2166_v1  ;;  %v5903_v61 = vld [vmem:[%s8289_s3 + $0x1c] ss:$0 sm:$0xff]  ;;  %v5908_v1 = vld [vmem:[%s8290_s4 + $0x1] ss:$0 sm:$0xff] }
 0x159   : > { %6286 = vmatmul.mubr.f32.gmra.mrb[2].mxu1 %v7201_v60  ;;  %6683 = vmatprep.subr.bf16.mxu0 %v6682_v2  ;;  %v2160_v12 = vand.u32 4294901760, %v2159_v7  ;;  %v5910_v7 = vld [vmem:[%s8290_s4 + $0x3] ss:$0 sm:$0xff]  ;;  %v5933_v39 = vld [vmem:[%s8293_s7 + $0x2] ss:$0 sm:$0xff] }
 0x15a   : > { %6365 = vmatmul.mubr.f32.vlgmr.msra.gmra.mrb[4].mxu0 %v7219_v3  ;;  %6334 = vmatprep.mubr.f32.mxu1 %v7179_v50 }
 0x15b   : > { %6685 = vmatpush3.bf16.msra.mxu0 %v6682_v2  ;;  %6367 = vmatprep.mubr.f32.mxu0 %v7225_v6  ;;  %v6670_v13 = vpack.c.bf16 %v2167_v8, %v2160_v12  ;;  %v5907_v2 = vld [vmem:[%s8290_s4] ss:$0 sm:$0xff]  ;;  %v5909_v8 = vld [vmem:[%s8290_s4 + $0x2] ss:$0 sm:$0xff]  ;;  %v5913_v12 = vld [vmem:[%s8290_s4 + $0x6] ss:$0 sm:$0xff] }
 0x15c   : > { %6687 = vmatprep.subr.bf16.mxu0 %v6666_v54 }
 0x15d   : > { %6335 = vmatmul.mubr.f32.vlgmr.msra.gmra.mrb[4].mxu1 %v7249_v24  ;;  %6671 = vmatprep.subr.bf16.mxu1 %v6670_v13 }
 0x15e   : > { %6368 = vmatmul.mubr.f32.gmra.mrb[6].mxu0 %v7236_v14  ;;  %6673 = vmatpush3.bf16.msra.mxu1 %v6670_v13  ;;  %v5916_v13 = vld [vmem:[%s8291_s5 + $0x1] ss:$0 sm:$0xff] }
 0x15f   : > { %6675 = vmatprep.subr.bf16.mxu1 %v6674_v62  ;;  %6337 = vmatprep.mubr.f32.mxu1 %v7254_v30 }
 0x160   : > { %6374 = vmatprep.mubr.f32.mxu0 %v7168_v46 }
 0x161   : > { %6338 = vmatmul.mubr.f32.gmra.mrb[6].mxu1 %v7263_v36 }
 0x162   : > { %6375 = vmatmul.mubr.f32.vlgmr.msra.gmra.mrb[4].mxu0 %v7193_v56  ;;  %6344 = vmatprep.mubr.f32.mxu1 %v7168_v46 }
 0x163   : > { %6689 = vmatpush3.bf16.msra.mxu0 %v6666_v54  ;;  %6377 = vmatprep.mubr.f32.mxu0 %v7195_v57  ;;  %v5902_v54 = vld [vmem:[%s8289_s3 + $0x1b] ss:$0 sm:$0xff] }
 0x164   : > { %6739 = vmatprep.subr.bf16.mxu0 %v7119_v4 }
 0x165   : > { %6345 = vmatmul.mubr.f32.vlgmr.msra.gmra.mrb[4].mxu1 %v7193_v56 }
 0x166   : > { %6677 = vmatpush3.bf16.msra.mxu1 %v6674_v62  ;;  %6378 = vmatmul.mubr.f32.gmra.mrb[6].mxu0 %v7201_v60  ;;  %v5906_v62 = vld [vmem:[%s8289_s3 + $0x1f] ss:$0 sm:$0xff] }
 0x167   : > { %6347 = vmatprep.mubr.f32.mxu1 %v7195_v57  ;;  %6384 = vmatprep.mubr.f32.mxu0 %v7168_v46 }
 0x168   : > { %6691 = vmatprep.subr.bf16.mxu1 %v7119_v4 }
 0x169   : > { %6348 = vmatmul.mubr.f32.gmra.mrb[6].mxu1 %v7201_v60 }
 0x16a   : > { %6385 = vmatmul.mubr.f32.vlgmr.msra.gmra.mrb[4].mxu0 %v7193_v56  ;;  %6354 = vmatprep.mubr.f32.mxu1 %v7171_v47 }
 0x16b   : > { %6387 = vmatprep.mubr.f32.mxu0 %v7195_v57  ;;  %6741 = vmatpush3.bf16.msra.mxu0 %v7119_v4 }
 0x16c   : > { %6743 = vmatprep.subr.bf16.mxu0 %v7132_v21 }
 0x16d   : > { %6355 = vmatmul.mubr.f32.vlgmr.msra.gmra.mrb[4].mxu1 %v7199_v59 }
 0x16e   : > { %6388 = vmatmul.mubr.f32.gmra.mrb[6].mxu0 %v7201_v60  ;;  %6357 = vmatprep.mubr.f32.mxu1 %v7210_v63 }
 0x16f   : > { %6496 = vmatprep.mubr.f32.mxu0 %v4113_v40  ;;  %6693 = vmatpush3.bf16.msra.mxu1 %v7119_v4  ;;  %v5936_v40 = vld [vmem:[%s8293_s7 + $0x5] ss:$0 sm:$0xff] }
 0x170   : > { %6695 = vmatprep.subr.bf16.mxu1 %v7132_v21 }
 0x171   : > { %6358 = vmatmul.mubr.f32.gmra.mrb[6].mxu1 %v7222_v5 }
 0x172   : > { %6497 = vmatmul.mubr.f32.vlgmr.msra.gmra.mrb[8].mxu0 %v4123_v42  ;;  %6394 = vmatprep.mubr.f32.mxu1 %v2865_v43  ;;  %v5938_v42 = vld [vmem:[%s8293_s7 + $0x7] ss:$0 sm:$0xff]  ;;  %v5937_v43 = vld [vmem:[%s8293_s7 + $0x6] ss:$0 sm:$0xff] }
 0x173   : > { %6745 = vmatpush3.bf16.msra.mxu0 %v7132_v21  ;;  %6503 = vmatprep.mubr.f32.mxu0 %v7316_v15 }
 0x174   : > { %6747 = vmatprep.subr.bf16.mxu0 %v7135_v28 }
 0x175   : > { %6395 = vmatmul.mubr.f32.vlgmr.msra.gmra.mrb[8].mxu1 %v2875_v44  ;;  %v7534_v44 = vpop.permute.xlu1 %1482 }
 0x176   : > { %6697 = vmatpush3.bf16.msra.mxu1 %v7132_v21  ;;  %6401 = vmatprep.mubr.f32.mxu1 %v7325_v20  ;;  %v5882_v21 = vld [vmem:[%s8289_s3 + $0x11] ss:$0 sm:$0xff] }
 0x177   : > { %6699 = vmatprep.subr.bf16.mxu1 %v7135_v28  ;;  %3942 = vperm.xlu1 %6949, %v5882_v21   ;;  %v7536_v21 = vpop.permute.xlu0 %1474 }
 0x17a   : > { %6504 = vmatmul.mubr.f32.vlgmr.msra.gmra.mrb[8].mxu0 %v7323_v19 }
 0x17b   : > { %6749 = vmatpush3.bf16.msra.mxu0 %v7135_v28  ;;  %6510 = vmatprep.mubr.f32.mxu0 %v4110_v23  ;;  %v5924_v23 = vld [vmem:[%s8292_s6 + $0x1] ss:$0 sm:$0xff] }
 0x17c   : > { %6751 = vmatprep.subr.bf16.mxu0 %v7119_v4 }
 0x17d   : > { %6402 = vmatmul.mubr.f32.vlgmr.msra.gmra.mrb[8].mxu1 %v7332_v25 }
 0x17e   : > { %6701 = vmatpush3.bf16.msra.mxu1 %v7135_v28  ;;  %6408 = vmatprep.mubr.f32.mxu1 %v2862_v27  ;;  %v5881_v28 = vld [vmem:[%s8289_s3 + $0x10] ss:$0 sm:$0xff]  ;;  %v5925_v27 = vld [vmem:[%s8292_s6 + $0x2] ss:$0 sm:$0xff] }
 0x17f   : > { %6703 = vmatprep.subr.bf16.mxu1 %v7119_v4  ;;  %3938 = vperm.xlu0 %6948, %v5881_v28   ;;  %v7538_v28 = vpop.permute.xlu1 %1486 }
 0x182   : > { %6511 = vmatmul.mubr.f32.vlgmr.msra.gmra.mrb[8].mxu0 %v4120_v26  ;;  %v5926_v26 = vld [vmem:[%s8292_s6 + $0x3] ss:$0 sm:$0xff] }
 0x183   : > { %6753 = vmatpush3.bf16.msra.mxu0 %v7119_v4  ;;  %6517 = vmatprep.mubr.f32.mxu0 %v4111_v31  ;;  %v5928_v31 = vld [vmem:[%s8292_s6 + $0x5] ss:$0 sm:$0xff] }
 0x184   : > { %6755 = vmatprep.subr.bf16.mxu0 %v7141_v29 }
 0x185   : > { %6409 = vmatmul.mubr.f32.vlgmr.msra.gmra.mrb[8].mxu1 %v2872_v32  ;;  %v5927_v32 = vld [vmem:[%s8292_s6 + $0x4] ss:$0 sm:$0xff] }
 0x186   : > { %6705 = vmatpush3.bf16.msra.mxu1 %v7119_v4  ;;  %6415 = vmatprep.mubr.f32.mxu1 %v2863_v34  ;;  %v5929_v34 = vld [vmem:[%s8292_s6 + $0x6] ss:$0 sm:$0xff] }
 0x187   : > { %6707 = vmatprep.subr.bf16.mxu1 %v7141_v29 }
 0x18a   : > { %6518 = vmatmul.mubr.f32.vlgmr.msra.gmra.mrb[8].mxu0 %v4121_v33  ;;  %v5930_v33 = vld [vmem:[%s8292_s6 + $0x7] ss:$0 sm:$0xff] }
 0x18b   : > { %6757 = vmatpush3.bf16.msra.mxu0 %v7141_v29  ;;  %6524 = vmatprep.mubr.f32.mxu0 %v7316_v15 }
 0x18c   : > { %6759 = vmatprep.subr.bf16.mxu0 %v7119_v4 }
 0x18d   : > { %6416 = vmatmul.mubr.f32.vlgmr.msra.gmra.mrb[8].mxu1 %v2873_v37  ;;  %v5931_v37 = vld [vmem:[%s8293_s7] ss:$0 sm:$0xff] }
 0x18e   : > { %6709 = vmatpush3.bf16.msra.mxu1 %v7141_v29  ;;  %6422 = vmatprep.mubr.f32.mxu1 %v7325_v20  ;;  %v5883_v29 = vld [vmem:[%s8289_s3 + $0x12] ss:$0 sm:$0xff] }
 0x18f   : > { %6711 = vmatprep.subr.bf16.mxu1 %v7119_v4  ;;  %3946 = vperm.xlu0 %6948, %v5883_v29  }
 0x192   : > { %6525 = vmatmul.mubr.f32.vlgmr.msra.gmra.mrb[8].mxu0 %v7323_v19 }
 0x193   : > { %6761 = vmatpush3.bf16.msra.mxu0 %v7119_v4  ;;  %6531 = vmatprep.mubr.f32.mxu0 %v7316_v15  ;;  %v5915_v15 = vld [vmem:[%s8291_s5] ss:$0 sm:$0xff] }
 0x194   : > { %3954 = vperm.xlu0 %6948, %v5885_v45   ;;  %v7542_v45 = vpop.permute.xlu1 %1494 }
 0x195   : > { %6423 = vmatmul.mubr.f32.vlgmr.msra.gmra.mrb[8].mxu1 %v7332_v25 }
 0x196   : > { %6713 = vmatpush3.bf16.msra.mxu1 %v7119_v4  ;;  %6429 = vmatprep.mubr.f32.mxu1 %v7325_v20  ;;  %v5884_v4 = vld [vmem:[%s8289_s3 + $0x13] ss:$0 sm:$0xff]  ;;  %v5922_v20 = vld [vmem:[%s8291_s5 + $0x7] ss:$0 sm:$0xff] }
 0x197   : > { %3950 = vperm.xlu1 %6949, %v5884_v4   ;;  %v7540_v4 = vpop.permute.xlu0 %1478 }
 0x198   : > { %3962 = vperm.xlu0 %6948, %v5887_v51  }
 0x19a   : > { %6532 = vmatmul.mubr.f32.vlgmr.msra.gmra.mrb[8].mxu0 %v7323_v19  ;;  %v5919_v19 = vld [vmem:[%s8291_s5 + $0x4] ss:$0 sm:$0xff] }
 0x19b   : > { %6538 = vmatprep.mubr.f32.mxu0 %v7179_v50 }
 0x19c   : > { %5186 = vperm.xlu0 %6948, %v5899_v53   ;;  %v7546_v53 = vpop.permute.xlu1 %1502 }
 0x19d   : > { %6430 = vmatmul.mubr.f32.vlgmr.msra.gmra.mrb[8].mxu1 %v7332_v25  ;;  %v5923_v25 = vld [vmem:[%s8292_s6] ss:$0 sm:$0xff] }
 0x19e   : > { %6436 = vmatprep.mubr.f32.mxu1 %v7179_v50  ;;  %v5886_v50 = vld [vmem:[%s8289_s3 + $0x15] ss:$0 sm:$0xff] }
 0x19f   : > { %3958 = vperm.xlu1 %6949, %v5886_v50  }
 0x1a0   : > { %5194 = vperm.xlu0 %6948, %v5901_v55   ;;  %v7550_v55 = vpop.permute.xlu1 %2694 }
 0x1a3   : > { %3966 = vperm.xlu1 %6949, %v5888_v49   ;;  %v7544_v49 = vpop.permute.xlu0 %1490 }
 0x1a4   : > { %5202 = vperm.xlu0 %6948, %v5903_v61  }
 0x1a7   : > { %5190 = vperm.xlu1 %6949, %v5900_v52  }
 0x1a8   : > { %5210 = vperm.xlu0 %6948, %v5905_v0  }
 0x1ab   : > { %5198 = vperm.xlu1 %6949, %v5902_v54   ;;  %v7548_v54 = vpop.permute.xlu0 %1498 }
 0x1ac   : > { %5330 = vperm.xlu0 %6948, %v5907_v2  }
 0x1af   : > { %5206 = vperm.xlu1 %6949, %v5904_v58   ;;  %v7552_v58 = vpop.permute.xlu0 %2690 }
 0x1b0   : > { %5338 = vperm.xlu0 %6948, %v5909_v8  }
 0x1b3   : > { %5214 = vperm.xlu1 %6949, %v5906_v62   ;;  %v7554_v62 = vpop.permute.xlu1 %2702 }
 0x1b4   : > { %5346 = vperm.xlu0 %6948, %v5911_v10  }
 0x1b7   : > { %5334 = vperm.xlu1 %6949, %v5908_v1   ;;  %v7556_v1 = vpop.permute.xlu0 %2698 }
 0x1b8   : > { %5354 = vperm.xlu0 %6948, %v5913_v12  }
 0x1bb   : > { %5342 = vperm.xlu1 %6949, %v5910_v7  }
 0x1bc   : > { %5442 = vperm.xlu0 %6948, %v5915_v15  }
 0x1bf   : > { %5350 = vperm.xlu1 %6949, %v5912_v9  }
 0x1c0   : > { %5450 = vperm.xlu0 %6948, %v5917_v17  }
 0x1c3   : > { %5358 = vperm.xlu1 %6949, %v5914_v11  }
 0x1c4   : > { %5458 = vperm.xlu0 %6948, %v5919_v19  }
 0x1c7   : > { %5446 = vperm.xlu1 %6949, %v5916_v13  }
 0x1c8   : > { %5466 = vperm.xlu0 %6948, %v5921_v22  }
 0x1cb   : > { %5454 = vperm.xlu1 %6949, %v5918_v16  }
 0x1cc   : > { %5554 = vperm.xlu0 %6948, %v5923_v25   ;;  %v7571_v25 = vpop.permute.xlu1 %2710 }
 0x1cf   : > { %5462 = vperm.xlu1 %6949, %v5920_v18  }
 0x1d0   : > { %5562 = vperm.xlu0 %6948, %v5925_v27   ;;  %v2719_v60 = vpop.permute.xlu1 %2718 }
 0x1d3   : > { %5470 = vperm.xlu1 %6949, %v5922_v20  }
 0x1d4   : > { %5570 = vperm.xlu0 %6948, %v5927_v32  }
 0x1d7   : > { %5558 = vperm.xlu1 %6949, %v5924_v23  }
 0x1d8   : > { %5578 = vperm.xlu0 %6948, %v5929_v34  }
 0x1db   : > { %5566 = vperm.xlu1 %6949, %v5926_v26  }
 0x1dc   : > { %5666 = vperm.xlu0 %6948, %v5931_v37  }
 0x1df   : > { %5574 = vperm.xlu1 %6949, %v5928_v31  }
 0x1e0   : > { %5674 = vperm.xlu0 %6948, %v5933_v39  }
 0x1e3   : > { %5582 = vperm.xlu1 %6949, %v5930_v33  }
 0x1e4   : > { %5682 = vperm.xlu0 %6948, %v5935_v41  }
 0x1e7   : > { %5670 = vperm.xlu1 %6949, %v5932_v35  }
 0x1e8   : > { %5690 = vperm.xlu0 %6948, %v5937_v43  }
 0x1eb   : > { %5678 = vperm.xlu1 %6949, %v5934_v38  }
 0x1ef   : > { %5686 = vperm.xlu1 %6949, %v5936_v40   ;;  %v7582_v40 = vpop.permute.xlu0 %2706 }
 0x1f3   : > { %5694 = vperm.xlu1 %6949, %v5938_v42   ;;  %v2715_v30 = vpop.permute.xlu0 %2714 }
 0x228   : > { %v6284_v29 = vpop.f32.mrb[0].mxu1 }
 0x229   : > { %v1399_v50 = vpop.f32.mrb[1].mxu1  ;;  %v1422_v61 = vmax.f32 %v6284_v29, 0.0 }
 0x22a   : > { %v1421_v0 = vmax.f32 %v1399_v50, 0.0 }
 0x22b   : > { %v1506_v2 = vmul.f32 %v7536_v21, %v1422_v61  ;;  %v1510_v7 = vmul.f32 %v7540_v4, %v1422_v61  ;;  %v1514_v9 = vmul.f32 %v7534_v44, %v1422_v61  ;;  %v1518_v10 = vmul.f32 %v7538_v28, %v1422_v61 }
 0x22c   : > { %v6287_v51 = vpop.f32.mrb[2].mxu1  ;;  %v1522_v11 = vmul.f32 %v7544_v49, %v1422_v61  ;;  %v1526_v15 = vmul.f32 %v7542_v45, %v1422_v61  ;;  %v1505_v16 = vmul.f32 %v7536_v21, %v1421_v0  ;;  %v1509_v17 = vmul.f32 %v7540_v4, %v1421_v0 }
 0x22d   : > { %v1411_v52 = vpop.f32.mrb[3].mxu1  ;;  %v1424_v12 = vmax.f32 %v6287_v51, 0.0  ;;  %v1513_v18 = vmul.f32 %v7534_v44, %v1421_v0  ;;  %v1517_v19 = vmul.f32 %v7538_v28, %v1421_v0  ;;  %v1521_v20 = vmul.f32 %v7544_v49, %v1421_v0 }
 0x22e   : > { %v1525_v22 = vmul.f32 %v7542_v45, %v1421_v0  ;;  %v1533_v23 = vmul.f32 %v7546_v53, %v1421_v0  ;;  %v1534_v27 = vmul.f32 %v7546_v53, %v1422_v61  ;;  %v1529_v31 = vmul.f32 %v7548_v54, %v1421_v0 }
 0x22f   : > { %v1530_v32 = vmul.f32 %v7548_v54, %v1422_v61  ;;  %v7577_v37 = vmul.f32 %v7536_v21, %v1424_v12  ;;  %v7580_v38 = vmul.f32 %v7540_v4, %v1424_v12  ;;  %v1423_v39 = vmax.f32 %v1411_v52, 0.0 }
 0x230   : > { %v7585_v43 = vmul.f32 %v7534_v44, %v1424_v12  ;;  %v7588_v29 = vmul.f32 %v7538_v28, %v1424_v12  ;;  %v7591_v50 = vmul.f32 %v7544_v49, %v1424_v12  ;;  %v7594_v61 = vmul.f32 %v7542_v45, %v1424_v12 }
 0x231   : > { %v7597_v0 = vmul.f32 %v7548_v54, %v1424_v12  ;;  %v7600_v52 = vmul.f32 %v7546_v53, %v1424_v12 }
 0x23d   : > { %v6386_v8 = vpop.f32.mrb[4].mxu0 }
 0x23e   : > { %v2614_v13 = vpop.f32.mrb[5].mxu0 }
 0x240   : > { %v6356_v26 = vpop.f32.mrb[4].mxu1 }
 0x241   : > { %v6786_v33 = vadd.f32 %v6386_v8, %v6356_v26  ;;  %v6389_v34 = vpop.f32.mrb[6].mxu0  ;;  %v2326_v35 = vpop.f32.mrb[5].mxu1 }
 0x242   : > { %v6787_v41 = vadd.f32 %v2614_v13, %v2326_v35  ;;  %v2626_v42 = vpop.f32.mrb[7].mxu0 }
 0x243   : > { %v2637_v51 = vmax.f32 %v6786_v33, 0.0 }
 0x244   : > { %v2636_v8 = vmax.f32 %v6787_v41, 0.0  ;;  %v6359_v13 = vpop.f32.mrb[6].mxu1 }
 0x245   : > { %v2722_v26 = vmul.f32 %v7552_v58, %v2637_v51  ;;  %v2726_v35 = vmul.f32 %v7550_v55, %v2637_v51  ;;  %v2730_v14 = vmul.f32 %v7556_v1, %v2637_v51  ;;  %v2734_v6 = vmul.f32 %v7554_v62, %v2637_v51  ;;  %v2340_v33 = vpop.f32.mrb[7].mxu1 }
 0x246   : > { %v2738_v3 = vmul.f32 %v7582_v40, %v2637_v51  ;;  %v2742_v48 = vmul.f32 %v7571_v25, %v2637_v51  ;;  %v2721_v5 = vmul.f32 %v7552_v58, %v2636_v8  ;;  %v2725_v12 = vmul.f32 %v7550_v55, %v2636_v8 }
 0x247   : > { %v7610_v63 = vadd.f32 %v2722_v26, %v1506_v2  ;;  %v7612_v41 = vadd.f32 %v2726_v35, %v1510_v7  ;;  %v7614_v59 = vadd.f32 %v2730_v14, %v1514_v9  ;;  %v7616_v47 = vadd.f32 %v2734_v6, %v1518_v10 }
 0x248   : > { %v7618_v57 = vadd.f32 %v2738_v3, %v1522_v11  ;;  %v7620_v56 = vadd.f32 %v2742_v48, %v1526_v15  ;;  %v2729_v46 = vmul.f32 %v7556_v1, %v2636_v8  ;;  %v2733_v36 = vmul.f32 %v7554_v62, %v2636_v8 }
 0x249   : > { %v2737_v24 = vmul.f32 %v7582_v40, %v2636_v8  ;;  %v2741_v2 = vmul.f32 %v7571_v25, %v2636_v8  ;;  %v7626_v7 = vadd.f32 %v2721_v5, %v1505_v16  ;;  %v7628_v14 = vadd.f32 %v2725_v12, %v1509_v17 }
 0x24a   : > { %8388 = vst [vmem:[#allocation20_spill] sm:$0xff] %v7620_v56  ;;  %v7630_v6 = vadd.f32 %v2729_v46, %v1513_v18  ;;  %v7632_v9 = vadd.f32 %v2733_v36, %v1517_v19  ;;  %v2749_v3 = vmul.f32 %v2719_v60, %v2636_v8  ;;  %v2750_v48 = vmul.f32 %v2719_v60, %v2637_v51 }
 0x24b   : > { %8389 = vst [vmem:[#allocation21_spill] sm:$0xff] %v7626_v7  ;;  %8390 = vst [vmem:[#allocation22_spill] sm:$0xff] %v7628_v14  ;;  %v7634_v10 = vadd.f32 %v2737_v24, %v1521_v20  ;;  %v7636_v11 = vadd.f32 %v2741_v2, %v1525_v22  ;;  %v2745_v15 = vmul.f32 %v2715_v30, %v2636_v8 }
 0x24c   : > { %8391 = vst [vmem:[#allocation23_spill] sm:$0xff] %v7630_v6  ;;  %8392 = vst [vmem:[#allocation24_spill] sm:$0xff] %v7632_v9  ;;  %v2746_v26 = vmul.f32 %v2715_v30, %v2637_v51  ;;  %v7638_v35 = vadd.f32 %v2749_v3, %v1533_v23  ;;  %v7640_v56 = vadd.f32 %v2750_v48, %v1534_v27 }
 0x24d   : > { %8393 = vst [vmem:[#allocation25_spill] sm:$0xff] %v7634_v10  ;;  %8394 = vst [vmem:[#allocation26_spill] sm:$0xff] %v7636_v11  ;;  %v6788_v5 = vadd.f32 %v6389_v34, %v6359_v13  ;;  %v6789_v16 = vadd.f32 %v2626_v42, %v2340_v33  ;;  %v1507_v17 = vmul.f32 %v7536_v21, %v1423_v39 }
 0x24e   : > { %8395 = vst [vmem:[#allocation27_spill] sm:$0xff] %v7638_v35  ;;  %v1511_v46 = vmul.f32 %v7540_v4, %v1423_v39  ;;  %v7644_v36 = vadd.f32 %v2745_v15, %v1529_v31  ;;  %v7646_v18 = vadd.f32 %v2746_v26, %v1530_v32  ;;  %v1515_v24 = vmul.f32 %v7534_v44, %v1423_v39 }
 0x24f   : > { %v1519_v19 = vmul.f32 %v7538_v28, %v1423_v39  ;;  %v1523_v20 = vmul.f32 %v7544_v49, %v1423_v39  ;;  %v2639_v22 = vmax.f32 %v6788_v5, 0.0  ;;  %v1527_v23 = vmul.f32 %v7542_v45, %v1423_v39 }
 0x250   : > { %8396 = vst [vmem:[#allocation28_spill] sm:$0xff] %v7644_v36  ;;  %v1531_v27 = vmul.f32 %v7548_v54, %v1423_v39  ;;  %v1535_v34 = vmul.f32 %v7546_v53, %v1423_v39  ;;  %v2638_v21 = vmax.f32 %v6789_v16, 0.0 }
 0x251   : > { %v2724_v4 = vmul.f32 %v7552_v58, %v2639_v22  ;;  %v2728_v31 = vmul.f32 %v7550_v55, %v2639_v22  ;;  %v2732_v32 = vmul.f32 %v7556_v1, %v2639_v22  ;;  %v2736_v44 = vmul.f32 %v7554_v62, %v2639_v22 }
 0x252   : > { %v2740_v28 = vmul.f32 %v7582_v40, %v2639_v22  ;;  %v2744_v49 = vmul.f32 %v7571_v25, %v2639_v22  ;;  %v2748_v42 = vmul.f32 %v2715_v30, %v2639_v22  ;;  %v2752_v51 = vmul.f32 %v2719_v60, %v2639_v22 }
 0x253   : > { %v7661_v45 = vadd.f32 %v2724_v4, %v7577_v37  ;;  %v7664_v53 = vadd.f32 %v2728_v31, %v7580_v38  ;;  %v7667_v54 = vadd.f32 %v2732_v32, %v7585_v43  ;;  %v7670_v39 = vadd.f32 %v2736_v44, %v7588_v29 }
 0x254   : > { %v7673_v8 = vadd.f32 %v2740_v28, %v7591_v50  ;;  %v7676_v13 = vadd.f32 %v2744_v49, %v7594_v61  ;;  %v7679_v33 = vadd.f32 %v2748_v42, %v7597_v0  ;;  %v7682_v37 = vadd.f32 %v2752_v51, %v7600_v52 }
 0x255   : > { %8397 = vst [vmem:[#allocation29_spill] sm:$0xff] %v7661_v45  ;;  %8398 = vst [vmem:[#allocation30_spill] sm:$0xff] %v7664_v53  ;;  %v2723_v38 = vmul.f32 %v7552_v58, %v2638_v21  ;;  %v2727_v43 = vmul.f32 %v7550_v55, %v2638_v21  ;;  %v2731_v12 = vmul.f32 %v7556_v1, %v2638_v21 }
 0x256   : > { %8399 = vst [vmem:[#allocation31_spill] sm:$0xff] %v7667_v54  ;;  %8400 = vst [vmem:[#allocation32_spill] sm:$0xff] %v7670_v39  ;;  %v2735_v29 = vmul.f32 %v7554_v62, %v2638_v21  ;;  %v2739_v50 = vmul.f32 %v7582_v40, %v2638_v21  ;;  %v2743_v2 = vmul.f32 %v7571_v25, %v2638_v21 }
 0x257   : > { %8401 = vst [vmem:[#allocation33_spill] sm:$0xff] %v7673_v8  ;;  %8402 = vst [vmem:[#allocation34_spill] sm:$0xff] %v7676_v13  ;;  %v2747_v61 = vmul.f32 %v2715_v30, %v2638_v21  ;;  %v2751_v3 = vmul.f32 %v2719_v60, %v2638_v21  ;;  %v7690_v48 = vadd.f32 %v2723_v38, %v1507_v17  ;;  %v8413_v38 = vld [vmem:[#allocation17_spill] sm:$0xff] }
 0x258   : > { %8403 = vst [vmem:[#allocation35_spill] sm:$0xff] %v7679_v33  ;;  %8404 = vst [vmem:[#allocation36_spill] sm:$0xff] %v7682_v37  ;;  %v7692_v0 = vadd.f32 %v2727_v43, %v1511_v46  ;;  %v7694_v52 = vadd.f32 %v2731_v12, %v1515_v24  ;;  %v7696_v15 = vadd.f32 %v2735_v29, %v1519_v19  ;;  %v8414_v29 = vld [vmem:[#allocation18_spill] sm:$0xff] }
 0x259   : > { %8405 = vst [vmem:[#allocation37_spill] sm:$0xff] %v7690_v48  ;;  %v7698_v58 = vadd.f32 %v2739_v50, %v1523_v20  ;;  %v7700_v55 = vadd.f32 %v2743_v2, %v1527_v23  ;;  %v7702_v1 = vadd.f32 %v2747_v61, %v1531_v27  ;;  %v7704_v62 = vadd.f32 %v2751_v3, %v1535_v34 }
 0x25a   : > { %8406 = vst [vmem:[#allocation38_spill] sm:$0xff] %v7692_v0  ;;  %8407 = vst [vmem:[#allocation39_spill] sm:$0xff] %v7694_v52 }
 0x25b   : > { %8408 = vst [vmem:[#allocation40_spill] sm:$0xff] %v7696_v15  ;;  %8409 = vst [vmem:[#allocation41_spill] sm:$0xff] %v7698_v58 }
 0x25c   : > { %8410 = vst [vmem:[#allocation42_spill] sm:$0xff] %v7700_v55  ;;  %8411 = vst [vmem:[#allocation43_spill] sm:$0xff] %v7702_v1 }
 0x25d   : > { %8412 = vst [vmem:[#allocation44_spill] sm:$0xff] %v7704_v62 }
 0x26d   : > { %v6533_v40 = vpop.f32.mrb[8].mxu0 }
 0x26e   : > { %v4548_v25 = vand.u32 4294901760, %v6533_v40  ;;  %v4534_v30 = vpop.f32.mrb[9].mxu0 }
 0x26f   : > { %v4545_v60 = vand.u32 4294901760, %v4534_v30 }
 0x270   : > { %v4660_v26 = vsub.f32 %v6533_v40, %v4548_v25  ;;  %v6431_v5 = vpop.f32.mrb[8].mxu1  ;;  %v8415_v40 = vld [vmem:[#allocation19_spill] sm:$0xff] }
 0x271   : > { %v7706_v16 = vpack.c.bf16 %v4548_v25, %v4545_v60  ;;  %v4653_v17 = vsub.f32 %v4534_v30, %v4545_v60  ;;  %v3300_v46 = vand.u32 4294901760, %v6431_v5  ;;  %v3286_v24 = vpop.f32.mrb[9].mxu1  ;;  %v8416_v30 = vld [vmem:[#allocation5_spill] sm:$0xff]  ;;  %v8417_v60 = vld [vmem:[#allocation8_spill] sm:$0xff] }
 0x272   : > { %v4661_v19 = vand.u32 4294901760, %v4660_v26  ;;  %v3297_v20 = vand.u32 4294901760, %v3286_v24 }
 0x273   : > { %v4654_v22 = vand.u32 4294901760, %v4653_v17  ;;  %v3412_v23 = vsub.f32 %v6431_v5, %v3300_v46  ;;  %6763 = vmatprep.subr.bf16.mxu0 %v7706_v16  ;;  %v6770_v27 = vpack.c.bf16 %v4660_v26, %v4653_v17  ;;  %v8419_v5 = vld [vmem:[#allocation11_spill] sm:$0xff] }
 0x274   : > { %v4662_v34 = vsub.f32 %v4660_v26, %v4661_v19  ;;  %v7709_v21 = vpack.c.bf16 %v3300_v46, %v3297_v20  ;;  %v3405_v4 = vsub.f32 %v3286_v24, %v3297_v20  ;;  %6765 = vmatpush3.bf16.msra.mxu0 %v7706_v16  ;;  %v8418_v26 = vld [vmem:[#allocation9_spill] sm:$0xff]  ;;  %v8421_v46 = vld [vmem:[#allocation10_spill] sm:$0xff]  ;;  %v8422_v24 = vld [vmem:[#allocation12_spill] sm:$0xff] }
 0x275   : > { %v4655_v31 = vsub.f32 %v4653_v17, %v4654_v22  ;;  %v3413_v32 = vand.u32 4294901760, %v3412_v23  ;;  %v6778_v44 = vpack.c.bf16 %v4661_v19, %v4654_v22  ;;  %v8420_v17 = vld [vmem:[#allocation6_spill] sm:$0xff]  ;;  %v8424_v20 = vld [vmem:[#allocation7_spill] sm:$0xff]  ;;  %v8425_v22 = vld [vmem:[#allocation13_spill] sm:$0xff] }
 0x276   : > { %v3406_v28 = vand.u32 4294901760, %v3405_v4  ;;  %6715 = vmatprep.subr.bf16.mxu1 %v7709_v21  ;;  %v4663_v49 = vand.u32 4294901760, %v4662_v34  ;;  %v6722_v42 = vpack.c.bf16 %v3412_v23, %v3405_v4  ;;  %v8423_v19 = vld [vmem:[#allocation14_spill] sm:$0xff]  ;;  %v7770_v34 = vpop.permute.xlu0 %3938 }
 0x277   : > { %v3414_v51 = vsub.f32 %v3412_v23, %v3413_v32  ;;  %6539 = vmatmul.mubr.f32.vlgmr.msra.gmra.mrb[10].mxu0 %v8413_v38  ;;  %6717 = vmatpush3.bf16.msra.mxu1 %v7709_v21  ;;  %v4656_v43 = vand.u32 4294901760, %v4655_v31  ;;  %v8426_v23 = vld [vmem:[#allocation15_spill] sm:$0xff]  ;;  %8429 = vst [vmem:[#allocation18_spill] sm:$0xff] %v7770_v34 }
 0x278   : > { %v3407_v12 = vsub.f32 %v3405_v4, %v3406_v28  ;;  %6541 = vmatprep.mubr.f32.mxu0 %v8414_v29  ;;  %v6730_v50 = vpack.c.bf16 %v3413_v32, %v3406_v28 }
 0x279   : > { %v6766_v2 = vpack.c.bf16 %v4663_v49, %v4656_v43  ;;  %v3415_v61 = vand.u32 4294901760, %v3414_v51 }
 0x27a   : > { %6437 = vmatmul.mubr.f32.vlgmr.msra.gmra.mrb[10].mxu1 %v8413_v38  ;;  %v3408_v3 = vand.u32 4294901760, %v3407_v12  ;;  %v7774_v4 = vpop.permute.xlu0 %3946 }
 0x27b   : > { %6542 = vmatmul.mubr.f32.gmra.mrb[12].mxu0 %v8415_v40  ;;  %6767 = vmatprep.subr.bf16.mxu0 %v6766_v2  ;;  %8431 = vst [vmem:[#allocation5_spill] sm:$0xff] %v7774_v4 }
 0x27c   : > { %6769 = vmatpush3.bf16.msra.mxu0 %v6766_v2  ;;  %6439 = vmatprep.mubr.f32.mxu1 %v8414_v29  ;;  %v6718_v25 = vpack.c.bf16 %v3415_v61, %v3408_v3 }
 0x27d   : > { %6771 = vmatprep.subr.bf16.mxu0 %v6770_v27  ;;  %6548 = vmatprep.mubr.f32.mxu0 %v8416_v30 }
 0x27e   : > { %6440 = vmatmul.mubr.f32.gmra.mrb[12].mxu1 %v8415_v40  ;;  %6719 = vmatprep.subr.bf16.mxu1 %v6718_v25  ;;  %v7778_v32 = vpop.permute.xlu0 %3954 }
 0x27f   : > { %6549 = vmatmul.mubr.f32.vlgmr.msra.gmra.mrb[10].mxu0 %v8417_v60  ;;  %6721 = vmatpush3.bf16.msra.mxu1 %v6718_v25  ;;  %8433 = vst [vmem:[#allocation9_spill] sm:$0xff] %v7778_v32 }
 0x280   : > { %6773 = vmatpush3.bf16.msra.mxu0 %v6770_v27  ;;  %6723 = vmatprep.subr.bf16.mxu1 %v6722_v42  ;;  %v8427_v27 = vld [vmem:[#allocation16_spill] sm:$0xff] }
 0x281   : > { %6775 = vmatprep.subr.bf16.mxu0 %v7706_v16  ;;  %6446 = vmatprep.mubr.f32.mxu1 %v8416_v30 }
 0x282   : > { %6551 = vmatprep.mubr.f32.mxu0 %v8418_v26  ;;  %6447 = vmatmul.mubr.f32.vlgmr.msra.gmra.mrb[10].mxu1 %v8417_v60  ;;  %v7782_v28 = vpop.permute.xlu0 %3962 }
 0x283   : > { %6552 = vmatmul.mubr.f32.gmra.mrb[12].mxu0 %v8419_v5  ;;  %6725 = vmatpush3.bf16.msra.mxu1 %v6722_v42  ;;  %8435 = vst [vmem:[#allocation6_spill] sm:$0xff] %v7782_v28 }
 0x284   : > { %6727 = vmatprep.subr.bf16.mxu1 %v7709_v21  ;;  %6449 = vmatprep.mubr.f32.mxu1 %v8418_v26 }
 0x285   : > { %6558 = vmatprep.mubr.f32.mxu0 %v8420_v17 }
 0x286   : > { %6450 = vmatmul.mubr.f32.gmra.mrb[12].mxu1 %v8419_v5  ;;  %v7786_v42 = vpop.permute.xlu0 %5186 }
 0x287   : > { %6559 = vmatmul.mubr.f32.vlgmr.msra.gmra.mrb[10].mxu0 %v8421_v46  ;;  %6456 = vmatprep.mubr.f32.mxu1 %v8420_v17  ;;  %8437 = vst [vmem:[#allocation12_spill] sm:$0xff] %v7786_v42 }
 0x288   : > { %6777 = vmatpush3.bf16.msra.mxu0 %v7706_v16  ;;  %6561 = vmatprep.mubr.f32.mxu0 %v8422_v24 }
 0x289   : > { %6779 = vmatprep.subr.bf16.mxu0 %v6778_v44 }
 0x28a   : > { %6457 = vmatmul.mubr.f32.vlgmr.msra.gmra.mrb[10].mxu1 %v8421_v46  ;;  %v7790_v38 = vpop.permute.xlu0 %5194 }
 0x28b   : > { %6729 = vmatpush3.bf16.msra.mxu1 %v7709_v21  ;;  %6562 = vmatmul.mubr.f32.gmra.mrb[12].mxu0 %v8423_v19  ;;  %8439 = vst [vmem:[#allocation7_spill] sm:$0xff] %v7790_v38 }
 0x28c   : > { %6731 = vmatprep.subr.bf16.mxu1 %v6730_v50  ;;  %6459 = vmatprep.mubr.f32.mxu1 %v8422_v24 }
 0x28d   : > { %6568 = vmatprep.mubr.f32.mxu0 %v8424_v20 }
 0x28e   : > { %6460 = vmatmul.mubr.f32.gmra.mrb[12].mxu1 %v8423_v19  ;;  %v7794_v12 = vpop.permute.xlu0 %5202 }
 0x28f   : > { %6569 = vmatmul.mubr.f32.vlgmr.msra.gmra.mrb[10].mxu0 %v8425_v22  ;;  %6466 = vmatprep.mubr.f32.mxu1 %v8424_v20  ;;  %8441 = vst [vmem:[#allocation15_spill] sm:$0xff] %v7794_v12 }
 0x290   : > { %6781 = vmatpush3.bf16.msra.mxu0 %v6778_v44  ;;  %6571 = vmatprep.mubr.f32.mxu0 %v8426_v23 }
 0x291   : > { %6783 = vmatprep.subr.bf16.mxu0 %v7706_v16 }
 0x292   : > { %6467 = vmatmul.mubr.f32.vlgmr.msra.gmra.mrb[10].mxu1 %v8425_v22 }
 0x293   : > { %6733 = vmatpush3.bf16.msra.mxu1 %v6730_v50  ;;  %6572 = vmatmul.mubr.f32.gmra.mrb[12].mxu0 %v8427_v27  ;;  %v7798_v50 = vpop.permute.xlu0 %5210 }
 0x294   : > { %6735 = vmatprep.subr.bf16.mxu1 %v7709_v21  ;;  %6469 = vmatprep.mubr.f32.mxu1 %v8426_v23  ;;  %8443 = vst [vmem:[#allocation45_spill] sm:$0xff] %v7798_v50 }
 0x295   : > { %6578 = vmatprep.mubr.f32.mxu0 %v8416_v30 }
 0x296   : > { %6470 = vmatmul.mubr.f32.gmra.mrb[12].mxu1 %v8427_v27 }
 0x297   : > { %6579 = vmatmul.mubr.f32.vlgmr.msra.gmra.mrb[10].mxu0 %v8417_v60  ;;  %6476 = vmatprep.mubr.f32.mxu1 %v8416_v30  ;;  %v7802_v61 = vpop.permute.xlu0 %5330 }
 0x298   : > { %6785 = vmatpush3.bf16.msra.mxu0 %v7706_v16  ;;  %6581 = vmatprep.mubr.f32.mxu0 %v8418_v26  ;;  %v7768_v16 = vpop.permute.xlu1 %3942 }
 0x299   : > { %8428 = vst [vmem:[#allocation17_spill] sm:$0xff] %v7768_v16 }
 0x29a   : > { %6477 = vmatmul.mubr.f32.vlgmr.msra.gmra.mrb[10].mxu1 %v8417_v60 }
 0x29b   : > { %6737 = vmatpush3.bf16.msra.mxu1 %v7709_v21  ;;  %6582 = vmatmul.mubr.f32.gmra.mrb[12].mxu0 %v8419_v5  ;;  %v7806_v40 = vpop.permute.xlu0 %5338 }
 0x29c   : > { %6479 = vmatprep.mubr.f32.mxu1 %v8418_v26  ;;  %6588 = vmatprep.mubr.f32.mxu0 %v8416_v30  ;;  %v7772_v21 = vpop.permute.xlu1 %3950 }
 0x29d   : > { %8430 = vst [vmem:[#allocation19_spill] sm:$0xff] %v7772_v21 }
 0x29e   : > { %6480 = vmatmul.mubr.f32.gmra.mrb[12].mxu1 %v8419_v5 }
 0x29f   : > { %6589 = vmatmul.mubr.f32.vlgmr.msra.gmra.mrb[10].mxu0 %v8417_v60  ;;  %6486 = vmatprep.mubr.f32.mxu1 %v8416_v30  ;;  %v7810_v30 = vpop.permute.xlu0 %5346 }
 0x2a0   : > { %6591 = vmatprep.mubr.f32.mxu0 %v8418_v26  ;;  %v7776_v31 = vpop.permute.xlu1 %3958 }
 0x2a1   : > { %8432 = vst [vmem:[#allocation8_spill] sm:$0xff] %v7776_v31 }
 0x2a2   : > { %6487 = vmatmul.mubr.f32.vlgmr.msra.gmra.mrb[10].mxu1 %v8417_v60 }
 0x2a3   : > { %6592 = vmatmul.mubr.f32.gmra.mrb[12].mxu0 %v8419_v5  ;;  %6489 = vmatprep.mubr.f32.mxu1 %v8418_v26  ;;  %v7814_v26 = vpop.permute.xlu0 %5354 }
 0x2a4   : > { %v7780_v44 = vpop.permute.xlu1 %3966 }
 0x2a5   : > { %8434 = vst [vmem:[#allocation11_spill] sm:$0xff] %v7780_v44 }
 0x2a6   : > { %6490 = vmatmul.mubr.f32.gmra.mrb[12].mxu1 %v8419_v5 }
 0x2a7   : > { %v7818_v17 = vpop.permute.xlu0 %5442 }
 0x2a8   : > { %v7784_v49 = vpop.permute.xlu1 %5190 }
 0x2a9   : > { %8436 = vst [vmem:[#allocation10_spill] sm:$0xff] %v7784_v49 }
 0x2ab   : > { %v7822_v24 = vpop.permute.xlu0 %5450 }
 0x2ac   : > { %v7788_v51 = vpop.permute.xlu1 %5198 }
 0x2ad   : > { %8438 = vst [vmem:[#allocation14_spill] sm:$0xff] %v7788_v51 }
 0x2af   : > { %v7826_v20 = vpop.permute.xlu0 %5458 }
 0x2b0   : > { %v7792_v43 = vpop.permute.xlu1 %5206 }
 0x2b1   : > { %8440 = vst [vmem:[#allocation13_spill] sm:$0xff] %v7792_v43 }
 0x2b3   : > { %v7830_v23 = vpop.permute.xlu0 %5466 }
 0x2b4   : > { %v7796_v29 = vpop.permute.xlu1 %5214 }
 0x2b5   : > { %8442 = vst [vmem:[#allocation16_spill] sm:$0xff] %v7796_v29 }
 0x2b7   : > { %v7834_v62 = vpop.permute.xlu0 %5554 }
 0x2b8   : > { %v7800_v2 = vpop.permute.xlu1 %5334 }
 0x2bb   : > { %v7838_v55 = vpop.permute.xlu0 %5562 }
 0x2bc   : > { %v7804_v3 = vpop.permute.xlu1 %5342 }
 0x2bf   : > { %v7842_v15 = vpop.permute.xlu0 %5570 }
 0x2c0   : > { %v7808_v25 = vpop.permute.xlu1 %5350 }
 0x2c3   : > { %v7846_v0 = vpop.permute.xlu0 %5578 }
 0x2c4   : > { %v7812_v60 = vpop.permute.xlu1 %5358 }
 0x2c7   : > { %v7850_v8 = vpop.permute.xlu0 %5666 }
 0x2c8   : > { %v7816_v5 = vpop.permute.xlu1 %5446  ;;  %8445 = vst [vmem:[#allocation47_spill] sm:$0xff] %v7850_v8 }
 0x2cc   : > { %v7820_v46 = vpop.permute.xlu1 %5454 }
 0x2d0   : > { %v7824_v19 = vpop.permute.xlu1 %5462 }
 0x2d4   : > { %v7828_v22 = vpop.permute.xlu1 %5470 }
 0x2d8   : > { %v7832_v27 = vpop.permute.xlu1 %5558 }
 0x2dc   : > { %v7836_v1 = vpop.permute.xlu1 %5566 }
 0x2e0   : > { %v7840_v58 = vpop.permute.xlu1 %5574 }
 0x2e4   : > { %v7844_v52 = vpop.permute.xlu1 %5582 }
 0x2e8   : > { %v7848_v13 = vpop.permute.xlu1 %5670 }
 0x2e9   : > { %8444 = vst [vmem:[#allocation46_spill] sm:$0xff] %v7848_v13 }
 0x372   : > { %v6590_v48 = vpop.f32.mrb[10].mxu0 }
 0x373   : > { %v5133_v37 = vmax.f32 %v6590_v48, 0.0  ;;  %v5110_v33 = vpop.f32.mrb[11].mxu0 }
 0x374   : > { %v7852_v39 = vmax.f32 %v5110_v33, 0.0 }
 0x375   : > { %v6488_v54 = vpop.f32.mrb[10].mxu1  ;;  %v5218_v35 = vmul.f32 %v7786_v42, %v5133_v37  ;;  %v5222_v36 = vmul.f32 %v7784_v49, %v5133_v37  ;;  %v5226_v10 = vmul.f32 %v7790_v38, %v5133_v37  ;;  %v5230_v48 = vmul.f32 %v7788_v51, %v5133_v37 }
 0x376   : > { %v6593_v53 = vpop.f32.mrb[12].mxu0  ;;  %v3862_v45 = vpop.f32.mrb[11].mxu1  ;;  %v5234_v9 = vmul.f32 %v7794_v12, %v5133_v37  ;;  %v5238_v6 = vmul.f32 %v7792_v43, %v5133_v37  ;;  %v5242_v33 = vmul.f32 %v7798_v50, %v5133_v37  ;;  %v5246_v14 = vmul.f32 %v7796_v29, %v5133_v37 }
 0x377   : > { %v7856_v11 = vpop.f32.mrb[13].mxu0  ;;  %v7866_v7 = vmul.f32 %v7786_v42, %v7852_v39  ;;  %v3885_v13 = vmax.f32 %v6488_v54, 0.0  ;;  %v7876_v12 = vmul.f32 %v7790_v38, %v7852_v39  ;;  %v7878_v43 = vmax.f32 %v6593_v53, 0.0  ;;  %v7884_v29 = vpop.permute.xlu1 %5678 }
 0x378   : > { %8446 = vst [vmem:[#allocation48_spill] sm:$0xff] %v7856_v11  ;;  %v7872_v11 = vmul.f32 %v7784_v49, %v7852_v39  ;;  %v7880_v50 = vmax.f32 %v3862_v45, 0.0 }
 0x379   : > { %8447 = vst [vmem:[#allocation49_spill] sm:$0xff] %v7866_v7  ;;  %v7868_v8 = vpop.f32.mrb[12].mxu1  ;;  %8450 = vst [vmem:[#allocation52_spill] sm:$0xff] %v7876_v12  ;;  %v7886_v7 = vpop.permute.xlu0 %5674  ;;  %v3970_v54 = vmul.f32 %v7770_v34, %v3885_v13  ;;  %v3978_v49 = vmul.f32 %v7774_v4, %v3885_v13  ;;  %v3986_v38 = vmul.f32 %v7778_v32, %v3885_v13 }
 0x37a   : > { %8448 = vst [vmem:[#allocation50_spill] sm:$0xff] %v7868_v8  ;;  %8449 = vst [vmem:[#allocation51_spill] sm:$0xff] %v7872_v11  ;;  %v7882_v37 = vpop.f32.mrb[13].mxu1  ;;  %v3974_v8 = vmul.f32 %v7768_v16, %v3885_v13  ;;  %v3982_v11 = vmul.f32 %v7772_v21, %v3885_v13  ;;  %v3990_v53 = vmul.f32 %v7776_v31, %v3885_v13  ;;  %v8454_v21 = vld [vmem:[#allocation20_spill] sm:$0xff] }
 0x37b   : > { %8451 = vst [vmem:[#allocation53_spill] sm:$0xff] %v7878_v43  ;;  %8452 = vst [vmem:[#allocation54_spill] sm:$0xff] %v7880_v50  ;;  %v3994_v45 = vmul.f32 %v7782_v28, %v3885_v13  ;;  %v4002_v12 = vadd.f32 %v3970_v54, %v7610_v63  ;;  %v4010_v34 = vadd.f32 %v3978_v49, %v7614_v59  ;;  %v8459_v54 = vld [vmem:[#allocation47_spill] sm:$0xff] }
 0x37c   : > { %8453 = vst [vmem:[#allocation55_spill] sm:$0xff] %v7882_v37  ;;  %v3998_v37 = vmul.f32 %v7780_v44, %v3885_v13  ;;  %v4006_v50 = vadd.f32 %v3974_v8, %v7612_v41  ;;  %v4014_v16 = vadd.f32 %v3982_v11, %v7616_v47  ;;  %v4018_v4 = vadd.f32 %v3986_v38, %v7618_v57  ;;  %v7905_v47 = vpop.permute.xlu1 %5686 }
 0x37d   : > { %v4022_v42 = vadd.f32 %v3990_v53, %v8454_v21  ;;  %v4026_v32 = vadd.f32 %v3994_v45, %v7646_v18  ;;  %v5250_v28 = vadd.f32 %v5218_v35, %v4002_v12  ;;  %v5258_v13 = vadd.f32 %v5226_v10, %v4010_v34  ;;  %8455 = vst [vmem:[#allocation20_spill] sm:$0xff] %v7905_v47  ;;  %v7907_v57 = vpop.permute.xlu0 %5682  ;;  %v8460_v45 = vld [vmem:[#allocation46_spill] sm:$0xff] }
 0x37e   : > { %v4030_v31 = vadd.f32 %v3998_v37, %v7640_v56  ;;  %v5254_v43 = vadd.f32 %v5222_v36, %v4006_v50  ;;  %v5262_v44 = vadd.f32 %v5230_v48, %v4014_v16  ;;  %v5266_v63 = vadd.f32 %v5234_v9, %v4018_v4  ;;  %8456 = vst [vmem:[#allocation56_spill] sm:$0xff] %v7907_v57 }
 0x37f   : > { %v5270_v41 = vadd.f32 %v5238_v6, %v4022_v42  ;;  %v5274_v59 = vadd.f32 %v5242_v33, %v4026_v32  ;;  %v5362_v11 = vadd.f32 %v7802_v61, %v5250_v28  ;;  %v5370_v56 = vadd.f32 %v7806_v40, %v5258_v13 }
 0x380   : > { %v5278_v8 = vadd.f32 %v5246_v14, %v4030_v31  ;;  %v5366_v18 = vadd.f32 %v7800_v2, %v5254_v43  ;;  %v5374_v35 = vadd.f32 %v7804_v3, %v5262_v44  ;;  %v5378_v10 = vadd.f32 %v7810_v30, %v5266_v63  ;;  %v7937_v33 = vpop.permute.xlu1 %5694 }
 0x381   : > { %v5382_v36 = vadd.f32 %v7808_v25, %v5270_v41  ;;  %v5386_v6 = vadd.f32 %v7814_v26, %v5274_v59  ;;  %v5474_v9 = vsub.f32 %v5362_v11, %v7818_v17  ;;  %v5482_v34 = vsub.f32 %v5370_v56, %v7822_v24  ;;  %8457 = vst [vmem:[#allocation57_spill] sm:$0xff] %v7937_v33  ;;  %v7939_v37 = vpop.permute.xlu0 %5690 }
 0x382   : > { %v5390_v14 = vadd.f32 %v7812_v60, %v5278_v8  ;;  %v5478_v16 = vsub.f32 %v5366_v18, %v7816_v5  ;;  %v5486_v21 = vsub.f32 %v5374_v35, %v7820_v46  ;;  %v5490_v4 = vsub.f32 %v5378_v10, %v7826_v20  ;;  %8458 = vst [vmem:[#allocation58_spill] sm:$0xff] %v7939_v37  ;;  %v8461_v35 = vld [vmem:[#allocation15_spill] sm:$0xff] }
 0x383   : > { %v5494_v31 = vsub.f32 %v5382_v36, %v7824_v19  ;;  %v5498_v32 = vsub.f32 %v5386_v6, %v7830_v23  ;;  %v5586_v28 = vmul.f32 %v7834_v62, %v5474_v9  ;;  %v5594_v42 = vmul.f32 %v7838_v55, %v5482_v34  ;;  %v8462_v36 = vld [vmem:[#allocation13_spill] sm:$0xff] }
 0x384   : > { %v5502_v44 = vsub.f32 %v5390_v14, %v7828_v22  ;;  %v5590_v49 = vmul.f32 %v7832_v27, %v5478_v16  ;;  %v5598_v38 = vmul.f32 %v7836_v1, %v5486_v21  ;;  %v5602_v43 = vmul.f32 %v7842_v15, %v5490_v4  ;;  %v8463_v14 = vld [vmem:[#allocation45_spill] sm:$0xff]  ;;  %v8464_v16 = vld [vmem:[#allocation16_spill] sm:$0xff] }
 0x385   : > { %v5606_v12 = vmul.f32 %v7840_v58, %v5494_v31  ;;  %v5610_v50 = vmul.f32 %v7846_v0, %v5498_v32  ;;  %v5698_v53 = vadd.f32 %v8459_v54, %v5586_v28  ;;  %v5706_v63 = vadd.f32 %v7886_v7, %v5594_v42  ;;  %v8465_v21 = vld [vmem:[#allocation53_spill] sm:$0xff]  ;;  %v8466_v4 = vld [vmem:[#allocation12_spill] sm:$0xff]  ;;  %v8470_v28 = vld [vmem:[#allocation50_spill] sm:$0xff] }
 0x386   : > { %v5614_v48 = vmul.f32 %v7844_v52, %v5502_v44  ;;  %v5702_v13 = vadd.f32 %v8460_v45, %v5590_v49  ;;  %v5710_v41 = vadd.f32 %v7884_v29, %v5598_v38  ;;  %v5714_v59 = vadd.f32 %v7907_v57, %v5602_v43  ;;  %v8468_v32 = vld [vmem:[#allocation48_spill] sm:$0xff]  ;;  %v8472_v42 = vld [vmem:[#allocation54_spill] sm:$0xff]  ;;  %v8474_v43 = vld [vmem:[#allocation17_spill] sm:$0xff] }
 0x387   : > { %v5718_v8 = vadd.f32 %v7905_v47, %v5606_v12  ;;  %v5722_v11 = vadd.f32 %v7939_v37, %v5610_v50  ;;  %v5229_v56 = vmul.f32 %v7788_v51, %v7852_v39  ;;  %v5233_v10 = vmul.f32 %v8461_v35, %v7852_v39  ;;  %5731 = vst.msk [vmem:[%s7958_s23 + $0x8] sm:$0xff] %vm5729_vm1, %v5698_v53  ;;  %v8475_v50 = vld [vmem:[#allocation5_spill] sm:$0xff]  ;;  %v8476_v53 = vld [vmem:[#allocation19_spill] sm:$0xff]  ;;  %v8487_v35 = vld [vmem:[#allocation28_spill] sm:$0xff] }
 0x388   : > { %v5726_v18 = vadd.f32 %v7937_v33, %v5614_v48  ;;  %v5237_v6 = vmul.f32 %v8462_v36, %v7852_v39  ;;  %v5241_v9 = vmul.f32 %v8463_v14, %v7852_v39  ;;  %5735 = vst.msk [vmem:[%s7958_s23 + $0x28] sm:$0xff] %vm5729_vm1, %v5702_v13  ;;  %5739 = vst.msk [vmem:[%s7958_s23 + $0x48] sm:$0xff] %vm5729_vm1, %v5706_v63  ;;  %v7983_v44 = vmax.f32 %v8468_v32, 0.0  ;;  %v8477_v63 = vld [vmem:[#allocation9_spill] sm:$0xff]  ;;  %v8480_v32 = vld [vmem:[#allocation11_spill] sm:$0xff] }
 0x389   : > { %5743 = vst.msk [vmem:[%s7958_s23 + $0x68] sm:$0xff] %vm5729_vm1, %v5710_v41  ;;  %v5245_v34 = vmul.f32 %v8464_v16, %v7852_v39  ;;  %5747 = vst.msk [vmem:[%s7958_s23 + $0x88] sm:$0xff] %vm5729_vm1, %v5714_v59  ;;  %v7980_v31 = vmul.f32 %v8466_v4, %v8465_v21  ;;  %v7986_v49 = vmax.f32 %v8470_v28, 0.0  ;;  %v8473_v39 = vld [vmem:[#allocation18_spill] sm:$0xff]  ;;  %v3973_v12 = vmul.f32 %v8474_v43, %v8472_v42  ;;  %v8478_v59 = vld [vmem:[#allocation8_spill] sm:$0xff] }
 0x38a   : > { %5751 = vst.msk [vmem:[%s7958_s23 + $0xa8] sm:$0xff] %vm5729_vm1, %v5718_v8  ;;  %5755 = vst.msk [vmem:[%s7958_s23 + $0xc8] sm:$0xff] %vm5729_vm1, %v5722_v11  ;;  %v3969_v38 = vmul.f32 %v8473_v39, %v8472_v42  ;;  %v3977_v48 = vmul.f32 %v8475_v50, %v8472_v42  ;;  %v3981_v13 = vmul.f32 %v8476_v53, %v8472_v42  ;;  %v8479_v11 = vld [vmem:[#allocation6_spill] sm:$0xff]  ;;  %v8483_v50 = vld [vmem:[#allocation23_spill] sm:$0xff] }
 0x38b   : > { %5759 = vst.msk [vmem:[%s7958_s23 + $0xe8] sm:$0xff] %vm5729_vm1, %v5726_v18  ;;  %8467 = vst [vmem:[#allocation47_spill] sm:$0xff] %v7980_v31  ;;  %v3985_v41 = vmul.f32 %v8477_v63, %v8472_v42  ;;  %v3989_v8 = vmul.f32 %v8478_v59, %v8472_v42  ;;  %v3993_v18 = vmul.f32 %v8479_v11, %v8472_v42  ;;  %v8481_v31 = vld [vmem:[#allocation21_spill] sm:$0xff]  ;;  %v8482_v39 = vld [vmem:[#allocation22_spill] sm:$0xff] }
 0x38c   : > { %8469 = vst [vmem:[#allocation46_spill] sm:$0xff] %v7983_v44  ;;  %8471 = vst [vmem:[#allocation48_spill] sm:$0xff] %v7986_v49  ;;  %v3997_v28 = vmul.f32 %v8480_v32, %v8472_v42  ;;  %v4001_v43 = vadd.f32 %v3969_v38, %v8481_v31  ;;  %v4005_v49 = vadd.f32 %v3973_v12, %v8482_v39  ;;  %v8484_v44 = vld [vmem:[#allocation24_spill] sm:$0xff]  ;;  %v8485_v16 = vld [vmem:[#allocation25_spill] sm:$0xff] }
 0x38d   : > { %v4009_v4 = vadd.f32 %v3977_v48, %v8483_v50  ;;  %v4013_v53 = vadd.f32 %v3981_v13, %v8484_v44  ;;  %v4017_v14 = vadd.f32 %v3985_v41, %v8485_v16  ;;  %v8486_v63 = vld [vmem:[#allocation26_spill] sm:$0xff]  ;;  %v4025_v59 = vadd.f32 %v3993_v18, %v8487_v35  ;;  %v8488_v51 = vld [vmem:[#allocation27_spill] sm:$0xff]  ;;  %v8489_v11 = vld [vmem:[#allocation49_spill] sm:$0xff] }
 0x38e   : > { %v4021_v36 = vadd.f32 %v3989_v8, %v8486_v63  ;;  %v4029_v21 = vadd.f32 %v3997_v28, %v8488_v51  ;;  %v5249_v33 = vadd.f32 %v8489_v11, %v4001_v43  ;;  %v8490_v37 = vld [vmem:[#allocation51_spill] sm:$0xff]  ;;  %v8491_v32 = vld [vmem:[#allocation52_spill] sm:$0xff] }
 0x38f   : > { %v5253_v42 = vadd.f32 %v8490_v37, %v4005_v49  ;;  %v5257_v31 = vadd.f32 %v8491_v32, %v4009_v4  ;;  %v5261_v38 = vadd.f32 %v5229_v56, %v4013_v53  ;;  %v5265_v39 = vadd.f32 %v5233_v10, %v4017_v14 }
 0x390   : > { %v5269_v12 = vadd.f32 %v5237_v6, %v4021_v36  ;;  %v5273_v50 = vadd.f32 %v5241_v9, %v4025_v59  ;;  %v5277_v48 = vadd.f32 %v5245_v34, %v4029_v21  ;;  %v5361_v44 = vadd.f32 %v7802_v61, %v5249_v33 }
 0x391   : > { %v5365_v16 = vadd.f32 %v7800_v2, %v5253_v42  ;;  %v5369_v13 = vadd.f32 %v7806_v40, %v5257_v31  ;;  %v5373_v35 = vadd.f32 %v7804_v3, %v5261_v38  ;;  %v5377_v51 = vadd.f32 %v7810_v30, %v5265_v39  ;;  %v8492_v39 = vld [vmem:[#allocation58_spill] sm:$0xff] }
 0x392   : > { %v5381_v43 = vadd.f32 %v7808_v25, %v5269_v12  ;;  %v5385_v37 = vadd.f32 %v7814_v26, %v5273_v50  ;;  %v5389_v56 = vadd.f32 %v7812_v60, %v5277_v48  ;;  %v5473_v10 = vsub.f32 %v5361_v44, %v7818_v17  ;;  %v8493_v50 = vld [vmem:[#allocation57_spill] sm:$0xff] }
 0x393   : > { %v5477_v36 = vsub.f32 %v5365_v16, %v7816_v5  ;;  %v5481_v33 = vsub.f32 %v5369_v13, %v7822_v24  ;;  %v5485_v6 = vsub.f32 %v5373_v35, %v7820_v46  ;;  %v5489_v14 = vsub.f32 %v5377_v51, %v7826_v20  ;;  %v8494_v44 = vld [vmem:[#allocation53_spill] sm:$0xff]  ;;  %v8495_v16 = vld [vmem:[#allocation10_spill] sm:$0xff]  ;;  %v8496_v35 = vld [vmem:[#allocation7_spill] sm:$0xff] }
 0x394   : > { %v5493_v9 = vsub.f32 %v5381_v43, %v7824_v19  ;;  %v5497_v34 = vsub.f32 %v5385_v37, %v7830_v23  ;;  %v5501_v21 = vsub.f32 %v5389_v56, %v7828_v22  ;;  %v5585_v4 = vmul.f32 %v7834_v62, %v5473_v10  ;;  %v8497_v43 = vld [vmem:[#allocation14_spill] sm:$0xff]  ;;  %v8498_v56 = vld [vmem:[#allocation15_spill] sm:$0xff] }
 0x395   : > { %v5589_v49 = vmul.f32 %v7832_v27, %v5477_v36  ;;  %v5593_v53 = vmul.f32 %v7838_v55, %v5481_v33  ;;  %v5597_v63 = vmul.f32 %v7836_v1, %v5485_v6  ;;  %v5601_v41 = vmul.f32 %v7842_v15, %v5489_v14  ;;  %v8499_v36 = vld [vmem:[#allocation13_spill] sm:$0xff] }
 0x396   : > { %v5605_v59 = vmul.f32 %v7840_v58, %v5493_v9  ;;  %v5609_v8 = vmul.f32 %v7846_v0, %v5497_v34  ;;  %v5613_v11 = vmul.f32 %v7844_v52, %v5501_v21  ;;  %v5697_v18 = vadd.f32 %v8459_v54, %v5585_v4  ;;  %v8500_v6 = vld [vmem:[#allocation45_spill] sm:$0xff]  ;;  %v8501_v9 = vld [vmem:[#allocation16_spill] sm:$0xff]  ;;  %v8502_v21 = vld [vmem:[#allocation46_spill] sm:$0xff] }
 0x397   : > { %v5701_v32 = vadd.f32 %v8460_v45, %v5589_v49  ;;  %v5705_v28 = vadd.f32 %v7886_v7, %v5593_v53  ;;  %v5709_v42 = vadd.f32 %v7884_v29, %v5597_v63  ;;  %v5713_v31 = vadd.f32 %v7907_v57, %v5601_v41  ;;  %v8503_v4 = vld [vmem:[#allocation12_spill] sm:$0xff]  ;;  %v8506_v63 = vld [vmem:[#allocation18_spill] sm:$0xff] }
 0x398   : > { %v5717_v38 = vadd.f32 %v7905_v47, %v5605_v59  ;;  %v5721_v12 = vadd.f32 %v8492_v39, %v5609_v8  ;;  %v5725_v48 = vadd.f32 %v8493_v50, %v5613_v11  ;;  %v5224_v13 = vmul.f32 %v8495_v16, %v8494_v44  ;;  %5730 = vst.msk [vmem:[%s7958_s23] sm:$0xff] %vm5729_vm1, %v5697_v18  ;;  %v8505_v53 = vld [vmem:[#allocation48_spill] sm:$0xff]  ;;  %v8507_v59 = vld [vmem:[#allocation17_spill] sm:$0xff] }
 0x399   : > { %v5228_v51 = vmul.f32 %v8496_v35, %v8494_v44  ;;  %v5232_v37 = vmul.f32 %v8497_v43, %v8494_v44  ;;  %v5236_v10 = vmul.f32 %v8498_v56, %v8494_v44  ;;  %5734 = vst.msk [vmem:[%s7958_s23 + $0x20] sm:$0xff] %vm5729_vm1, %v5701_v32  ;;  %5738 = vst.msk [vmem:[%s7958_s23 + $0x40] sm:$0xff] %vm5729_vm1, %v5705_v28  ;;  %v8508_v11 = vld [vmem:[#allocation5_spill] sm:$0xff]  ;;  %v8509_v32 = vld [vmem:[#allocation19_spill] sm:$0xff] }
 0x39a   : > { %5742 = vst.msk [vmem:[%s7958_s23 + $0x60] sm:$0xff] %vm5729_vm1, %v5709_v42  ;;  %v5240_v33 = vmul.f32 %v8499_v36, %v8494_v44  ;;  %v5244_v14 = vmul.f32 %v8500_v6, %v8494_v44  ;;  %v5248_v34 = vmul.f32 %v8501_v9, %v8494_v44  ;;  %5746 = vst.msk [vmem:[%s7958_s23 + $0x80] sm:$0xff] %vm5729_vm1, %v5713_v31  ;;  %v8510_v42 = vld [vmem:[#allocation9_spill] sm:$0xff]  ;;  %v8515_v9 = vld [vmem:[#allocation30_spill] sm:$0xff] }
 0x39b   : > { %5750 = vst.msk [vmem:[%s7958_s23 + $0xa0] sm:$0xff] %vm5729_vm1, %v5717_v38  ;;  %5754 = vst.msk [vmem:[%s7958_s23 + $0xc0] sm:$0xff] %vm5729_vm1, %v5721_v12  ;;  %v8079_v49 = vmul.f32 %v8503_v4, %v8502_v21  ;;  %v3972_v41 = vmul.f32 %v8506_v63, %v8505_v53  ;;  %v3976_v8 = vmul.f32 %v8507_v59, %v8505_v53  ;;  %v8511_v38 = vld [vmem:[#allocation8_spill] sm:$0xff]  ;;  %v8513_v4 = vld [vmem:[#allocation11_spill] sm:$0xff] }
 0x39c   : > { %5758 = vst.msk [vmem:[%s7958_s23 + $0xe0] sm:$0xff] %vm5729_vm1, %v5725_v48  ;;  %v3980_v18 = vmul.f32 %v8508_v11, %v8505_v53  ;;  %v3984_v28 = vmul.f32 %v8509_v32, %v8505_v53  ;;  %v3988_v31 = vmul.f32 %v8510_v42, %v8505_v53  ;;  %v3992_v12 = vmul.f32 %v8511_v38, %v8505_v53  ;;  %v8512_v48 = vld [vmem:[#allocation6_spill] sm:$0xff]  ;;  %v8514_v63 = vld [vmem:[#allocation29_spill] sm:$0xff]  ;;  %v8516_v11 = vld [vmem:[#allocation31_spill] sm:$0xff] }
 0x39d   : > { %8504 = vst [vmem:[#allocation50_spill] sm:$0xff] %v8079_v49  ;;  %v3996_v44 = vmul.f32 %v8512_v48, %v8505_v53  ;;  %v4000_v49 = vmul.f32 %v8513_v4, %v8505_v53  ;;  %v4004_v59 = vadd.f32 %v3972_v41, %v8514_v63  ;;  %v4008_v6 = vadd.f32 %v3976_v8, %v8515_v9  ;;  %v8517_v56 = vld [vmem:[#allocation32_spill] sm:$0xff]  ;;  %v8518_v43 = vld [vmem:[#allocation33_spill] sm:$0xff]  ;;  %v8519_v42 = vld [vmem:[#allocation34_spill] sm:$0xff] }
 0x39e   : > { %v4012_v36 = vadd.f32 %v3980_v18, %v8516_v11  ;;  %v4016_v32 = vadd.f32 %v3984_v28, %v8517_v56  ;;  %v4020_v35 = vadd.f32 %v3988_v31, %v8518_v43  ;;  %v4024_v16 = vadd.f32 %v3992_v12, %v8519_v42  ;;  %v8520_v21 = vld [vmem:[#allocation35_spill] sm:$0xff]  ;;  %v8521_v50 = vld [vmem:[#allocation36_spill] sm:$0xff] }
 0x39f   : > { %v4028_v38 = vadd.f32 %v3996_v44, %v8520_v21  ;;  %v4032_v39 = vadd.f32 %v4000_v49, %v8521_v50  ;;  %v8522_v48 = vld [vmem:[#allocation47_spill] sm:$0xff]  ;;  %v5256_v57 = vadd.f32 %v5224_v13, %v4008_v6 }
 0x3a0   : > { %v5252_v47 = vadd.f32 %v8522_v48, %v4004_v59  ;;  %v5260_v53 = vadd.f32 %v5228_v51, %v4012_v36  ;;  %v5264_v4 = vadd.f32 %v5232_v37, %v4016_v32  ;;  %v5268_v63 = vadd.f32 %v5236_v10, %v4020_v35  ;;  %v8523_v48 = vld [vmem:[#allocation56_spill] sm:$0xff] }
 0x3a1   : > { %v5272_v41 = vadd.f32 %v5240_v33, %v4024_v16  ;;  %v5276_v9 = vadd.f32 %v5244_v14, %v4028_v38  ;;  %v5280_v8 = vadd.f32 %v5248_v34, %v4032_v39  ;;  %v5368_v56 = vadd.f32 %v7800_v2, %v5256_v57 }
 0x3a2   : > { %v5364_v11 = vadd.f32 %v7802_v61, %v5252_v47  ;;  %v5372_v43 = vadd.f32 %v7806_v40, %v5260_v53  ;;  %v5376_v18 = vadd.f32 %v7804_v3, %v5264_v4  ;;  %v5380_v21 = vadd.f32 %v7810_v30, %v5268_v63  ;;  %v8524_v4 = vld [vmem:[#allocation20_spill] sm:$0xff]  ;;  %v8525_v63 = vld [vmem:[#allocation58_spill] sm:$0xff] }
 0x3a3   : > { %v5384_v50 = vadd.f32 %v7808_v25, %v5272_v41  ;;  %v5388_v13 = vadd.f32 %v7814_v26, %v5276_v9  ;;  %v5392_v51 = vadd.f32 %v7812_v60, %v5280_v8  ;;  %v5480_v39 = vsub.f32 %v5368_v56, %v7816_v5  ;;  %v8526_v9 = vld [vmem:[#allocation57_spill] sm:$0xff]  ;;  %v8528_v56 = vld [vmem:[#allocation10_spill] sm:$0xff] }
 0x3a4   : > { %v5476_v16 = vsub.f32 %v5364_v11, %v7818_v17  ;;  %v5484_v47 = vsub.f32 %v5372_v43, %v7822_v24  ;;  %v5488_v57 = vsub.f32 %v5376_v18, %v7820_v46  ;;  %v5492_v35 = vsub.f32 %v5380_v21, %v7826_v20  ;;  %v8527_v11 = vld [vmem:[#allocation46_spill] sm:$0xff]  ;;  %v8529_v18 = vld [vmem:[#allocation7_spill] sm:$0xff] }
 0x3a5   : > { %v5496_v37 = vsub.f32 %v5384_v50, %v7824_v19  ;;  %v5500_v10 = vsub.f32 %v5388_v13, %v7830_v23  ;;  %v5504_v36 = vsub.f32 %v5392_v51, %v7828_v22  ;;  %v5592_v6 = vmul.f32 %v7832_v27, %v5480_v39  ;;  %v8530_v50 = vld [vmem:[#allocation14_spill] sm:$0xff]  ;;  %v8531_v51 = vld [vmem:[#allocation55_spill] sm:$0xff] }
 0x3a6   : > { %v5588_v33 = vmul.f32 %v7834_v62, %v5476_v16  ;;  %v5596_v14 = vmul.f32 %v7838_v55, %v5484_v47  ;;  %v5600_v34 = vmul.f32 %v7836_v1, %v5488_v57  ;;  %v5604_v49 = vmul.f32 %v7842_v15, %v5492_v35  ;;  %v8532_v39 = vld [vmem:[#allocation15_spill] sm:$0xff]  ;;  %v8533_v57 = vld [vmem:[#allocation13_spill] sm:$0xff] }
 0x3a7   : > { %v5608_v59 = vmul.f32 %v7840_v58, %v5496_v37  ;;  %v5612_v32 = vmul.f32 %v7846_v0, %v5500_v10  ;;  %v5616_v28 = vmul.f32 %v7844_v52, %v5504_v36  ;;  %v5704_v31 = vadd.f32 %v8460_v45, %v5592_v6  ;;  %v8534_v37 = vld [vmem:[#allocation45_spill] sm:$0xff]  ;;  %v8535_v36 = vld [vmem:[#allocation16_spill] sm:$0xff]  ;;  %v8536_v6 = vld [vmem:[#allocation18_spill] sm:$0xff] }
 0x3a8   : > { %v5700_v42 = vadd.f32 %v8459_v54, %v5588_v33  ;;  %v5708_v38 = vadd.f32 %v7886_v7, %v5596_v14  ;;  %v5712_v12 = vadd.f32 %v7884_v29, %v5600_v34  ;;  %v5716_v44 = vadd.f32 %v8523_v48, %v5604_v49  ;;  %v8537_v34 = vld [vmem:[#allocation17_spill] sm:$0xff] }
 0x3a9   : > { %v5720_v53 = vadd.f32 %v8524_v4, %v5608_v59  ;;  %v5724_v41 = vadd.f32 %v8525_v63, %v5612_v32  ;;  %v5728_v8 = vadd.f32 %v8526_v9, %v5616_v28  ;;  %v5223_v43 = vmul.f32 %v8528_v56, %v8527_v11  ;;  %5737 = vst.msk [vmem:[%s7958_s23 + $0x38] sm:$0xff] %vm5729_vm1, %v5704_v31  ;;  %v8538_v59 = vld [vmem:[#allocation5_spill] sm:$0xff]  ;;  %v8539_v28 = vld [vmem:[#allocation19_spill] sm:$0xff]  ;;  %v8542_v56 = vld [vmem:[#allocation6_spill] sm:$0xff] }
 0x3aa   : > { %v5227_v21 = vmul.f32 %v8529_v18, %v8527_v11  ;;  %v5231_v13 = vmul.f32 %v8530_v50, %v8527_v11  ;;  %5733 = vst.msk [vmem:[%s7958_s23 + $0x18] sm:$0xff] %vm5729_vm1, %v5700_v42  ;;  %5741 = vst.msk [vmem:[%s7958_s23 + $0x58] sm:$0xff] %vm5729_vm1, %v5708_v38  ;;  %v3886_v16 = vmax.f32 %v8531_v51, 0.0  ;;  %v5235_v47 = vmul.f32 %v8532_v39, %v8527_v11  ;;  %v8540_v31 = vld [vmem:[#allocation9_spill] sm:$0xff]  ;;  %v8543_v18 = vld [vmem:[#allocation11_spill] sm:$0xff] }
 0x3ab   : > { %5745 = vst.msk [vmem:[%s7958_s23 + $0x78] sm:$0xff] %vm5729_vm1, %v5712_v12  ;;  %v5239_v35 = vmul.f32 %v8533_v57, %v8527_v11  ;;  %v5243_v10 = vmul.f32 %v8534_v37, %v8527_v11  ;;  %v5247_v33 = vmul.f32 %v8535_v36, %v8527_v11  ;;  %5749 = vst.msk [vmem:[%s7958_s23 + $0x98] sm:$0xff] %vm5729_vm1, %v5716_v44  ;;  %v8541_v12 = vld [vmem:[#allocation8_spill] sm:$0xff]  ;;  %v8544_v50 = vld [vmem:[#allocation37_spill] sm:$0xff] }
 0x3ac   : > { %5753 = vst.msk [vmem:[%s7958_s23 + $0xb8] sm:$0xff] %vm5729_vm1, %v5720_v53  ;;  %5757 = vst.msk [vmem:[%s7958_s23 + $0xd8] sm:$0xff] %vm5729_vm1, %v5724_v41  ;;  %v3971_v14 = vmul.f32 %v8536_v6, %v3886_v16  ;;  %v3975_v49 = vmul.f32 %v8537_v34, %v3886_v16  ;;  %v3979_v32 = vmul.f32 %v8538_v59, %v3886_v16  ;;  %v8545_v51 = vld [vmem:[#allocation38_spill] sm:$0xff]  ;;  %v8546_v39 = vld [vmem:[#allocation39_spill] sm:$0xff] }
 0x3ad   : > { %5761 = vst.msk [vmem:[%s7958_s23 + $0xf8] sm:$0xff] %vm5729_vm1, %v5728_v8  ;;  %v3983_v42 = vmul.f32 %v8539_v28, %v3886_v16  ;;  %v3987_v38 = vmul.f32 %v8540_v31, %v3886_v16  ;;  %v3991_v11 = vmul.f32 %v8541_v12, %v3886_v16  ;;  %v3995_v44 = vmul.f32 %v8542_v56, %v3886_v16  ;;  %v8547_v37 = vld [vmem:[#allocation40_spill] sm:$0xff]  ;;  %v8548_v6 = vld [vmem:[#allocation41_spill] sm:$0xff]  ;;  %v8549_v59 = vld [vmem:[#allocation42_spill] sm:$0xff] }
 0x3ae   : > { %v3999_v53 = vmul.f32 %v8543_v18, %v3886_v16  ;;  %v4003_v41 = vadd.f32 %v3971_v14, %v8544_v50  ;;  %v4007_v8 = vadd.f32 %v3975_v49, %v8545_v51  ;;  %v4011_v57 = vadd.f32 %v3979_v32, %v8546_v39  ;;  %v8550_v9 = vld [vmem:[#allocation43_spill] sm:$0xff]  ;;  %v8551_v63 = vld [vmem:[#allocation44_spill] sm:$0xff]  ;;  %v8552_v4 = vld [vmem:[#allocation50_spill] sm:$0xff] }
 0x3af   : > { %v4015_v36 = vadd.f32 %v3983_v42, %v8547_v37  ;;  %v4019_v34 = vadd.f32 %v3987_v38, %v8548_v6  ;;  %v4023_v28 = vadd.f32 %v3991_v11, %v8549_v59  ;;  %v4027_v31 = vadd.f32 %v3995_v44, %v8550_v9 }
 0x3b0   : > { %v4031_v12 = vadd.f32 %v3999_v53, %v8551_v63  ;;  %v5251_v56 = vadd.f32 %v8552_v4, %v4003_v41  ;;  %v5255_v48 = vadd.f32 %v5223_v43, %v4007_v8  ;;  %v5259_v16 = vadd.f32 %v5227_v21, %v4011_v57 }
 0x3b1   : > { %v5263_v18 = vadd.f32 %v5231_v13, %v4015_v36  ;;  %v5267_v14 = vadd.f32 %v5235_v47, %v4019_v34  ;;  %v5271_v50 = vadd.f32 %v5239_v35, %v4023_v28  ;;  %v5275_v49 = vadd.f32 %v5243_v10, %v4027_v31 }
 0x3b2   : > { %v5279_v51 = vadd.f32 %v5247_v33, %v4031_v12  ;;  %v5363_v32 = vadd.f32 %v7802_v61, %v5251_v56  ;;  %v5367_v42 = vadd.f32 %v7800_v2, %v5255_v48  ;;  %v5371_v38 = vadd.f32 %v7806_v40, %v5259_v16 }
 0x3b3   : > { %v5375_v9 = vadd.f32 %v7804_v3, %v5263_v18  ;;  %v5379_v63 = vadd.f32 %v7810_v30, %v5267_v14  ;;  %v5383_v4 = vadd.f32 %v7808_v25, %v5271_v50  ;;  %v5387_v43 = vadd.f32 %v7814_v26, %v5275_v49 }
 0x3b4   : > { %v5391_v21 = vadd.f32 %v7812_v60, %v5279_v51  ;;  %v5475_v13 = vsub.f32 %v5363_v32, %v7818_v17  ;;  %v5479_v61 = vsub.f32 %v5367_v42, %v7816_v5  ;;  %v5483_v47 = vsub.f32 %v5371_v38, %v7822_v24 }
 0x3b5   : > { %v5487_v2 = vsub.f32 %v5375_v9, %v7820_v46  ;;  %v5491_v40 = vsub.f32 %v5379_v63, %v7826_v20  ;;  %v5495_v3 = vsub.f32 %v5383_v4, %v7824_v19  ;;  %v5499_v30 = vsub.f32 %v5387_v43, %v7830_v23  ;;  %v8555_v23 = vld [vmem:[#allocation58_spill] sm:$0xff] }
 0x3b6   : > { %v5503_v25 = vsub.f32 %v5391_v21, %v7828_v22  ;;  %v5587_v60 = vmul.f32 %v7834_v62, %v5475_v13  ;;  %v5591_v26 = vmul.f32 %v7832_v27, %v5479_v61  ;;  %v5595_v5 = vmul.f32 %v7838_v55, %v5483_v47 }
 0x3b7   : > { %v5599_v17 = vmul.f32 %v7836_v1, %v5487_v2  ;;  %v5603_v46 = vmul.f32 %v7842_v15, %v5491_v40  ;;  %v5607_v24 = vmul.f32 %v7840_v58, %v5495_v3  ;;  %v5611_v19 = vmul.f32 %v7846_v0, %v5499_v30  ;;  %v8553_v0 = vld [vmem:[#allocation56_spill] sm:$0xff] }
 0x3b8   : > { %v5615_v20 = vmul.f32 %v7844_v52, %v5503_v25  ;;  %v5699_v62 = vadd.f32 %v8459_v54, %v5587_v60  ;;  %v5703_v55 = vadd.f32 %v8460_v45, %v5591_v26  ;;  %v5707_v1 = vadd.f32 %v7886_v7, %v5595_v5  ;;  %v8554_v58 = vld [vmem:[#allocation20_spill] sm:$0xff]  ;;  %v8556_v7 = vld [vmem:[#allocation57_spill] sm:$0xff] }
 0x3b9   : > { %v5711_v15 = vadd.f32 %v7884_v29, %v5599_v17  ;;  %v5715_v52 = vadd.f32 %v8553_v0, %v5603_v46  ;;  %v5719_v22 = vadd.f32 %v8554_v58, %v5607_v24  ;;  %v5723_v27 = vadd.f32 %v8555_v23, %v5611_v19 }
 0x3ba   : > { %v5727_v54 = vadd.f32 %v8556_v7, %v5615_v20  ;;  %5732 = vst.msk [vmem:[%s7958_s23 + $0x10] sm:$0xff] %vm5729_vm1, %v5699_v62  ;;  %5736 = vst.msk [vmem:[%s7958_s23 + $0x30] sm:$0xff] %vm5729_vm1, %v5703_v55 }
 0x3bb   : > { %5740 = vst.msk [vmem:[%s7958_s23 + $0x50] sm:$0xff] %vm5729_vm1, %v5707_v1  ;;  %5744 = vst.msk [vmem:[%s7958_s23 + $0x70] sm:$0xff] %vm5729_vm1, %v5711_v15 }
 0x3bc   : > { %5748 = vst.msk [vmem:[%s7958_s23 + $0x90] sm:$0xff] %vm5729_vm1, %v5715_v52  ;;  %5752 = vst.msk [vmem:[%s7958_s23 + $0xb0] sm:$0xff] %vm5729_vm1, %v5719_v22 }
 0x3bd   : > { %5756 = vst.msk [vmem:[%s7958_s23 + $0xd0] sm:$0xff] %vm5729_vm1, %v5723_v27  ;;  %5760 = vst.msk [vmem:[%s7958_s23 + $0xf0] sm:$0xff] %vm5729_vm1, %v5727_v54 }
 0x3be   : > { %6963 = shalt.err (!%p6960_p3)
}
 0x3bf   : > { %s6964_s20 = scalar_lea.hbm %s8219_s12, 4096  ;;  %s6968_s23 = scalar_lea.hbm %s8294_s8, 8192 }
 0x3c0   : > { %p6965_p4 = scmp.ne.s32.totalorder %s8219_s12, %s6964_s20  ;;  %p6969_p9 = scmp.lt.u32.totalorder %s8219_s12, %s8294_s8 }
 0x3c1   : > { %p6970_p10 = scmp.lt.u32.totalorder %s6968_s23, %s6964_s20  ;;  %p6972_p12 = scmp.lt.u32.totalorder %s6964_s20, %s8219_s12 }
 0x3c2   : > { %p6966_p7 = pnand %p6965_p4, %p7101_p5 }
 0x3c3   : > { %p6971_p11 = por %p6970_p10, %p6969_p9 }
 0x3c4   : > { %p6967_p8 = pneg %p6966_p7 }
 0x3c5   : > { %p6973_p13 = por %p6972_p12, %p6971_p11 }
 0x3c7   : > { %p6974_p0 = pnand %p6973_p13, %p6967_p8 }
 0x3c9   : > { %6977 = shalt.err (!%p6974_p0)
}
 0x3ca   : > { %s7016_s10 = smov 128   ;;  %s7017_s25 = smov 8  }
 0x3cb   : > { %6906 = dma.vmem_to_hbm [thread:$0]  (%p7101_p5), %s8221_s26, 4096, %s8219_s12, %s8245_s13, %s7016_s10, %s7016_s10, %s7017_s25  }
 0x3cc PF: > { %p6912_p1 = scmp.ge.s32.totalorder %s7012_s30, 2  ;;  %s5791_s17 = sand.u32 1, %s7000_s27  }
 0x3cd   : > { %s5792_s18 = scalar_lea.sflag [#allocation3], %s5791_s17 }
 0x3ce   : > { %p6909_p2 = pnand %p6912_p1, %p7105_p6 }
 0x3d0   : > { %6995 = dma.done.wait (!%p6909_p2), %s5792_s18, 4096  }
 0x3d1   : > { %6997 = vsyncadd (!%p6909_p2), %s5792_s18, 4294963200  ;;  %p18_p3 = scmp.ge.s32.totalorder %s7088_s11, 4   ;;  %s8557_s27 = smov %s7004_s28 }
 0x3d2   : > { %s8558_s28 = smov %s7008_s29  ;;  %s8559_s29 = smov %s7099_s14 }
 0x3d3   : > { %s8560_s30 = smov %s7088_s11  ;;  %20 = sbr.rel (!%p18_p3) target bundleno = 3 (0x3), region = 93 }
 0x3da   :  { %5797 = vsyncpa [#allocation3], 1 }
 0x3db   :  { %5799 = vsyncpa [#allocation3 + $0x1], 1 }

// kernel: factorized_increase_forward.2
= control target key start
LH: loop header
LB: loop body
LE: loop exit
PB: predicated region body
PF: predicated region fallthrough
CT: control target
= control target key end

     0   :  { %s6917_s21 = smov 0   ;;  %s8110_s0 = inlined_call_operand.vmem [shape: f32[2,4,16,16], index: 0, kind: input, shape index: {}]   ;;  %s8111_s1 = inlined_call_operand.vmem [shape: f32[32,16], index: 1, kind: input, shape index: {}]   ;;  %s8112_s2 = inlined_call_operand.vmem [shape: f32[16,32], index: 2, kind: input, shape index: {}]   ;;  %s8113_s3 = inlined_call_operand.vmem [shape: f32[4,8,1,1], index: 3, kind: input, shape index: {}]   ;;  %s8114_s4 = inlined_call_operand.vmem [shape: f32[8,1,1], index: 4, kind: input, shape index: {}]   ;;  %s8115_s5 = inlined_call_operand.vmem [shape: f32[2,8,1,1], index: 5, kind: output, shape index: {0}]   ;;  %s8116_s6 = inlined_call_operand.vmem [shape: f32[2,8,1,1], index: 6, kind: output, shape index: {1}]  }
   0x1 LB: > { %s5820_s22 = sadd.s32 4294967295, %s6879_s21   ;;  %p5824_p0 = scmp.ge.s32.totalorder %s6879_s21, 1  ;;  %s6879_s21 = sphi %s6917_s21, %s17_s21  }
   0x2   : > { %p215_p1 = scmp.lt.s32.totalorder %s6879_s21, 3 }
   0x4   : > { %p216_p2 = pnand %p5824_p0, %p215_p1 }
   0x6   : > { %219 = sbr.rel (%p216_p2) target bundleno = 1173 (0x495), region = 40 }
   0xd   : > { %v265_v0 = vld [vmem:[%s8112_s2] sm:$0xff]  ;;  %v266_v1 = vld [vmem:[%s8112_s2 + $0x8] sm:$0xff]  ;;  %p248_p3 = scmp.lt.s32.totalorder %s5820_s22, 1  ;;  %vm269_vm0 = vcmask 130048   ;;  %v263_v52 = vld [vmem:[%s8111_s1 + $0x10] sm:$0xff]  ;;  %vm5350_vm1 = vcmask 261120  }
   0xe   : > { %v277_v2 = vand.u32 4294901760, %v265_v0  ;;  %v280_v3 = vand.u32 4294901760, %v266_v1  ;;  %v261_v44 = vld [vmem:[%s8111_s1] sm:$0xff]  ;;  %v262_v51 = vld [vmem:[%s8111_s1 + $0x8] sm:$0xff]  ;;  %v785_v54 = vsel %vm269_vm0, %v263_v52, 0  ;;  %v264_v55 = vld [vmem:[%s8111_s1 + $0x18] sm:$0xff] }
   0xf   : > { %s8221_s22 = smov (!%p248_p3, %s5820_s22), 1  ;;  %v779_v45 = vsel %vm269_vm0, %v261_v44, 0  ;;  %v782_v53 = vsel %vm269_vm0, %v262_v51, 0  ;;  %v7010_v57 = vand.u32 4294901760, %v785_v54  ;;  %v788_v58 = vsel %vm269_vm0, %v264_v55, 0 }
  0x10   : > { %v6933_v4 = vpack.c.bf16 %v280_v3, %v277_v2  ;;  %v365_v5 = vsub.f32 %v265_v0, %v277_v2  ;;  %v372_v6 = vsub.f32 %v266_v1, %v280_v3  ;;  %s5901_s27 = sshll.u32 %s8221_s22, 6  ;;  %v6983_v46 = vand.u32 4294901760, %v779_v45  ;;  %v5831_v61 = vld [vmem:[%s8113_s3 + $0x2] ss:$0 sm:$0xff]  ;;  %v5829_v62 = vld [vmem:[%s8113_s3] ss:$0 sm:$0xff] }
  0x11   : > { %s6940_s30 = scalar_lea.vmem %s8110_s0, %s5901_s27  ;;  %v7008_v56 = vand.u32 4294901760, %v782_v53  ;;  %8148 = vst [vmem:[#allocation6_spill] sm:$0xff] %v7010_v57  ;;  %v7016_v60 = vand.u32 4294901760, %v788_v58  ;;  %v7025_v63 = vsub.f32 %v785_v54, %v7010_v57  ;;  %v6881_v0 = vmov 0   ;;  %v5832_v1 = vld [vmem:[%s8113_s3 + $0x3] ss:$0 sm:$0xff] }
  0x12   : > { %6551 = vmatprep.subr.bf16.mxu0 %v6933_v4  ;;  %v366_v7 = vand.u32 4294901760, %v365_v5  ;;  %v373_v8 = vand.u32 4294901760, %v372_v6  ;;  %v267_v9 = vld [vmem:[%s6940_s30] sm:$0xff]  ;;  %v268_v10 = vld [vmem:[%s6940_s30 + $0x8] sm:$0xff]  ;;  %v6950_v28 = vpack.c.bf16 %v372_v6, %v365_v5  ;;  %v5837_v30 = vld [vmem:[%s6940_s30 + $0x10] sm:$0xff]  ;;  %8144 = vst [vmem:[#allocation2_spill] sm:$0xff] %v6983_v46  ;;  %v6986_v47 = vsub.f32 %v779_v45, %v6983_v46  ;;  %6872 = vset.pattern.permute.xlu1 %v6881_v0 }
  0x13   : > { %6553 = vmatpush3.bf16.msra.mxu0 %v6933_v4  ;;  %v271_v11 = vsel %vm269_vm0, %v267_v9, 0  ;;  %v274_v12 = vsel %vm269_vm0, %v268_v10, 0  ;;  %v1498_v31 = vsel %vm269_vm0, %v5837_v30, 0  ;;  %v5838_v32 = vld [vmem:[%s6940_s30 + $0x18] sm:$0xff]  ;;  %8147 = vst [vmem:[#allocation5_spill] sm:$0xff] %v7008_v56  ;;  %v7014_v59 = vsub.f32 %v782_v53, %v7008_v56  ;;  %8150 = vst [vmem:[#allocation8_spill] sm:$0xff] %v7016_v60  ;;  %6871 = vset.pattern.permute.xlu0 %v6881_v0 }
  0x14   : > { %v367_v13 = vsub.f32 %v365_v5, %v366_v7  ;;  %v374_v14 = vsub.f32 %v372_v6, %v373_v8  ;;  %v343_v15 = vand.u32 4294901760, %v271_v11  ;;  %v353_v16 = vand.u32 4294901760, %v274_v12  ;;  %8145 = vst [vmem:[#allocation3_spill] sm:$0xff] %v6986_v47  ;;  %8151 = vst [vmem:[#allocation9_spill] sm:$0xff] %v7025_v63  ;;  %1439 = vperm.xlu1 %6872, %v5831_v61   ;;  %v5830_v2 = vld [vmem:[%s8113_s3 + $0x1] ss:$0 sm:$0xff] }
  0x15   : > { %v6956_v29 = vpack.c.bf16 %v373_v8, %v366_v7  ;;  %v1570_v33 = vand.u32 4294901760, %v1498_v31  ;;  %v1501_v34 = vsel %vm269_vm0, %v5838_v32, 0  ;;  %v6989_v48 = vand.u32 4294901760, %v6986_v47  ;;  %8149 = vst [vmem:[#allocation7_spill] sm:$0xff] %v7014_v59  ;;  %1431 = vperm.xlu0 %6871, %v5829_v62   ;;  %v5834_v10 = vld [vmem:[%s8113_s3 + $0x5] ss:$0 sm:$0xff] }
  0x16   : > { %v368_v17 = vand.u32 4294901760, %v367_v13  ;;  %v375_v18 = vand.u32 4294901760, %v374_v14  ;;  %v344_v19 = vsub.f32 %v271_v11, %v343_v15  ;;  %v354_v20 = vsub.f32 %v274_v12, %v353_v16  ;;  %v5833_v11 = vld [vmem:[%s8113_s3 + $0x4] ss:$0 sm:$0xff]  ;;  %v5853_v44 = vld [vmem:[%s8113_s3 + $0xe] ss:$0 sm:$0xff] }
  0x17   : > { %v1580_v35 = vand.u32 4294901760, %v1501_v34  ;;  %v1571_v36 = vsub.f32 %v1498_v31, %v1570_v33  ;;  %8146 = vst [vmem:[#allocation4_spill] sm:$0xff] %v6989_v48  ;;  %v860_v49 = vsub.f32 %v6986_v47, %v6989_v48  ;;  %v7034_v3 = vand.u32 4294901760, %v7014_v59  ;;  %v5873_v0 = vld [vmem:[%s6940_s30 + $0x30] sm:$0xff]  ;;  %s5827_s8 = sshll.u32 %s8221_s22, 3 }
  0x18   : > { %v6947_v21 = vpack.c.bf16 %v375_v18, %v368_v17  ;;  %v345_v22 = vand.u32 4294901760, %v344_v19  ;;  %v355_v23 = vand.u32 4294901760, %v354_v20  ;;  %v7037_v5 = vsub.f32 %v788_v58, %v7016_v60  ;;  %1443 = vperm.xlu1 %6872, %v5832_v1   ;;  %s8052_s11 = scalar_lea.vmem %s8115_s5, %s5827_s8  ;;  %s8086_s14 = scalar_lea.vmem %s8116_s6, %s5827_s8 }
  0x19   : > { %v1581_v37 = vsub.f32 %v1501_v34, %v1580_v35  ;;  %v1572_v38 = vand.u32 4294901760, %v1571_v36  ;;  %v6994_v50 = vand.u32 4294901760, %v860_v49  ;;  %8152 = vst [vmem:[#allocation10_spill] sm:$0xff] %v7034_v3  ;;  %v7040_v6 = vand.u32 4294901760, %v7025_v63  ;;  %1435 = vperm.xlu0 %6871, %v5830_v2   ;;  %v5848_v34 = vld [vmem:[%s8113_s3 + $0x9] ss:$0 sm:$0xff] }
  0x1a   : > { %6555 = vmatprep.subr.bf16.mxu0 %v6947_v21  ;;  %v346_v24 = vsub.f32 %v344_v19, %v345_v22  ;;  %v356_v25 = vsub.f32 %v354_v20, %v355_v23  ;;  %8153 = vst [vmem:[#allocation11_spill] sm:$0xff] %v7037_v5  ;;  %v870_v13 = vsub.f32 %v7014_v59, %v7034_v3  ;;  %v7051_v14 = vand.u32 4294901760, %v7037_v5 }
  0x1b   : > { %v1582_v39 = vand.u32 4294901760, %v1581_v37  ;;  %v1573_v40 = vsub.f32 %v1571_v36, %v1572_v38  ;;  %6188 = vmatprep.mubr.f32.mxu1 %v6994_v50  ;;  %8154 = vst [vmem:[#allocation12_spill] sm:$0xff] %v7040_v6  ;;  %vm5519_vm2 = vcmask 0  }
  0x1c   : > { %v347_v26 = vand.u32 4294901760, %v346_v24  ;;  %v357_v27 = vand.u32 4294901760, %v356_v25  ;;  %8155 = vst [vmem:[#allocation13_spill] sm:$0xff] %v7051_v14  ;;  %1451 = vperm.xlu1 %6872, %v5834_v10   ;;  %v7064_v24 = vand.u32 4294901760, %v870_v13  ;;  %v890_v25 = vsub.f32 %v7037_v5, %v7051_v14  ;;  %v5874_v10 = vld [vmem:[%s6940_s30 + $0x38] sm:$0xff] }
  0x1d   : > { %v1583_v41 = vsub.f32 %v1581_v37, %v1582_v39  ;;  %v1574_v42 = vand.u32 4294901760, %v1573_v40  ;;  %1447 = vperm.xlu0 %6871, %v5833_v11   ;;  %v5849_v40 = vld [vmem:[%s8113_s3 + $0xa] ss:$0 sm:$0xff]  ;;  %v5855_v11 = vld [vmem:[%s6940_s30 + $0x20] sm:$0xff] }
  0x1e   : > { %6146 = vmatprep.mubr.f32.mxu0 %v347_v26 }
  0x1f   : > { %6147 = vmatmul.mubr.f32.vlgmr.msra.gmra.mrb[0].mxu0 %v357_v27  ;;  %v1584_v43 = vand.u32 4294901760, %v1583_v41  ;;  %v5852_v41 = vld [vmem:[%s8113_s3 + $0xd] ss:$0 sm:$0xff] }
  0x20   : > { %6557 = vmatpush3.bf16.msra.mxu0 %v6947_v21  ;;  %6153 = vmatprep.mubr.f32.mxu0 %v343_v15 }
  0x21   : > { %6559 = vmatprep.subr.bf16.mxu0 %v6950_v28 }
  0x27   : > { %6154 = vmatmul.mubr.f32.vlgmr.msra.gmra.mrb[0].mxu0 %v353_v16 }
  0x28   : > { %6561 = vmatpush3.bf16.msra.mxu0 %v6950_v28  ;;  %6160 = vmatprep.mubr.f32.mxu0 %v344_v19 }
  0x29   : > { %6563 = vmatprep.subr.bf16.mxu0 %v6933_v4 }
  0x2f   : > { %6161 = vmatmul.mubr.f32.vlgmr.msra.gmra.mrb[0].mxu0 %v354_v20  ;;  %v5836_v20 = vld [vmem:[%s8113_s3 + $0x7] ss:$0 sm:$0xff] }
  0x30   : > { %6565 = vmatpush3.bf16.msra.mxu0 %v6933_v4  ;;  %6167 = vmatprep.mubr.f32.mxu0 %v345_v22  ;;  %v5835_v22 = vld [vmem:[%s8113_s3 + $0x6] ss:$0 sm:$0xff] }
  0x31   : > { %6567 = vmatprep.subr.bf16.mxu0 %v6956_v29  ;;  %1459 = vperm.xlu1 %6872, %v5836_v20  }
  0x32   : > { %1455 = vperm.xlu0 %6871, %v5835_v22  }
  0x35   : > { %2651 = vperm.xlu1 %6872, %v5848_v34  }
  0x37   : > { %6168 = vmatmul.mubr.f32.vlgmr.msra.gmra.mrb[0].mxu0 %v355_v23 }
  0x38   : > { %6569 = vmatpush3.bf16.msra.mxu0 %v6956_v29  ;;  %6174 = vmatprep.mubr.f32.mxu0 %v343_v15 }
  0x39   : > { %6571 = vmatprep.subr.bf16.mxu0 %v6933_v4 }
  0x3f   : > { %6175 = vmatmul.mubr.f32.vlgmr.msra.gmra.mrb[0].mxu0 %v353_v16 }
  0x40   : > { %6573 = vmatpush3.bf16.msra.mxu0 %v6933_v4  ;;  %6181 = vmatprep.mubr.f32.mxu0 %v343_v15 }
  0x41   : > { %6599 = vmatprep.subr.bf16.mxu0 %v6933_v4 }
  0x47   : > { %6182 = vmatmul.mubr.f32.vlgmr.msra.gmra.mrb[0].mxu0 %v353_v16  ;;  %v880_v16 = vsub.f32 %v7025_v63, %v7040_v6 }
  0x48   : > { %6601 = vmatpush3.bf16.msra.mxu0 %v6933_v4  ;;  %6248 = vmatprep.mubr.f32.mxu0 %v1574_v42  ;;  %v5851_v42 = vld [vmem:[%s8113_s3 + $0xc] ss:$0 sm:$0xff] }
  0x49   : > { %6603 = vmatprep.subr.bf16.mxu0 %v6947_v21  ;;  %v7069_v30 = vand.u32 4294901760, %v880_v16  ;;  %v3997_v16 = vsel %vm269_vm0, %v5874_v10, 0  ;;  %v5887_v10 = vld [vmem:[%s8113_s3 + $0x1c] ss:$0 sm:$0xff] }
  0x4b   : > { %6249 = vmatmul.mubr.f32.vlgmr.msra.gmra.mrb[2].mxu0 %v1584_v43  ;;  %v5854_v43 = vld [vmem:[%s8113_s3 + $0xf] ss:$0 sm:$0xff] }
  0x4c   : > { %6605 = vmatpush3.bf16.msra.mxu0 %v6947_v21  ;;  %6255 = vmatprep.mubr.f32.mxu0 %v1570_v33 }
  0x4d   : > { %6607 = vmatprep.subr.bf16.mxu0 %v6950_v28 }
  0x53   : > { %6256 = vmatmul.mubr.f32.vlgmr.msra.gmra.mrb[2].mxu0 %v1580_v35 }
  0x54   : > { %6609 = vmatpush3.bf16.msra.mxu0 %v6950_v28  ;;  %6262 = vmatprep.mubr.f32.mxu0 %v1571_v36  ;;  %v7078_v36 = vand.u32 4294901760, %v890_v25 }
  0x55   : > { %6611 = vmatprep.subr.bf16.mxu0 %v6933_v4 }
  0x56   : > { %8156 = vst [vmem:[#allocation14_spill] sm:$0xff] %v7078_v36 }
  0x5b   : > { %6263 = vmatmul.mubr.f32.vlgmr.msra.gmra.mrb[2].mxu0 %v1581_v37 }
  0x5c   : > { %6613 = vmatpush3.bf16.msra.mxu0 %v6933_v4  ;;  %6269 = vmatprep.mubr.f32.mxu0 %v1572_v38 }
  0x5d   : > { %6615 = vmatprep.subr.bf16.mxu0 %v6956_v29 }
  0x63   : > { %6270 = vmatmul.mubr.f32.vlgmr.msra.gmra.mrb[2].mxu0 %v1582_v39  ;;  %v5850_v39 = vld [vmem:[%s8113_s3 + $0xb] ss:$0 sm:$0xff] }
  0x64   : > { %6617 = vmatpush3.bf16.msra.mxu0 %v6956_v29  ;;  %6276 = vmatprep.mubr.f32.mxu0 %v1570_v33 }
  0x65   : > { %6619 = vmatprep.subr.bf16.mxu0 %v6933_v4  ;;  %2659 = vperm.xlu1 %6872, %v5850_v39  }
  0x69   : > { %2667 = vperm.xlu1 %6872, %v5852_v41  }
  0x6b   : > { %6277 = vmatmul.mubr.f32.vlgmr.msra.gmra.mrb[2].mxu0 %v1580_v35 }
  0x6c   : > { %6621 = vmatpush3.bf16.msra.mxu0 %v6933_v4  ;;  %6283 = vmatprep.mubr.f32.mxu0 %v1570_v33 }
  0x6d   : > { %2675 = vperm.xlu1 %6872, %v5854_v43  }
  0x73   : > { %6284 = vmatmul.mubr.f32.vlgmr.msra.gmra.mrb[2].mxu0 %v1580_v35  ;;  %v5847_v35 = vld [vmem:[%s8113_s3 + $0x8] ss:$0 sm:$0xff] }
  0x74   : > { %6320 = vmatprep.mubr.f32.mxu0 %v6989_v48  ;;  %2647 = vperm.xlu0 %6871, %v5847_v35  }
  0x78   : > { %2655 = vperm.xlu0 %6871, %v5849_v40  }
  0x7c   : > { %2663 = vperm.xlu0 %6871, %v5851_v42  }
  0x80   : > { %2671 = vperm.xlu0 %6871, %v5853_v44  }
 0x11a   : > { %v6183_v7 = vpop.f32.mrb[0].mxu0 }
 0x11b   : > { %v794_v8 = vand.u32 4294901760, %v6183_v7  ;;  %v768_v9 = vpop.f32.mrb[1].mxu0 }
 0x11c   : > { %v791_v12 = vand.u32 4294901760, %v768_v9 }
 0x11d   : > { %v906_v15 = vsub.f32 %v6183_v7, %v794_v8 }
 0x11e   : > { %v7055_v17 = vpack.c.bf16 %v794_v8, %v791_v12  ;;  %v899_v18 = vsub.f32 %v768_v9, %v791_v12  ;;  %v3994_v9 = vsel %vm269_vm0, %v5873_v0, 0 }
 0x11f   : > { %v907_v19 = vand.u32 4294901760, %v906_v15 }
 0x120   : > { %v900_v23 = vand.u32 4294901760, %v899_v18  ;;  %6575 = vmatprep.subr.bf16.mxu1 %v7055_v17  ;;  %v6582_v26 = vpack.c.bf16 %v906_v15, %v899_v18 }
 0x121   : > { %v908_v27 = vsub.f32 %v906_v15, %v907_v19  ;;  %6577 = vmatpush3.bf16.msra.mxu1 %v7055_v17  ;;  %v7131_v15 = vand.u32 4294901760, %v3994_v9 }
 0x122   : > { %v901_v31 = vsub.f32 %v899_v18, %v900_v23  ;;  %v6590_v32 = vpack.c.bf16 %v907_v19, %v900_v23  ;;  %v5856_v18 = vld [vmem:[%s6940_s30 + $0x28] sm:$0xff]  ;;  %v7138_v19 = vand.u32 4294901760, %v3997_v16 }
 0x123   : > { %v909_v33 = vand.u32 4294901760, %v908_v27  ;;  %v2749_v22 = vsel %vm269_vm0, %v5856_v18, 0  ;;  %v4067_v23 = vsub.f32 %v3994_v9, %v7131_v15  ;;  %v5888_v9 = vld [vmem:[%s8113_s3 + $0x1d] ss:$0 sm:$0xff] }
 0x124   : > { %6189 = vmatmul.mubr.f32.vlgmr.msra.gmra.mrb[0].mxu1 %v7064_v24  ;;  %v902_v37 = vand.u32 4294901760, %v901_v31  ;;  %v7147_v25 = vand.u32 4294901760, %v2749_v22 }
 0x125   : > { %6191 = vmatprep.mubr.f32.mxu1 %v7069_v30  ;;  %v4068_v31 = vand.u32 4294901760, %v4067_v23 }
 0x126   : > { %v6578_v38 = vpack.c.bf16 %v909_v33, %v902_v37 }
 0x127   : > { %v4069_v35 = vsub.f32 %v4067_v23, %v4068_v31 }
 0x128   : > { %6192 = vmatmul.mubr.f32.gmra.mrb[2].mxu1 %v7078_v36  ;;  %6579 = vmatprep.subr.bf16.mxu1 %v6578_v38 }
 0x129   : > { %6581 = vmatpush3.bf16.msra.mxu1 %v6578_v38  ;;  %6198 = vmatprep.mubr.f32.mxu1 %v6983_v46  ;;  %v4070_v40 = vand.u32 4294901760, %v4069_v35 }
 0x12a   : > { %6583 = vmatprep.subr.bf16.mxu1 %v6582_v26 }
 0x12c   : > { %6199 = vmatmul.mubr.f32.vlgmr.msra.gmra.mrb[0].mxu1 %v7008_v56 }
 0x12d   : > { %6585 = vmatpush3.bf16.msra.mxu1 %v6582_v26  ;;  %6201 = vmatprep.mubr.f32.mxu1 %v7010_v57  ;;  %v4077_v26 = vsub.f32 %v3997_v16, %v7138_v19  ;;  %v5890_v16 = vld [vmem:[%s8113_s3 + $0x1f] ss:$0 sm:$0xff] }
 0x12e   : > { %6587 = vmatprep.subr.bf16.mxu1 %v7055_v17 }
 0x12f   : > { %v4078_v33 = vand.u32 4294901760, %v4077_v26 }
 0x130   : > { %6202 = vmatmul.mubr.f32.gmra.mrb[2].mxu1 %v7016_v60 }
 0x131   : > { %6208 = vmatprep.mubr.f32.mxu1 %v6986_v47  ;;  %v4079_v38 = vsub.f32 %v4077_v26, %v4078_v33 }
 0x133   : > { %v4080_v42 = vand.u32 4294901760, %v4079_v38 }
 0x134   : > { %6209 = vmatmul.mubr.f32.vlgmr.msra.gmra.mrb[0].mxu1 %v7014_v59 }
 0x135   : > { %6589 = vmatpush3.bf16.msra.mxu1 %v7055_v17  ;;  %6211 = vmatprep.mubr.f32.mxu1 %v7025_v63 }
 0x136   : > { %6591 = vmatprep.subr.bf16.mxu1 %v6590_v32 }
 0x138   : > { %6212 = vmatmul.mubr.f32.gmra.mrb[2].mxu1 %v7037_v5 }
 0x139   : > { %6218 = vmatprep.mubr.f32.mxu1 %v6989_v48 }
 0x13c   : > { %6219 = vmatmul.mubr.f32.vlgmr.msra.gmra.mrb[0].mxu1 %v7034_v3 }
 0x13d   : > { %6593 = vmatpush3.bf16.msra.mxu1 %v6590_v32  ;;  %6221 = vmatprep.mubr.f32.mxu1 %v7040_v6  ;;  %v2829_v32 = vsub.f32 %v2749_v22, %v7147_v25  ;;  %v5891_v22 = vld [vmem:[%s8114_s4] ss:$0 sm:$0xff] }
 0x13e   : > { %6595 = vmatprep.subr.bf16.mxu1 %v7055_v17 }
 0x13f   : > { %v2830_v37 = vand.u32 4294901760, %v2829_v32 }
 0x140   : > { %6222 = vmatmul.mubr.f32.gmra.mrb[2].mxu1 %v7051_v14 }
 0x141   : > { %6228 = vmatprep.mubr.f32.mxu1 %v6983_v46  ;;  %v2831_v41 = vsub.f32 %v2829_v32, %v2830_v37 }
 0x143   : > { %v2832_v44 = vand.u32 4294901760, %v2831_v41 }
 0x144   : > { %6229 = vmatmul.mubr.f32.vlgmr.msra.gmra.mrb[0].mxu1 %v7008_v56 }
 0x145   : > { %6597 = vmatpush3.bf16.msra.mxu1 %v7055_v17  ;;  %6231 = vmatprep.mubr.f32.mxu1 %v7010_v57  ;;  %v2746_v17 = vsel %vm269_vm0, %v5855_v11, 0 }
 0x146   : > { %v6285_v45 = vpop.f32.mrb[2].mxu0  ;;  %v7140_v20 = vand.u32 4294901760, %v2746_v17 }
 0x147   : > { %v2009_v49 = vand.u32 4294901760, %v6285_v45  ;;  %v1995_v51 = vpop.f32.mrb[3].mxu0 }
 0x148   : > { %v2006_v52 = vand.u32 4294901760, %v1995_v51  ;;  %6232 = vmatmul.mubr.f32.gmra.mrb[2].mxu1 %v7016_v60  ;;  %v2819_v27 = vsub.f32 %v2746_v17, %v7140_v20  ;;  %v5889_v17 = vld [vmem:[%s8113_s3 + $0x1e] ss:$0 sm:$0xff] }
 0x149   : > { %v2121_v53 = vsub.f32 %v6285_v45, %v2009_v49  ;;  %6238 = vmatprep.mubr.f32.mxu1 %v6983_v46  ;;  %v7217_v45 = vpop.permute.xlu1 %1439 }
 0x14a   : > { %v6622_v54 = vpack.c.bf16 %v2009_v49, %v2006_v52  ;;  %v2114_v55 = vsub.f32 %v1995_v51, %v2006_v52  ;;  %v2820_v34 = vand.u32 4294901760, %v2819_v27  ;;  %v5870_v49 = vld [vmem:[%s8113_s3 + $0x15] ss:$0 sm:$0xff]  ;;  %v5869_v51 = vld [vmem:[%s8113_s3 + $0x14] ss:$0 sm:$0xff] }
 0x14b   : > { %v2122_v58 = vand.u32 4294901760, %v2121_v53 }
 0x14c   : > { %6239 = vmatmul.mubr.f32.vlgmr.msra.gmra.mrb[0].mxu1 %v7008_v56  ;;  %6623 = vmatprep.subr.bf16.mxu1 %v6622_v54  ;;  %v2115_v61 = vand.u32 4294901760, %v2114_v55  ;;  %v6630_v62 = vpack.c.bf16 %v2121_v53, %v2114_v55  ;;  %v2821_v39 = vsub.f32 %v2819_v27, %v2820_v34 }
 0x14d   : > { %6635 = vmatprep.subr.bf16.mxu0 %v6622_v54  ;;  %6625 = vmatpush3.bf16.msra.mxu1 %v6622_v54  ;;  %v2123_v1 = vsub.f32 %v2121_v53, %v2122_v58  ;;  %v7227_v52 = vpop.permute.xlu1 %1443  ;;  %v5872_v53 = vld [vmem:[%s8113_s3 + $0x17] ss:$0 sm:$0xff] }
 0x14e   : > { %6637 = vmatpush3.bf16.msra.mxu0 %v6622_v54  ;;  %6241 = vmatprep.mubr.f32.mxu1 %v7010_v57  ;;  %v6638_v2 = vpack.c.bf16 %v2122_v58, %v2115_v61  ;;  %v2116_v7 = vsub.f32 %v2114_v55, %v2115_v61  ;;  %v2822_v43 = vand.u32 4294901760, %v2821_v39  ;;  %v5884_v58 = vld [vmem:[%s8113_s3 + $0x19] ss:$0 sm:$0xff]  ;;  %v5883_v61 = vld [vmem:[%s8113_s3 + $0x18] ss:$0 sm:$0xff] }
 0x14f   : > { %v2124_v8 = vand.u32 4294901760, %v2123_v1  ;;  %v5886_v1 = vld [vmem:[%s8113_s3 + $0x1b] ss:$0 sm:$0xff] }
 0x150   : > { %6242 = vmatmul.mubr.f32.gmra.mrb[2].mxu1 %v7016_v60  ;;  %6639 = vmatprep.subr.bf16.mxu0 %v6638_v2  ;;  %v2117_v12 = vand.u32 4294901760, %v2116_v7 }
 0x151   : > { %6321 = vmatmul.mubr.f32.vlgmr.msra.gmra.mrb[4].mxu0 %v7034_v3  ;;  %6290 = vmatprep.mubr.f32.mxu1 %v6994_v50 }
 0x152   : > { %6641 = vmatpush3.bf16.msra.mxu0 %v6638_v2  ;;  %6323 = vmatprep.mubr.f32.mxu0 %v7040_v6  ;;  %v6626_v13 = vpack.c.bf16 %v2124_v8, %v2117_v12  ;;  %v5885_v2 = vld [vmem:[%s8113_s3 + $0x1a] ss:$0 sm:$0xff] }
 0x153   : > { %6643 = vmatprep.subr.bf16.mxu0 %v6622_v54 }
 0x154   : > { %6291 = vmatmul.mubr.f32.vlgmr.msra.gmra.mrb[4].mxu1 %v7064_v24  ;;  %6627 = vmatprep.subr.bf16.mxu1 %v6626_v13 }
 0x155   : > { %6324 = vmatmul.mubr.f32.gmra.mrb[6].mxu0 %v7051_v14  ;;  %6629 = vmatpush3.bf16.msra.mxu1 %v6626_v13 }
 0x156   : > { %6631 = vmatprep.subr.bf16.mxu1 %v6630_v62  ;;  %6293 = vmatprep.mubr.f32.mxu1 %v7069_v30 }
 0x157   : > { %6330 = vmatprep.mubr.f32.mxu0 %v6983_v46 }
 0x158   : > { %6294 = vmatmul.mubr.f32.gmra.mrb[6].mxu1 %v7078_v36 }
 0x159   : > { %6331 = vmatmul.mubr.f32.vlgmr.msra.gmra.mrb[4].mxu0 %v7008_v56  ;;  %6300 = vmatprep.mubr.f32.mxu1 %v6983_v46 }
 0x15a   : > { %6645 = vmatpush3.bf16.msra.mxu0 %v6622_v54  ;;  %6333 = vmatprep.mubr.f32.mxu0 %v7010_v57  ;;  %v5871_v54 = vld [vmem:[%s8113_s3 + $0x16] ss:$0 sm:$0xff] }
 0x15b   : > { %6695 = vmatprep.subr.bf16.mxu0 %v6933_v4 }
 0x15c   : > { %6301 = vmatmul.mubr.f32.vlgmr.msra.gmra.mrb[4].mxu1 %v7008_v56 }
 0x15d   : > { %6633 = vmatpush3.bf16.msra.mxu1 %v6630_v62  ;;  %6334 = vmatmul.mubr.f32.gmra.mrb[6].mxu0 %v7016_v60  ;;  %v7243_v62 = vpop.permute.xlu1 %1451 }
 0x15e   : > { %6303 = vmatprep.mubr.f32.mxu1 %v7010_v57  ;;  %6340 = vmatprep.mubr.f32.mxu0 %v6983_v46 }
 0x15f   : > { %6647 = vmatprep.subr.bf16.mxu1 %v6933_v4 }
 0x160   : > { %6304 = vmatmul.mubr.f32.gmra.mrb[6].mxu1 %v7016_v60 }
 0x161   : > { %6341 = vmatmul.mubr.f32.vlgmr.msra.gmra.mrb[4].mxu0 %v7008_v56  ;;  %6310 = vmatprep.mubr.f32.mxu1 %v6986_v47  ;;  %v7259_v11 = vpop.permute.xlu1 %1459 }
 0x162   : > { %6343 = vmatprep.mubr.f32.mxu0 %v7010_v57  ;;  %6697 = vmatpush3.bf16.msra.mxu0 %v6933_v4 }
 0x163   : > { %6699 = vmatprep.subr.bf16.mxu0 %v6947_v21 }
 0x164   : > { %6311 = vmatmul.mubr.f32.vlgmr.msra.gmra.mrb[4].mxu1 %v7014_v59 }
 0x165   : > { %6344 = vmatmul.mubr.f32.gmra.mrb[6].mxu0 %v7016_v60  ;;  %6313 = vmatprep.mubr.f32.mxu1 %v7025_v63  ;;  %v7269_v18 = vpop.permute.xlu1 %2651 }
 0x166   : > { %6452 = vmatprep.mubr.f32.mxu0 %v4070_v40  ;;  %6649 = vmatpush3.bf16.msra.mxu1 %v6933_v4 }
 0x167   : > { %6651 = vmatprep.subr.bf16.mxu1 %v6947_v21 }
 0x168   : > { %6314 = vmatmul.mubr.f32.gmra.mrb[6].mxu1 %v7037_v5 }
 0x169   : > { %6453 = vmatmul.mubr.f32.vlgmr.msra.gmra.mrb[8].mxu0 %v4080_v42  ;;  %6350 = vmatprep.mubr.f32.mxu1 %v2822_v43 }
 0x16a   : > { %6701 = vmatpush3.bf16.msra.mxu0 %v6947_v21  ;;  %6459 = vmatprep.mubr.f32.mxu0 %v7131_v15 }
 0x16b   : > { %6703 = vmatprep.subr.bf16.mxu0 %v6950_v28 }
 0x16c   : > { %6351 = vmatmul.mubr.f32.vlgmr.msra.gmra.mrb[8].mxu1 %v2832_v44 }
 0x16d   : > { %6653 = vmatpush3.bf16.msra.mxu1 %v6947_v21  ;;  %6357 = vmatprep.mubr.f32.mxu1 %v7140_v20  ;;  %v5866_v21 = vld [vmem:[%s8113_s3 + $0x11] ss:$0 sm:$0xff] }
 0x16e   : > { %6655 = vmatprep.subr.bf16.mxu1 %v6950_v28  ;;  %3899 = vperm.xlu1 %6872, %v5866_v21  }
 0x171   : > { %6460 = vmatmul.mubr.f32.vlgmr.msra.gmra.mrb[8].mxu0 %v7138_v19 }
 0x172   : > { %6705 = vmatpush3.bf16.msra.mxu0 %v6950_v28  ;;  %6466 = vmatprep.mubr.f32.mxu0 %v4067_v23  ;;  %v7279_v23 = vpop.permute.xlu1 %2659 }
 0x173   : > { %6707 = vmatprep.subr.bf16.mxu0 %v6933_v4 }
 0x174   : > { %6358 = vmatmul.mubr.f32.vlgmr.msra.gmra.mrb[8].mxu1 %v7147_v25 }
 0x175   : > { %6657 = vmatpush3.bf16.msra.mxu1 %v6950_v28  ;;  %6364 = vmatprep.mubr.f32.mxu1 %v2819_v27  ;;  %v5865_v28 = vld [vmem:[%s8113_s3 + $0x10] ss:$0 sm:$0xff] }
 0x176   : > { %6659 = vmatprep.subr.bf16.mxu1 %v6933_v4  ;;  %3895 = vperm.xlu0 %6871, %v5865_v28   ;;  %v7295_v35 = vpop.permute.xlu1 %2667  ;;  %v5898_v28 = vld [vmem:[%s8114_s4 + $0x7] ss:$0 sm:$0xff] }
 0x179   : > { %6467 = vmatmul.mubr.f32.vlgmr.msra.gmra.mrb[8].mxu0 %v4077_v26  ;;  %v5893_v26 = vld [vmem:[%s8114_s4 + $0x2] ss:$0 sm:$0xff] }
 0x17a   : > { %6709 = vmatpush3.bf16.msra.mxu0 %v6933_v4  ;;  %6473 = vmatprep.mubr.f32.mxu0 %v4068_v31 }
 0x17b   : > { %6711 = vmatprep.subr.bf16.mxu0 %v6956_v29 }
 0x17c   : > { %6365 = vmatmul.mubr.f32.vlgmr.msra.gmra.mrb[8].mxu1 %v2829_v32 }
 0x17d   : > { %6661 = vmatpush3.bf16.msra.mxu1 %v6933_v4  ;;  %6371 = vmatprep.mubr.f32.mxu1 %v2820_v34  ;;  %v5895_v34 = vld [vmem:[%s8114_s4 + $0x4] ss:$0 sm:$0xff] }
 0x17e   : > { %6663 = vmatprep.subr.bf16.mxu1 %v6956_v29 }
 0x181   : > { %6474 = vmatmul.mubr.f32.vlgmr.msra.gmra.mrb[8].mxu0 %v4078_v33  ;;  %v5896_v33 = vld [vmem:[%s8114_s4 + $0x5] ss:$0 sm:$0xff] }
 0x182   : > { %6713 = vmatpush3.bf16.msra.mxu0 %v6956_v29  ;;  %6480 = vmatprep.mubr.f32.mxu0 %v7131_v15 }
 0x183   : > { %6715 = vmatprep.subr.bf16.mxu0 %v6933_v4 }
 0x184   : > { %6372 = vmatmul.mubr.f32.vlgmr.msra.gmra.mrb[8].mxu1 %v2830_v37 }
 0x185   : > { %6665 = vmatpush3.bf16.msra.mxu1 %v6956_v29  ;;  %6378 = vmatprep.mubr.f32.mxu1 %v7140_v20  ;;  %v5867_v29 = vld [vmem:[%s8113_s3 + $0x12] ss:$0 sm:$0xff] }
 0x186   : > { %6667 = vmatprep.subr.bf16.mxu1 %v6933_v4  ;;  %3903 = vperm.xlu0 %6871, %v5867_v29  }
 0x189   : > { %6481 = vmatmul.mubr.f32.vlgmr.msra.gmra.mrb[8].mxu0 %v7138_v19 }
 0x18a   : > { %6717 = vmatpush3.bf16.msra.mxu0 %v6933_v4  ;;  %6487 = vmatprep.mubr.f32.mxu0 %v7131_v15 }
 0x18b   : > { %3911 = vperm.xlu0 %6871, %v5869_v51  }
 0x18c   : > { %6379 = vmatmul.mubr.f32.vlgmr.msra.gmra.mrb[8].mxu1 %v7147_v25 }
 0x18d   : > { %6669 = vmatpush3.bf16.msra.mxu1 %v6933_v4  ;;  %6385 = vmatprep.mubr.f32.mxu1 %v7140_v20  ;;  %v5868_v4 = vld [vmem:[%s8113_s3 + $0x13] ss:$0 sm:$0xff]  ;;  %v5892_v20 = vld [vmem:[%s8114_s4 + $0x1] ss:$0 sm:$0xff] }
 0x18e   : > { %3907 = vperm.xlu1 %6872, %v5868_v4   ;;  %v5897_v4 = vld [vmem:[%s8114_s4 + $0x6] ss:$0 sm:$0xff] }
 0x18f   : > { %3919 = vperm.xlu0 %6871, %v5871_v54  }
 0x191   : > { %6488 = vmatmul.mubr.f32.vlgmr.msra.gmra.mrb[8].mxu0 %v7138_v19 }
 0x192   : > { %6494 = vmatprep.mubr.f32.mxu0 %v6994_v50  ;;  %3915 = vperm.xlu1 %6872, %v5870_v49  }
 0x193   : > { %5143 = vperm.xlu0 %6871, %v5883_v61  }
 0x194   : > { %6386 = vmatmul.mubr.f32.vlgmr.msra.gmra.mrb[8].mxu1 %v7147_v25  ;;  %v5894_v25 = vld [vmem:[%s8114_s4 + $0x3] ss:$0 sm:$0xff] }
 0x195   : > { %6392 = vmatprep.mubr.f32.mxu1 %v6994_v50  ;;  %v7219_v50 = vpop.permute.xlu0 %1431 }
 0x196   : > { %3923 = vperm.xlu1 %6872, %v5872_v53  }
 0x197   : > { %5151 = vperm.xlu0 %6871, %v5885_v2  }
 0x199   : > { %v7235_v55 = vpop.permute.xlu0 %1435 }
 0x19a   : > { %5147 = vperm.xlu1 %6872, %v5884_v58  }
 0x19b   : > { %5159 = vperm.xlu0 %6871, %v5887_v10   ;;  %v7328_v10 = vpop.permute.xlu1 %2675 }
 0x19d   : > { %v7245_v0 = vpop.permute.xlu0 %1447 }
 0x19e   : > { %5155 = vperm.xlu1 %6872, %v5886_v1  }
 0x19f   : > { %5167 = vperm.xlu0 %6871, %v5889_v17  }
 0x1a1   : > { %v7261_v12 = vpop.permute.xlu0 %1455 }
 0x1a2   : > { %5163 = vperm.xlu1 %6872, %v5888_v9  }
 0x1a3   : > { %5287 = vperm.xlu0 %6871, %v5891_v22  }
 0x1a5   : > { %v7271_v19 = vpop.permute.xlu0 %2647 }
 0x1a6   : > { %5171 = vperm.xlu1 %6872, %v5890_v16  }
 0x1a7   : > { %5295 = vperm.xlu0 %6871, %v5893_v26  }
 0x1a9   : > { %v7287_v27 = vpop.permute.xlu0 %2655 }
 0x1aa   : > { %5291 = vperm.xlu1 %6872, %v5892_v20  }
 0x1ab   : > { %5303 = vperm.xlu0 %6871, %v5895_v34  }
 0x1ad   : > { %v7299_v40 = vpop.permute.xlu0 %2663 }
 0x1ae   : > { %5299 = vperm.xlu1 %6872, %v5894_v25  }
 0x1af   : > { %5311 = vperm.xlu0 %6871, %v5897_v4  }
 0x1b1   : > { %v7348_v34 = vpop.permute.xlu0 %2671 }
 0x1b2   : > { %5307 = vperm.xlu1 %6872, %v5896_v33  }
 0x1b6   : > { %5315 = vperm.xlu1 %6872, %v5898_v28  }
 0x21f   : > { %v6240_v7 = vpop.f32.mrb[0].mxu1 }
 0x220   : > { %v1356_v8 = vpop.f32.mrb[1].mxu1  ;;  %v1379_v31 = vmax.f32 %v6240_v7, 0.0 }
 0x221   : > { %v1378_v32 = vmax.f32 %v1356_v8, 0.0 }
 0x222   : > { %v1491_v37 = vmul.f32 %v7259_v11, %v1379_v31  ;;  %v1487_v38 = vmul.f32 %v7261_v12, %v1379_v31  ;;  %v1467_v41 = vmul.f32 %v7235_v55, %v1379_v31  ;;  %v1463_v42 = vmul.f32 %v7219_v50, %v1379_v31 }
 0x223   : > { %v6243_v13 = vpop.f32.mrb[2].mxu1  ;;  %v1490_v43 = vmul.f32 %v7259_v11, %v1378_v32  ;;  %v1486_v44 = vmul.f32 %v7261_v12, %v1378_v32  ;;  %v7312_v29 = vmul.f32 %v7217_v45, %v1379_v31  ;;  %v7315_v49 = vmul.f32 %v7243_v62, %v1379_v31 }
 0x224   : > { %v1368_v15 = vpop.f32.mrb[3].mxu1  ;;  %v1381_v39 = vmax.f32 %v6243_v13, 0.0  ;;  %v1475_v54 = vmul.f32 %v7227_v52, %v1379_v31  ;;  %v1479_v58 = vmul.f32 %v7245_v0, %v1379_v31  ;;  %v1466_v61 = vmul.f32 %v7235_v55, %v1378_v32 }
 0x225   : > { %v7317_v51 = vmax.f32 %v1368_v15, 0.0  ;;  %v1462_v1 = vmul.f32 %v7219_v50, %v1378_v32  ;;  %v1470_v2 = vmul.f32 %v7217_v45, %v1378_v32  ;;  %v1482_v7 = vmul.f32 %v7243_v62, %v1378_v32 }
 0x226   : > { %v7326_v8 = vmul.f32 %v7227_v52, %v1378_v32  ;;  %v7331_v13 = vmul.f32 %v7245_v0, %v1378_v32  ;;  %v7334_v15 = vmul.f32 %v7245_v0, %v1381_v39  ;;  %v7337_v16 = vmul.f32 %v7219_v50, %v1381_v39 }
 0x227   : > { %v7340_v25 = vmul.f32 %v7261_v12, %v1381_v39  ;;  %v7343_v26 = vmul.f32 %v7235_v55, %v1381_v39  ;;  %v7346_v31 = vmul.f32 %v7217_v45, %v1381_v39  ;;  %v1468_v28 = vmul.f32 %v7235_v55, %v7317_v51 }
 0x228   : > { %v7357_v4 = vmul.f32 %v7217_v45, %v7317_v51  ;;  %v7360_v14 = vmul.f32 %v7243_v62, %v1381_v39  ;;  %v7371_v3 = vmul.f32 %v7245_v0, %v7317_v51  ;;  %v7375_v45 = vmul.f32 %v7261_v12, %v7317_v51 }
 0x234   : > { %v6342_v21 = vpop.f32.mrb[4].mxu0 }
 0x235   : > { %v2571_v53 = vpop.f32.mrb[5].mxu0 }
 0x237   : > { %v6312_v9 = vpop.f32.mrb[4].mxu1 }
 0x238   : > { %v6742_v17 = vadd.f32 %v6342_v21, %v6312_v9  ;;  %v6345_v20 = vpop.f32.mrb[6].mxu0  ;;  %v2283_v22 = vpop.f32.mrb[5].mxu1  ;;  %v7353_v21 = vmul.f32 %v7227_v52, %v1381_v39 }
 0x239   : > { %v6743_v32 = vadd.f32 %v2571_v53, %v2283_v22  ;;  %v2583_v33 = vpop.f32.mrb[7].mxu0  ;;  %v7364_v53 = vmul.f32 %v7227_v52, %v7317_v51  ;;  %v7367_v22 = vmul.f32 %v7259_v11, %v1381_v39 }
 0x23a   : > { %v2594_v9 = vmax.f32 %v6742_v17, 0.0  ;;  %v7379_v17 = vmul.f32 %v7219_v50, %v7317_v51 }
 0x23b   : > { %v2593_v6 = vmax.f32 %v6743_v32, 0.0  ;;  %v6315_v55 = vpop.f32.mrb[6].mxu1 }
 0x23c   : > { %v2707_v52 = vmul.f32 %v7328_v10, %v2594_v9  ;;  %v2703_v48 = vmul.f32 %v7348_v34, %v2594_v9  ;;  %v6744_v39 = vadd.f32 %v6345_v20, %v6315_v55  ;;  %v2297_v5 = vpop.f32.mrb[7].mxu1  ;;  %v2683_v32 = vmul.f32 %v7269_v18, %v2594_v9 }
 0x23d   : > { %v2706_v63 = vmul.f32 %v7328_v10, %v2593_v6  ;;  %v2702_v0 = vmul.f32 %v7348_v34, %v2593_v6  ;;  %v6745_v59 = vadd.f32 %v2583_v33, %v2297_v5  ;;  %v2679_v12 = vmul.f32 %v7271_v19, %v2594_v9 }
 0x23e   : > { %v7387_v47 = vadd.f32 %v2707_v52, %v1491_v37  ;;  %v7389_v60 = vadd.f32 %v2703_v48, %v1487_v38  ;;  %v2596_v50 = vmax.f32 %v6744_v39, 0.0  ;;  %v7391_v57 = vadd.f32 %v2683_v32, %v1467_v41 }
 0x23f   : > { %v7393_v56 = vadd.f32 %v2706_v63, %v1490_v43  ;;  %v7395_v20 = vadd.f32 %v2702_v0, %v1486_v44  ;;  %v2595_v55 = vmax.f32 %v6745_v59, 0.0  ;;  %v7397_v46 = vadd.f32 %v2679_v12, %v1463_v42 }
 0x240   : > { %v2687_v36 = vmul.f32 %v7287_v27, %v2594_v9  ;;  %v2699_v5 = vmul.f32 %v7295_v35, %v2594_v9  ;;  %v2691_v33 = vmul.f32 %v7279_v23, %v2594_v9  ;;  %v2695_v37 = vmul.f32 %v7299_v40, %v2594_v9 }
 0x241   : > { %8157 = vst [vmem:[#allocation15_spill] sm:$0xff] %v7393_v56  ;;  %v2682_v48 = vmul.f32 %v7269_v18, %v2593_v6  ;;  %v2678_v38 = vmul.f32 %v7271_v19, %v2593_v6  ;;  %v2686_v63 = vmul.f32 %v7287_v27, %v2593_v6  ;;  %v2698_v41 = vmul.f32 %v7295_v35, %v2593_v6 }
 0x242   : > { %v7408_v59 = vadd.f32 %v2687_v36, %v7312_v29  ;;  %v7411_v42 = vadd.f32 %v2699_v5, %v7315_v49  ;;  %v7413_v43 = vadd.f32 %v2691_v33, %v1475_v54  ;;  %v7415_v44 = vadd.f32 %v2695_v37, %v1479_v58 }
 0x243   : > { %v7417_v52 = vadd.f32 %v2682_v48, %v1466_v61  ;;  %v7419_v9 = vadd.f32 %v2678_v38, %v1462_v1  ;;  %v7421_v39 = vadd.f32 %v2686_v63, %v1470_v2  ;;  %v7423_v32 = vadd.f32 %v2698_v41, %v1482_v7 }
 0x244   : > { %v2690_v0 = vmul.f32 %v7279_v23, %v2593_v6  ;;  %v2694_v36 = vmul.f32 %v7299_v40, %v2593_v6  ;;  %v2697_v29 = vmul.f32 %v7299_v40, %v2596_v50  ;;  %v2681_v49 = vmul.f32 %v7271_v19, %v2596_v50 }
 0x245   : > { %v2705_v54 = vmul.f32 %v7348_v34, %v2596_v50  ;;  %v2685_v58 = vmul.f32 %v7269_v18, %v2596_v50  ;;  %v2689_v61 = vmul.f32 %v7287_v27, %v2596_v50  ;;  %v2684_v1 = vmul.f32 %v7269_v18, %v2595_v55 }
 0x246   : > { %v7434_v2 = vadd.f32 %v2690_v0, %v7326_v8  ;;  %v7437_v7 = vadd.f32 %v2694_v36, %v7331_v13  ;;  %v7440_v6 = vadd.f32 %v2697_v29, %v7334_v15  ;;  %v7443_v12 = vadd.f32 %v2681_v49, %v7337_v16 }
 0x247   : > { %v7446_v5 = vadd.f32 %v2705_v54, %v7340_v25  ;;  %v7449_v33 = vadd.f32 %v2685_v58, %v7343_v26  ;;  %v7452_v18 = vadd.f32 %v2689_v61, %v7346_v31  ;;  %v7454_v8 = vadd.f32 %v2684_v1, %v1468_v28 }
 0x248   : > { %8158 = vst [vmem:[#allocation16_spill] sm:$0xff] %v7437_v7  ;;  %8159 = vst [vmem:[#allocation17_spill] sm:$0xff] %v7440_v6  ;;  %v2693_v13 = vmul.f32 %v7279_v23, %v2596_v50  ;;  %v2688_v37 = vmul.f32 %v7287_v27, %v2595_v55  ;;  %v2701_v15 = vmul.f32 %v7295_v35, %v2596_v50 }
 0x249   : > { %8160 = vst [vmem:[#allocation18_spill] sm:$0xff] %v7443_v12  ;;  %8161 = vst [vmem:[#allocation19_spill] sm:$0xff] %v7446_v5  ;;  %v2692_v16 = vmul.f32 %v7279_v23, %v2595_v55  ;;  %v2709_v48 = vmul.f32 %v7328_v10, %v2596_v50  ;;  %v2696_v25 = vmul.f32 %v7299_v40, %v2595_v55 }
 0x24a   : > { %8162 = vst [vmem:[#allocation20_spill] sm:$0xff] %v7449_v33  ;;  %8163 = vst [vmem:[#allocation21_spill] sm:$0xff] %v7452_v18  ;;  %v2704_v26 = vmul.f32 %v7348_v34, %v2595_v55  ;;  %v2680_v38 = vmul.f32 %v7271_v19, %v2595_v55  ;;  %v7465_v31 = vadd.f32 %v2693_v13, %v7353_v21 }
 0x24b   : > { %8164 = vst [vmem:[#allocation22_spill] sm:$0xff] %v7454_v8  ;;  %v7468_v28 = vadd.f32 %v2688_v37, %v7357_v4  ;;  %v7471_v27 = vadd.f32 %v2701_v15, %v7360_v14  ;;  %v7474_v63 = vadd.f32 %v2692_v16, %v7364_v53  ;;  %v7477_v23 = vadd.f32 %v2709_v48, %v7367_v22 }
 0x24c   : > { %8165 = vst [vmem:[#allocation23_spill] sm:$0xff] %v7465_v31  ;;  %v7480_v40 = vadd.f32 %v2696_v25, %v7371_v3  ;;  %v7483_v19 = vadd.f32 %v2704_v26, %v7375_v45  ;;  %v7486_v34 = vadd.f32 %v2680_v38, %v7379_v17  ;;  %v1484_v21 = vmul.f32 %v7243_v62, %v7317_v51 }
 0x24d   : > { %8166 = vst [vmem:[#allocation24_spill] sm:$0xff] %v7468_v28  ;;  %8167 = vst [vmem:[#allocation25_spill] sm:$0xff] %v7471_v27  ;;  %v2700_v14 = vmul.f32 %v7295_v35, %v2595_v55  ;;  %v1492_v4 = vmul.f32 %v7259_v11, %v7317_v51  ;;  %v2708_v53 = vmul.f32 %v7328_v10, %v2595_v55 }
 0x24e   : > { %8168 = vst [vmem:[#allocation26_spill] sm:$0xff] %v7474_v63  ;;  %8169 = vst [vmem:[#allocation27_spill] sm:$0xff] %v7477_v23 }
 0x24f   : > { %8170 = vst [vmem:[#allocation28_spill] sm:$0xff] %v7480_v40  ;;  %8171 = vst [vmem:[#allocation29_spill] sm:$0xff] %v7483_v19  ;;  %v7494_v22 = vadd.f32 %v2700_v14, %v1484_v21  ;;  %v7496_v3 = vadd.f32 %v2708_v53, %v1492_v4 }
 0x250   : > { %8172 = vst [vmem:[#allocation30_spill] sm:$0xff] %v7486_v34 }
 0x251   : > { %8173 = vst [vmem:[#allocation31_spill] sm:$0xff] %v7494_v22  ;;  %8174 = vst [vmem:[#allocation32_spill] sm:$0xff] %v7496_v3 }
 0x264   : > { %v6489_v50 = vpop.f32.mrb[8].mxu0 }
 0x265   : > { %v4505_v45 = vand.u32 4294901760, %v6489_v50  ;;  %v4491_v41 = vpop.f32.mrb[9].mxu0 }
 0x266   : > { %v4502_v0 = vand.u32 4294901760, %v4491_v41 }
 0x267   : > { %v4617_v17 = vsub.f32 %v6489_v50, %v4505_v45  ;;  %v6387_v36 = vpop.f32.mrb[8].mxu1 }
 0x268   : > { %v7498_v29 = vpack.c.bf16 %v4505_v45, %v4502_v0  ;;  %v4610_v62 = vsub.f32 %v4491_v41, %v4502_v0  ;;  %v3257_v49 = vand.u32 4294901760, %v6387_v36  ;;  %v3243_v35 = vpop.f32.mrb[9].mxu1  ;;  %v8175_v45 = vld [vmem:[#allocation14_spill] sm:$0xff] }
 0x269   : > { %v4618_v54 = vand.u32 4294901760, %v4617_v17  ;;  %v3254_v58 = vand.u32 4294901760, %v3243_v35  ;;  %v8176_v0 = vld [vmem:[#allocation2_spill] sm:$0xff] }
 0x26a   : > { %v4611_v11 = vand.u32 4294901760, %v4610_v62  ;;  %v3369_v51 = vsub.f32 %v6387_v36, %v3257_v49  ;;  %6719 = vmatprep.subr.bf16.mxu0 %v7498_v29  ;;  %v6726_v10 = vpack.c.bf16 %v4617_v17, %v4610_v62  ;;  %v8180_v36 = vld [vmem:[#allocation3_spill] sm:$0xff] }
 0x26b   : > { %v4619_v55 = vsub.f32 %v4617_v17, %v4618_v54  ;;  %v7501_v61 = vpack.c.bf16 %v3257_v49, %v3254_v58  ;;  %v3362_v1 = vsub.f32 %v3243_v35, %v3254_v58  ;;  %6721 = vmatpush3.bf16.msra.mxu0 %v7498_v29  ;;  %v8177_v17 = vld [vmem:[#allocation5_spill] sm:$0xff]  ;;  %v8183_v35 = vld [vmem:[#allocation11_spill] sm:$0xff]  ;;  %v8185_v58 = vld [vmem:[#allocation10_spill] sm:$0xff] }
 0x26c   : > { %v4612_v13 = vsub.f32 %v4610_v62, %v4611_v11  ;;  %v3370_v37 = vand.u32 4294901760, %v3369_v51  ;;  %v6734_v15 = vpack.c.bf16 %v4618_v54, %v4611_v11  ;;  %v8181_v62 = vld [vmem:[#allocation7_spill] sm:$0xff]  ;;  %v8182_v49 = vld [vmem:[#allocation9_spill] sm:$0xff]  ;;  %v8184_v54 = vld [vmem:[#allocation4_spill] sm:$0xff] }
 0x26d   : > { %v3363_v16 = vand.u32 4294901760, %v3362_v1  ;;  %6671 = vmatprep.subr.bf16.mxu1 %v7501_v61  ;;  %v4620_v48 = vand.u32 4294901760, %v4619_v55  ;;  %v6678_v25 = vpack.c.bf16 %v3369_v51, %v3362_v1  ;;  %v8186_v11 = vld [vmem:[#allocation12_spill] sm:$0xff] }
 0x26e   : > { %v3371_v26 = vsub.f32 %v3369_v51, %v3370_v37  ;;  %6495 = vmatmul.mubr.f32.vlgmr.msra.gmra.mrb[10].mxu0 %v7064_v24  ;;  %6673 = vmatpush3.bf16.msra.mxu1 %v7501_v61  ;;  %v4613_v38 = vand.u32 4294901760, %v4612_v13  ;;  %v8187_v51 = vld [vmem:[#allocation13_spill] sm:$0xff] }
 0x26f   : > { %v3364_v21 = vsub.f32 %v3362_v1, %v3363_v16  ;;  %6497 = vmatprep.mubr.f32.mxu0 %v7069_v30  ;;  %v6686_v14 = vpack.c.bf16 %v3370_v37, %v3363_v16 }
 0x270   : > { %v6722_v4 = vpack.c.bf16 %v4620_v48, %v4613_v38  ;;  %v3372_v53 = vand.u32 4294901760, %v3371_v26 }
 0x271   : > { %6393 = vmatmul.mubr.f32.vlgmr.msra.gmra.mrb[10].mxu1 %v7064_v24  ;;  %v3365_v50 = vand.u32 4294901760, %v3364_v21  ;;  %v8178_v24 = vld [vmem:[#allocation6_spill] sm:$0xff] }
 0x272   : > { %6498 = vmatmul.mubr.f32.gmra.mrb[12].mxu0 %v8175_v45  ;;  %6723 = vmatprep.subr.bf16.mxu0 %v6722_v4 }
 0x273   : > { %6725 = vmatpush3.bf16.msra.mxu0 %v6722_v4  ;;  %6395 = vmatprep.mubr.f32.mxu1 %v7069_v30  ;;  %v6674_v41 = vpack.c.bf16 %v3372_v53, %v3365_v50  ;;  %v8179_v30 = vld [vmem:[#allocation8_spill] sm:$0xff] }
 0x274   : > { %6727 = vmatprep.subr.bf16.mxu0 %v6726_v10  ;;  %6504 = vmatprep.mubr.f32.mxu0 %v8176_v0 }
 0x275   : > { %6396 = vmatmul.mubr.f32.gmra.mrb[12].mxu1 %v8175_v45  ;;  %6675 = vmatprep.subr.bf16.mxu1 %v6674_v41 }
 0x276   : > { %6505 = vmatmul.mubr.f32.vlgmr.msra.gmra.mrb[10].mxu0 %v8177_v17  ;;  %6677 = vmatpush3.bf16.msra.mxu1 %v6674_v41 }
 0x277   : > { %6729 = vmatpush3.bf16.msra.mxu0 %v6726_v10  ;;  %6679 = vmatprep.subr.bf16.mxu1 %v6678_v25  ;;  %v7562_v10 = vpop.permute.xlu1 %3899 }
 0x278   : > { %6731 = vmatprep.subr.bf16.mxu0 %v7498_v29  ;;  %6402 = vmatprep.mubr.f32.mxu1 %v8176_v0 }
 0x279   : > { %6507 = vmatprep.mubr.f32.mxu0 %v8178_v24  ;;  %6403 = vmatmul.mubr.f32.vlgmr.msra.gmra.mrb[10].mxu1 %v8177_v17 }
 0x27a   : > { %6508 = vmatmul.mubr.f32.gmra.mrb[12].mxu0 %v8179_v30  ;;  %6681 = vmatpush3.bf16.msra.mxu1 %v6678_v25 }
 0x27b   : > { %6683 = vmatprep.subr.bf16.mxu1 %v7501_v61  ;;  %6405 = vmatprep.mubr.f32.mxu1 %v8178_v24 }
 0x27c   : > { %6514 = vmatprep.mubr.f32.mxu0 %v8180_v36 }
 0x27d   : > { %6406 = vmatmul.mubr.f32.gmra.mrb[12].mxu1 %v8179_v30 }
 0x27e   : > { %6515 = vmatmul.mubr.f32.vlgmr.msra.gmra.mrb[10].mxu0 %v8181_v62  ;;  %6412 = vmatprep.mubr.f32.mxu1 %v8180_v36 }
 0x27f   : > { %6733 = vmatpush3.bf16.msra.mxu0 %v7498_v29  ;;  %6517 = vmatprep.mubr.f32.mxu0 %v8182_v49 }
 0x280   : > { %6735 = vmatprep.subr.bf16.mxu0 %v6734_v15 }
 0x281   : > { %6413 = vmatmul.mubr.f32.vlgmr.msra.gmra.mrb[10].mxu1 %v8181_v62 }
 0x282   : > { %6685 = vmatpush3.bf16.msra.mxu1 %v7501_v61  ;;  %6518 = vmatmul.mubr.f32.gmra.mrb[12].mxu0 %v8183_v35 }
 0x283   : > { %6687 = vmatprep.subr.bf16.mxu1 %v6686_v14  ;;  %6415 = vmatprep.mubr.f32.mxu1 %v8182_v49 }
 0x284   : > { %6524 = vmatprep.mubr.f32.mxu0 %v8184_v54 }
 0x285   : > { %6416 = vmatmul.mubr.f32.gmra.mrb[12].mxu1 %v8183_v35 }
 0x286   : > { %6525 = vmatmul.mubr.f32.vlgmr.msra.gmra.mrb[10].mxu0 %v8185_v58  ;;  %6422 = vmatprep.mubr.f32.mxu1 %v8184_v54 }
 0x287   : > { %6737 = vmatpush3.bf16.msra.mxu0 %v6734_v15  ;;  %6527 = vmatprep.mubr.f32.mxu0 %v8186_v11 }
 0x288   : > { %6739 = vmatprep.subr.bf16.mxu0 %v7498_v29 }
 0x289   : > { %6423 = vmatmul.mubr.f32.vlgmr.msra.gmra.mrb[10].mxu1 %v8185_v58 }
 0x28a   : > { %6689 = vmatpush3.bf16.msra.mxu1 %v6686_v14  ;;  %6528 = vmatmul.mubr.f32.gmra.mrb[12].mxu0 %v8187_v51 }
 0x28b   : > { %6691 = vmatprep.subr.bf16.mxu1 %v7501_v61  ;;  %6425 = vmatprep.mubr.f32.mxu1 %v8186_v11 }
 0x28c   : > { %6534 = vmatprep.mubr.f32.mxu0 %v8176_v0 }
 0x28d   : > { %6426 = vmatmul.mubr.f32.gmra.mrb[12].mxu1 %v8187_v51 }
 0x28e   : > { %6535 = vmatmul.mubr.f32.vlgmr.msra.gmra.mrb[10].mxu0 %v8177_v17  ;;  %6432 = vmatprep.mubr.f32.mxu1 %v8176_v0 }
 0x28f   : > { %6741 = vmatpush3.bf16.msra.mxu0 %v7498_v29  ;;  %6537 = vmatprep.mubr.f32.mxu0 %v8178_v24  ;;  %v7560_v29 = vpop.permute.xlu0 %3895 }
 0x291   : > { %6433 = vmatmul.mubr.f32.vlgmr.msra.gmra.mrb[10].mxu1 %v8177_v17 }
 0x292   : > { %6693 = vmatpush3.bf16.msra.mxu1 %v7501_v61  ;;  %6538 = vmatmul.mubr.f32.gmra.mrb[12].mxu0 %v8179_v30  ;;  %v7566_v61 = vpop.permute.xlu1 %3907 }
 0x293   : > { %6435 = vmatprep.mubr.f32.mxu1 %v8178_v24  ;;  %6544 = vmatprep.mubr.f32.mxu0 %v8176_v0  ;;  %v7564_v55 = vpop.permute.xlu0 %3903 }
 0x295   : > { %6436 = vmatmul.mubr.f32.gmra.mrb[12].mxu1 %v8179_v30 }
 0x296   : > { %6545 = vmatmul.mubr.f32.vlgmr.msra.gmra.mrb[10].mxu0 %v8177_v17  ;;  %6442 = vmatprep.mubr.f32.mxu1 %v8176_v0  ;;  %v7570_v13 = vpop.permute.xlu1 %3915 }
 0x297   : > { %6547 = vmatprep.mubr.f32.mxu0 %v8178_v24  ;;  %v7568_v1 = vpop.permute.xlu0 %3911 }
 0x299   : > { %6443 = vmatmul.mubr.f32.vlgmr.msra.gmra.mrb[10].mxu1 %v8177_v17 }
 0x29a   : > { %6548 = vmatmul.mubr.f32.gmra.mrb[12].mxu0 %v8179_v30  ;;  %6445 = vmatprep.mubr.f32.mxu1 %v8178_v24  ;;  %v7574_v15 = vpop.permute.xlu1 %3923 }
 0x29b   : > { %v7572_v37 = vpop.permute.xlu0 %3919 }
 0x29d   : > { %6446 = vmatmul.mubr.f32.gmra.mrb[12].mxu1 %v8179_v30 }
 0x29e   : > { %v7578_v48 = vpop.permute.xlu1 %5147 }
 0x29f   : > { %v7576_v16 = vpop.permute.xlu0 %5143 }
 0x2a2   : > { %v7582_v26 = vpop.permute.xlu1 %5155 }
 0x2a3   : > { %v7580_v25 = vpop.permute.xlu0 %5151 }
 0x2a6   : > { %v7586_v21 = vpop.permute.xlu1 %5163 }
 0x2a7   : > { %v7584_v38 = vpop.permute.xlu0 %5159 }
 0x2aa   : > { %v7590_v4 = vpop.permute.xlu1 %5171 }
 0x2ab   : > { %v7588_v14 = vpop.permute.xlu0 %5167 }
 0x2ae   : > { %v7594_v50 = vpop.permute.xlu1 %5291 }
 0x2af   : > { %v7592_v53 = vpop.permute.xlu0 %5287 }
 0x2b2   : > { %v7609_v3 = vpop.permute.xlu1 %5299 }
 0x2b3   : > { %v7596_v17 = vpop.permute.xlu0 %5295 }
 0x2b7   : > { %v7621_v28 = vpop.permute.xlu0 %5303 }
 0x369   : > { %v6546_v45 = vpop.f32.mrb[10].mxu0 }
 0x36a   : > { %v5090_v41 = vmax.f32 %v6546_v45, 0.0  ;;  %v5067_v0 = vpop.f32.mrb[11].mxu0 }
 0x36b   : > { %v7598_v30 = vmax.f32 %v5067_v0, 0.0 }
 0x36c   : > { %v6444_v24 = vpop.f32.mrb[10].mxu1  ;;  %v5179_v35 = vmul.f32 %v7578_v48, %v5090_v41  ;;  %v5175_v58 = vmul.f32 %v7576_v16, %v5090_v41  ;;  %v5183_v11 = vmul.f32 %v7580_v25, %v5090_v41  ;;  %v5195_v51 = vmul.f32 %v7586_v21, %v5090_v41 }
 0x36d   : > { %v3842_v36 = vmax.f32 %v6444_v24, 0.0  ;;  %v7600_v62 = vpop.f32.mrb[12].mxu0  ;;  %v3819_v49 = vpop.f32.mrb[11].mxu1  ;;  %v5187_v45 = vmul.f32 %v7582_v26, %v5090_v41  ;;  %v5199_v34 = vmul.f32 %v7588_v14, %v5090_v41  ;;  %v5191_v5 = vmul.f32 %v7584_v38, %v5090_v41 }
 0x36e   : > { %8188 = vst [vmem:[#allocation14_spill] sm:$0xff] %v7600_v62  ;;  %v7603_v54 = vpop.f32.mrb[13].mxu0  ;;  %v7629_v12 = vmax.f32 %v3819_v49, 0.0 }
 0x36f   : > { %8189 = vst [vmem:[#allocation2_spill] sm:$0xff] %v7603_v54  ;;  %v3931_v0 = vmul.f32 %v7562_v10, %v3842_v36  ;;  %v3927_v24 = vmul.f32 %v7560_v29, %v3842_v36  ;;  %v3935_v22 = vmul.f32 %v7564_v55, %v3842_v36  ;;  %v3947_v40 = vmul.f32 %v7570_v13, %v3842_v36 }
 0x370   : > { %v7615_v19 = vpop.f32.mrb[12].mxu1  ;;  %v3939_v23 = vmul.f32 %v7566_v61, %v3842_v36  ;;  %v3951_v63 = vmul.f32 %v7572_v37, %v3842_v36  ;;  %v3943_v27 = vmul.f32 %v7568_v1, %v3842_v36 }
 0x371   : > { %8190 = vst [vmem:[#allocation5_spill] sm:$0xff] %v7615_v19  ;;  %v7623_v31 = vpop.f32.mrb[13].mxu1  ;;  %v3963_v8 = vadd.f32 %v3931_v0, %v7391_v57  ;;  %v3959_v18 = vadd.f32 %v3927_v24, %v7397_v46  ;;  %v3967_v33 = vadd.f32 %v3935_v22, %v7408_v59  ;;  %v3979_v6 = vadd.f32 %v3947_v40, %v7411_v42  ;;  %v7636_v22 = vpop.permute.xlu1 %5307 }
 0x372   : > { %8191 = vst [vmem:[#allocation6_spill] sm:$0xff] %v7623_v31  ;;  %v3971_v56 = vadd.f32 %v3939_v23, %v7413_v43  ;;  %v3983_v19 = vadd.f32 %v3951_v63, %v7389_v60  ;;  %v3975_v31 = vadd.f32 %v3943_v27, %v7415_v44  ;;  %v3955_v59 = vmul.f32 %v7574_v15, %v3842_v36 }
 0x373   : > { %v5211_v54 = vadd.f32 %v5179_v35, %v3963_v8  ;;  %v5207_v62 = vadd.f32 %v5175_v58, %v3959_v18  ;;  %v5215_v7 = vadd.f32 %v5183_v11, %v3967_v33  ;;  %v5227_v57 = vadd.f32 %v5195_v51, %v3979_v6  ;;  %v7652_v6 = vpop.permute.xlu0 %5311 }
 0x374   : > { %v5219_v0 = vadd.f32 %v5187_v45, %v3971_v56  ;;  %v5231_v46 = vadd.f32 %v5199_v34, %v3983_v19  ;;  %v5223_v43 = vadd.f32 %v5191_v5, %v3975_v31  ;;  %v3987_v56 = vadd.f32 %v3955_v59, %v7387_v47 }
 0x375   : > { %v7639_v49 = vadd.f32 %v7594_v50, %v5211_v54  ;;  %v7642_v42 = vadd.f32 %v7592_v53, %v5207_v62  ;;  %v7645_v60 = vadd.f32 %v7596_v17, %v5215_v7  ;;  %v7648_v33 = vadd.f32 %v7636_v22, %v5227_v57  ;;  %v7700_v59 = vpop.permute.xlu1 %5315 }
 0x376   : > { %v5203_v44 = vmul.f32 %v7590_v4, %v5090_v41  ;;  %v5178_v7 = vmul.f32 %v7578_v48, %v7598_v30  ;;  %v7663_v47 = vadd.f32 %v7609_v3, %v5219_v0  ;;  %v7666_v31 = vadd.f32 %v7652_v6, %v5231_v46 }
 0x377   : > { %v5366_v18 = vsel %vm5350_vm1, %v7639_v49, 0.0  ;;  %v5354_v8 = vsel %vm5350_vm1, %v7642_v42, 0.0  ;;  %v5378_v5 = vsel %vm5350_vm1, %v7645_v60, 0.0  ;;  %v5414_v63 = vsel %vm5350_vm1, %v7648_v33, 0.0 }
 0x378   : > { %5367 = vadd.xlane.f32.xlu0 %v5366_v18  ;;  %5355 = vadd.xlane.f32.xlu1 %v5354_v8  ;;  %v5235_v27 = vadd.f32 %v5203_v44, %v3987_v56  ;;  %v7671_v23 = vadd.f32 %v7621_v28, %v5223_v43  ;;  %v3930_v40 = vmul.f32 %v7562_v10, %v7629_v12  ;;  %v5390_v51 = vsel %vm5350_vm1, %v7663_v47, 0.0 }
 0x379   : > { %v3926_v19 = vmul.f32 %v7560_v29, %v7629_v12  ;;  %v5174_v34 = vmul.f32 %v7576_v16, %v7598_v30  ;;  %v3934_v41 = vmul.f32 %v7564_v55, %v7629_v12  ;;  %v5182_v36 = vmul.f32 %v7580_v25, %v7598_v30 }
 0x37a   : > { %v3946_v62 = vmul.f32 %v7570_v13, %v7629_v12  ;;  %v3962_v35 = vadd.f32 %v3930_v40, %v7417_v52  ;;  %v5194_v58 = vmul.f32 %v7586_v21, %v7598_v30  ;;  %v3938_v11 = vmul.f32 %v7566_v61, %v7629_v12 }
 0x37b   : > { %v3958_v54 = vadd.f32 %v3926_v19, %v7419_v9  ;;  %v3966_v45 = vadd.f32 %v3934_v41, %v7421_v39  ;;  %v5186_v52 = vmul.f32 %v7582_v26, %v7598_v30  ;;  %v3950_v46 = vmul.f32 %v7572_v37, %v7629_v12 }
 0x37c   : > { %5379 = vadd.xlane.f32.xlu0 %v5378_v5  ;;  %5415 = vadd.xlane.f32.xlu1 %v5414_v63  ;;  %v3978_v24 = vadd.f32 %v3946_v62, %v7423_v32  ;;  %v5210_v57 = vadd.f32 %v5178_v7, %v3962_v35  ;;  %v3970_v0 = vadd.f32 %v3938_v11, %v7434_v2  ;;  %v5426_v43 = vsel %vm5350_vm1, %v7666_v31, 0.0  ;;  %v8192_v7 = vld [vmem:[#allocation16_spill] sm:$0xff]  ;;  %v8193_v63 = vld [vmem:[#allocation14_spill] sm:$0xff] }
 0x37d   : > { %v5206_v9 = vadd.f32 %v5174_v34, %v3958_v54  ;;  %v5214_v56 = vadd.f32 %v5182_v36, %v3966_v45  ;;  %v3942_v39 = vmul.f32 %v7568_v1, %v7629_v12  ;;  %v7707_v32 = vadd.f32 %v7700_v59, %v5235_v27  ;;  %v8194_v27 = vld [vmem:[#allocation2_spill] sm:$0xff]  ;;  %v8195_v45 = vld [vmem:[#allocation5_spill] sm:$0xff] }
 0x37e   : > { %v5226_v44 = vadd.f32 %v5194_v58, %v3978_v24  ;;  %v5218_v18 = vadd.f32 %v5186_v52, %v3970_v0  ;;  %v3982_v8 = vadd.f32 %v3950_v46, %v7395_v20  ;;  %v5198_v2 = vmul.f32 %v7588_v14, %v7598_v30 }
 0x37f   : > { %v3974_v5 = vadd.f32 %v3942_v39, %v8192_v7  ;;  %v7714_v40 = vmax.f32 %v8193_v63, 0.0  ;;  %v5322_v19 = vadd.f32 %v7594_v50, %v5210_v57  ;;  %v5318_v34 = vadd.f32 %v7592_v53, %v5206_v9  ;;  %v8196_v57 = vld [vmem:[#allocation15_spill] sm:$0xff]  ;;  %v8197_v63 = vld [vmem:[#allocation6_spill] sm:$0xff] }
 0x380   : > { %5391 = vadd.xlane.f32.xlu0 %v5390_v51  ;;  %5427 = vadd.xlane.f32.xlu1 %v5426_v43  ;;  %v5230_v41 = vadd.f32 %v5198_v2, %v3982_v8  ;;  %v7719_v36 = vmax.f32 %v8194_v27, 0.0  ;;  %v5402_v20 = vsel %vm5350_vm1, %v7671_v23, 0.0  ;;  %v5190_v62 = vmul.f32 %v7584_v38, %v7598_v30 }
 0x381   : > { %v3954_v35 = vmul.f32 %v7574_v15, %v7629_v12  ;;  %v5438_v54 = vsel %vm5350_vm1, %v7707_v32, 0.0  ;;  %v5326_v58 = vadd.f32 %v7596_v17, %v5214_v56  ;;  %v5338_v11 = vadd.f32 %v7636_v22, %v5226_v44 }
 0x382   : > { %v5330_v51 = vadd.f32 %v7609_v3, %v5218_v18  ;;  %v7733_v24 = vmax.f32 %v8195_v45, 0.0  ;;  %v5222_v52 = vadd.f32 %v5190_v62, %v3974_v5  ;;  %v5202_v12 = vmul.f32 %v7590_v4, %v7598_v30 }
 0x383   : > { %v3986_v9 = vadd.f32 %v3954_v35, %v8196_v57  ;;  %v5363_v0 = vsel %vm5350_vm1, %v5322_v19, 0.0  ;;  %v5351_v46 = vsel %vm5350_vm1, %v5318_v34, 0.0  ;;  %v5342_v43 = vadd.f32 %v7652_v6, %v5230_v41 }
 0x384   : > { %5403 = vadd.xlane.f32.xlu0 %v5402_v20  ;;  %5439 = vadd.xlane.f32.xlu1 %v5438_v54  ;;  %v5529_v56 = vmul.f32 %v7642_v42, %v7642_v42  ;;  %v5528_v39 = vmul.f32 %v5318_v34, %v5318_v34  ;;  %v5533_v18 = vmul.f32 %v7639_v49, %v7639_v49  ;;  %v7751_v41 = vmax.f32 %v8197_v63, 0.0 }
 0x385   : > { %v5234_v44 = vadd.f32 %v5202_v12, %v3986_v9  ;;  %v5532_v8 = vmul.f32 %v5322_v19, %v5322_v19  ;;  %v5334_v2 = vadd.f32 %v7621_v28, %v5222_v52  ;;  %v5537_v30 = vmul.f32 %v7645_v60, %v7645_v60 }
 0x386   : > { %v5536_v7 = vmul.f32 %v5326_v58, %v5326_v58  ;;  %v5541_v5 = vmul.f32 %v7663_v47, %v7663_v47  ;;  %v5375_v42 = vsel %vm5350_vm1, %v5326_v58, 0.0  ;;  %v5540_v49 = vmul.f32 %v5330_v51, %v5330_v51 }
 0x387   : > { %v7755_v34 = vadd.f32 %v7700_v59, %v5234_v44  ;;  %v5411_v19 = vsel %vm5350_vm1, %v5338_v11, 0.0  ;;  %v5387_v27 = vsel %vm5350_vm1, %v5330_v51, 0.0  ;;  %v5423_v60 = vsel %vm5350_vm1, %v5342_v43, 0.0 }
 0x388   : > { %5364 = vadd.xlane.f32.xlu1 %v5363_v0  ;;  %5352 = vadd.xlane.f32.xlu0 %v5351_v46  ;;  %v5545_v47 = vmul.f32 %v7671_v23, %v7671_v23  ;;  %v5563_v20 = vsel %vm5350_vm1, %v5529_v56, 0.0  ;;  %v5560_v62 = vsel %vm5350_vm1, %v5528_v39, 0.0  ;;  %v7765_v35 = vsel %vm5350_vm1, %v5533_v18, 0.0 }
 0x389   : > { %8198 = vst [vmem:[#allocation8_spill] sm:$0xff] %v7755_v34  ;;  %v7768_v54 = vsel %vm5350_vm1, %v5532_v8, 0.0  ;;  %v5399_v58 = vsel %vm5350_vm1, %v5334_v2, 0.0  ;;  %v7772_v45 = vsel %vm5350_vm1, %v5537_v30, 0.0  ;;  %v7775_v51 = vsel %vm5350_vm1, %v5536_v7, 0.0 }
 0x38a   : > { %v7778_v23 = vsel %vm5350_vm1, %v5541_v5, 0.0  ;;  %v5435_v52 = vsel %vm5350_vm1, %v7755_v34, 0.0  ;;  %v7783_v57 = vsel %vm5350_vm1, %v5540_v49, 0.0  ;;  %v5544_v9 = vmul.f32 %v5334_v2, %v5334_v2  ;;  %v8202_v5 = vld [vmem:[#allocation18_spill] sm:$0xff] }
 0x38b   : > { %v5549_v12 = vmul.f32 %v7648_v33, %v7648_v33  ;;  %v7788_v0 = vsel %vm5350_vm1, %v5545_v47, 0.0  ;;  %v7790_v46 = vmul.f32 %v5338_v11, %v5338_v11  ;;  %v7794_v56 = vmul.f32 %v7666_v31, %v7666_v31  ;;  %v8201_v11 = vld [vmem:[#allocation17_spill] sm:$0xff]  ;;  %v8203_v47 = vld [vmem:[#allocation19_spill] sm:$0xff] }
 0x38c   : > { %5376 = vadd.xlane.f32.xlu1 %v5375_v42  ;;  %5412 = vadd.xlane.f32.xlu0 %v5411_v19  ;;  %v3945_v44 = vmul.f32 %v7568_v1, %v7733_v24  ;;  %v7798_v39 = vmul.f32 %v5342_v43, %v5342_v43  ;;  %v5193_v18 = vmul.f32 %v7584_v38, %v7714_v40  ;;  %v7814_v7 = vsel %vm5350_vm1, %v5544_v9, 0.0 }
 0x38d   : > { %8199 = vst [vmem:[#allocation3_spill] sm:$0xff] %v7794_v56  ;;  %v3929_v33 = vmul.f32 %v7560_v29, %v7733_v24  ;;  %v5177_v8 = vmul.f32 %v7576_v16, %v7714_v40  ;;  %v3953_v31 = vmul.f32 %v7572_v37, %v7733_v24  ;;  %v5201_v30 = vmul.f32 %v7588_v14, %v7714_v40 }
 0x38e   : > { %8200 = vst [vmem:[#allocation7_spill] sm:$0xff] %v7798_v39  ;;  %v3977_v2 = vadd.f32 %v3945_v44, %v8201_v11  ;;  %v3933_v43 = vmul.f32 %v7562_v10, %v7733_v24  ;;  %v5181_v42 = vmul.f32 %v7578_v48, %v7714_v40  ;;  %v3937_v49 = vmul.f32 %v7564_v55, %v7733_v24  ;;  %v8204_v11 = vld [vmem:[#allocation20_spill] sm:$0xff]  ;;  %v8205_v39 = vld [vmem:[#allocation21_spill] sm:$0xff] }
 0x38f   : > { %v3961_v63 = vadd.f32 %v3929_v33, %v8202_v5  ;;  %v3985_v44 = vadd.f32 %v3953_v31, %v8203_v47  ;;  %v3932_v33 = vmul.f32 %v7562_v10, %v7751_v41  ;;  %v5180_v5 = vmul.f32 %v7578_v48, %v7719_v36  ;;  %v8206_v10 = vld [vmem:[#allocation22_spill] sm:$0xff] }
 0x390   : > { %5388 = vadd.xlane.f32.xlu1 %v5387_v27  ;;  %5424 = vadd.xlane.f32.xlu0 %v5423_v60  ;;  %v5225_v19 = vadd.f32 %v5193_v18, %v3977_v2  ;;  %v3965_v34 = vadd.f32 %v3933_v43, %v8204_v11  ;;  %v5185_v27 = vmul.f32 %v7580_v25, %v7714_v40 }
 0x391   : > { %v5209_v60 = vadd.f32 %v5177_v8, %v3961_v63  ;;  %v3969_v9 = vadd.f32 %v3937_v49, %v8205_v39  ;;  %v5233_v18 = vadd.f32 %v5201_v30, %v3985_v44  ;;  %v3941_v31 = vmul.f32 %v7566_v61, %v7733_v24 }
 0x392   : > { %v7831_v56 = vadd.f32 %v7621_v28, %v5225_v19  ;;  %v5213_v2 = vadd.f32 %v5181_v42, %v3965_v34  ;;  %v7836_v8 = vsel %vm5350_vm1, %v5549_v12, 0.0  ;;  %v3964_v63 = vadd.f32 %v3932_v33, %v8206_v10 }
 0x393   : > { %v5321_v39 = vadd.f32 %v7592_v53, %v5209_v60  ;;  %v5217_v43 = vadd.f32 %v5185_v27, %v3969_v9  ;;  %v7845_v30 = vadd.f32 %v7652_v6, %v5233_v18  ;;  %v5189_v19 = vmul.f32 %v7582_v26, %v7714_v40  ;;  %v8208_v18 = vld [vmem:[#allocation24_spill] sm:$0xff] }
 0x394   : > { %5400 = vadd.xlane.f32.xlu1 %v5399_v58  ;;  %5436 = vadd.xlane.f32.xlu0 %v5435_v52  ;;  %v7842_v48 = vsel %vm5350_vm1, %v7831_v56, 0.0  ;;  %v7848_v34 = vadd.f32 %v7594_v50, %v5213_v2  ;;  %v8207_v58 = vld [vmem:[#allocation23_spill] sm:$0xff]  ;;  %v5212_v49 = vadd.f32 %v5180_v5, %v3964_v63  ;;  %v3936_v11 = vmul.f32 %v7564_v55, %v7751_v41 }
 0x395   : > { %v3973_v52 = vadd.f32 %v3941_v31, %v8207_v58  ;;  %v7852_v12 = vsel %vm5350_vm1, %v5321_v39, 0.0  ;;  %v5329_v42 = vadd.f32 %v7596_v17, %v5217_v43  ;;  %v7859_v47 = vsel %vm5350_vm1, %v7845_v30, 0.0  ;;  %v8209_v31 = vld [vmem:[#allocation25_spill] sm:$0xff]  ;;  %v8210_v58 = vld [vmem:[#allocation26_spill] sm:$0xff] }
 0x396   : > { %v7863_v44 = vsel %vm5350_vm1, %v7848_v34, 0.0  ;;  %v5184_v27 = vmul.f32 %v7580_v25, %v7719_v36  ;;  %v7873_v9 = vadd.f32 %v7594_v50, %v5212_v49  ;;  %v3949_v5 = vmul.f32 %v7570_v13, %v7733_v24 }
 0x397   : > { %v7870_v60 = vsel %vm5350_vm1, %v5329_v42, 0.0  ;;  %v5221_v33 = vadd.f32 %v5189_v19, %v3973_v52  ;;  %v3968_v2 = vadd.f32 %v3936_v11, %v8208_v18  ;;  %v5197_v55 = vmul.f32 %v7586_v21, %v7714_v40  ;;  %v8211_v11 = vld [vmem:[#allocation27_spill] sm:$0xff] }
 0x398   : > { %5564 = vadd.xlane.f32.xlu1 %v5563_v20  ;;  %5561 = vadd.xlane.f32.xlu0 %v5560_v62  ;;  %v3940_v25 = vmul.f32 %v7566_v61, %v7751_v41  ;;  %v5188_v20 = vmul.f32 %v7582_v26, %v7719_v36  ;;  %v7886_v62 = vsel %vm5350_vm1, %v7873_v9, 0.0  ;;  %v3981_v43 = vadd.f32 %v3949_v5, %v8209_v31 }
 0x399   : > { %v5333_v50 = vadd.f32 %v7609_v3, %v5221_v33  ;;  %v3957_v10 = vmul.f32 %v7574_v15, %v7733_v24  ;;  %v5216_v63 = vadd.f32 %v5184_v27, %v3968_v2  ;;  %v5205_v61 = vmul.f32 %v7590_v4, %v7714_v40  ;;  %v8212_v40 = vld [vmem:[#allocation28_spill] sm:$0xff] }
 0x39a   : > { %v3972_v52 = vadd.f32 %v3940_v25, %v8210_v58  ;;  %v3944_v26 = vmul.f32 %v7568_v1, %v7751_v41  ;;  %v5229_v19 = vadd.f32 %v5197_v55, %v3981_v43  ;;  %v5192_v24 = vmul.f32 %v7584_v38, %v7719_v36  ;;  %v8214_v43 = vld [vmem:[#allocation30_spill] sm:$0xff] }
 0x39b   : > { %v7900_v49 = vsel %vm5350_vm1, %v5333_v50, 0.0  ;;  %v3989_v33 = vadd.f32 %v3957_v10, %v8211_v11  ;;  %v5328_v27 = vadd.f32 %v7596_v17, %v5216_v63  ;;  %v3952_v1 = vmul.f32 %v7572_v37, %v7751_v41 }
 0x39c   : > { %5576 = vadd.xlane.f32.xlu1 %v7765_v35  ;;  %5573 = vadd.xlane.f32.xlu0 %v7768_v54  ;;  %v5220_v5 = vadd.f32 %v5188_v20, %v3972_v52  ;;  %v3976_v18 = vadd.f32 %v3944_v26, %v8212_v40  ;;  %v5341_v35 = vadd.f32 %v7636_v22, %v5229_v19  ;;  %v8213_v20 = vld [vmem:[#allocation29_spill] sm:$0xff] }
 0x39d   : > { %v5237_v54 = vadd.f32 %v5205_v61, %v3989_v33  ;;  %v5200_v2 = vmul.f32 %v7588_v14, %v7719_v36  ;;  %v3928_v55 = vmul.f32 %v7560_v29, %v7751_v41  ;;  %v7915_v25 = vsel %vm5350_vm1, %v5328_v27, 0.0  ;;  %v8215_v33 = vld [vmem:[#allocation31_spill] sm:$0xff] }
 0x39e   : > { %v5332_v38 = vadd.f32 %v7609_v3, %v5220_v5  ;;  %v5224_v17 = vadd.f32 %v5192_v24, %v3976_v18  ;;  %v3984_v31 = vadd.f32 %v3952_v1, %v8213_v20  ;;  %v7922_v37 = vsel %vm5350_vm1, %v5341_v35, 0.0 }
 0x39f   : > { %v5349_v14 = vadd.f32 %v7700_v59, %v5237_v54  ;;  %v3960_v10 = vadd.f32 %v3928_v55, %v8214_v43  ;;  %v5176_v29 = vmul.f32 %v7576_v16, %v7719_v36  ;;  %v5531_v52 = vmul.f32 %v5321_v39, %v5321_v39 }
 0x3a0   : > { %5588 = vadd.xlane.f32.xlu1 %v7772_v45  ;;  %5585 = vadd.xlane.f32.xlu0 %v7775_v51  ;;  %v7929_v63 = vsel %vm5350_vm1, %v5332_v38, 0.0  ;;  %v5336_v3 = vadd.f32 %v7621_v28, %v5224_v17  ;;  %v5232_v58 = vadd.f32 %v5200_v2, %v3984_v31  ;;  %v3948_v61 = vmul.f32 %v7570_v13, %v7751_v41 }
 0x3a1   : > { %v7933_v45 = vsel %vm5350_vm1, %v5349_v14, 0.0  ;;  %v5208_v51 = vadd.f32 %v5176_v29, %v3960_v10  ;;  %v5196_v26 = vmul.f32 %v7586_v21, %v7719_v36  ;;  %v7944_v11 = vsel %vm5350_vm1, %v5531_v52, 0.0 }
 0x3a2   : > { %v7940_v19 = vsel %vm5350_vm1, %v5336_v3, 0.0  ;;  %v5344_v16 = vadd.f32 %v7652_v6, %v5232_v58  ;;  %v5539_v28 = vmul.f32 %v5329_v42, %v5329_v42  ;;  %v5620_v39 = vsel %vm5350_vm1, %v7790_v46, 0.0  ;;  %v8216_v42 = vld [vmem:[#allocation32_spill] sm:$0xff] }
 0x3a3   : > { %v5320_v13 = vadd.f32 %v7592_v53, %v5208_v51  ;;  %v3980_v21 = vadd.f32 %v3948_v61, %v8215_v33  ;;  %v3956_v24 = vmul.f32 %v7574_v15, %v7751_v41  ;;  %v5535_v15 = vmul.f32 %v7848_v34, %v7848_v34  ;;  %v8217_v61 = vld [vmem:[#allocation3_spill] sm:$0xff] }
 0x3a4   : > { %5600 = vadd.xlane.f32.xlu1 %v7778_v23  ;;  %5597 = vadd.xlane.f32.xlu0 %v7783_v57  ;;  %v7955_v6 = vsel %vm5350_vm1, %v5344_v16, 0.0  ;;  %v7958_v5 = vsel %vm5350_vm1, %v5539_v28, 0.0  ;;  %v5204_v23 = vmul.f32 %v7590_v4, %v7719_v36  ;;  %v5547_v57 = vmul.f32 %v7831_v56, %v7831_v56 }
 0x3a5   : > { %v5357_v46 = vsel %vm5350_vm1, %v5320_v13, 0.0  ;;  %v5228_v53 = vadd.f32 %v5196_v26, %v3980_v21  ;;  %v3988_v40 = vadd.f32 %v3956_v24, %v8216_v42  ;;  %v5530_v18 = vmul.f32 %v5320_v13, %v5320_v13 }
 0x3a6   : > { %v5617_v41 = vsel %vm5350_vm1, %v5547_v57, 0.0  ;;  %v5543_v1 = vmul.f32 %v5333_v50, %v5333_v50  ;;  %v5538_v54 = vmul.f32 %v5328_v27, %v5328_v27  ;;  %v5581_v56 = vsel %vm5350_vm1, %v5535_v15, 0.0 }
 0x3a7   : > { %v5340_v4 = vadd.f32 %v7636_v22, %v5228_v53  ;;  %v5236_v36 = vadd.f32 %v5204_v23, %v3988_v40  ;;  %v5551_v2 = vmul.f32 %v5341_v35, %v5341_v35  ;;  %v5566_v55 = vsel %vm5350_vm1, %v5530_v18, 0.0 }
 0x3a8   : > { %5612 = vadd.xlane.f32.xlu1 %v7788_v0  ;;  %5609 = vadd.xlane.f32.xlu0 %v7814_v7  ;;  %v5605_v17 = vsel %vm5350_vm1, %v5543_v1, 0.0  ;;  %v5590_v34 = vsel %vm5350_vm1, %v5538_v54, 0.0  ;;  %v5546_v20 = vmul.f32 %v5336_v3, %v5336_v3  ;;  %v5534_v22 = vmul.f32 %v7873_v9, %v7873_v9 }
 0x3a9   : > { %v5417_v50 = vsel %vm5350_vm1, %v5340_v4, 0.0  ;;  %v5348_v27 = vadd.f32 %v7700_v59, %v5236_v36  ;;  %v5629_v0 = vsel %vm5350_vm1, %v5551_v2, 0.0  ;;  %v5554_v31 = vmul.f32 %v5344_v16, %v5344_v16  ;;  %v8218_v16 = vld [vmem:[#allocation7_spill] sm:$0xff] }
 0x3aa   : > { %v5614_v7 = vsel %vm5350_vm1, %v5546_v20, 0.0  ;;  %v5542_v35 = vmul.f32 %v5332_v38, %v5332_v38  ;;  %v5555_v43 = vmul.f32 %v7845_v30, %v7845_v30  ;;  %v5578_v29 = vsel %vm5350_vm1, %v5534_v22, 0.0 }
 0x3ab   : > { %v5441_v10 = vsel %vm5350_vm1, %v5348_v27, 0.0  ;;  %v5550_v59 = vmul.f32 %v5340_v4, %v5340_v4  ;;  %v5558_v3 = vmul.f32 %v5348_v27, %v5348_v27  ;;  %v5638_v58 = vsel %vm5350_vm1, %v5554_v31, 0.0 }
 0x3ac   : > { %5624 = vadd.xlane.f32.xlu1 %v7836_v8  ;;  %5621 = vadd.xlane.f32.xlu0 %v5620_v39  ;;  %v5602_v9 = vsel %vm5350_vm1, %v5542_v35, 0.0  ;;  %v5641_v52 = vsel %vm5350_vm1, %v5555_v43, 0.0  ;;  %v5559_v51 = vmul.f32 %v5349_v14, %v5349_v14  ;;  %v5557_v38 = vmul.f32 %v7707_v32, %v7707_v32  ;;  %v8219_v39 = vld [vmem:[#allocation8_spill] sm:$0xff] }
 0x3ad   : > { %v5626_v30 = vsel %vm5350_vm1, %v5550_v59, 0.0  ;;  %v5650_v8 = vsel %vm5350_vm1, %v5558_v3, 0.0  ;;  %v5635_v26 = vsel %vm5350_vm1, %v8217_v61, 0.0  ;;  %v5632_v28 = vsel %vm5350_vm1, %v8218_v16, 0.0 }
 0x3ae   : > { %v5556_v13 = vmul.f32 %v8219_v39, %v8219_v39  ;;  %v5653_v33 = vsel %vm5350_vm1, %v5559_v51, 0.0  ;;  %v5647_v14 = vsel %vm5350_vm1, %v5557_v38, 0.0 }
 0x3b0   : > { %5636 = vadd.xlane.f32.xlu1 %v5635_v26  ;;  %5633 = vadd.xlane.f32.xlu0 %v5632_v28  ;;  %v5644_v32 = vsel %vm5350_vm1, %v5556_v13, 0.0 }
 0x3b4   : > { %5648 = vadd.xlane.f32.xlu1 %v5647_v14  ;;  %5645 = vadd.xlane.f32.xlu0 %v5644_v32 }
 0x3b8   : > { %5409 = vadd.xlane.f32.xlu1 %v7842_v48  ;;  %5361 = vadd.xlane.f32.xlu0 %v7852_v12 }
 0x3bc   : > { %5433 = vadd.xlane.f32.xlu1 %v7859_v47  ;;  %5373 = vadd.xlane.f32.xlu0 %v7863_v44 }
 0x3c0   : > { %5385 = vadd.xlane.f32.xlu0 %v7870_v60  ;;  %5370 = vadd.xlane.f32.xlu1 %v7886_v62 }
 0x3c4   : > { %5397 = vadd.xlane.f32.xlu0 %v7900_v49  ;;  %5382 = vadd.xlane.f32.xlu1 %v7915_v25 }
 0x3c8   : > { %5421 = vadd.xlane.f32.xlu0 %v7922_v37  ;;  %5394 = vadd.xlane.f32.xlu1 %v7929_v63 }
 0x3cc   : > { %5445 = vadd.xlane.f32.xlu0 %v7933_v45  ;;  %5406 = vadd.xlane.f32.xlu1 %v7940_v19 }
 0x3d0   : > { %5430 = vadd.xlane.f32.xlu1 %v7955_v6  ;;  %5358 = vadd.xlane.f32.xlu0 %v5357_v46 }
 0x3d4   : > { %5570 = vadd.xlane.f32.xlu1 %v7944_v11  ;;  %5418 = vadd.xlane.f32.xlu0 %v5417_v50 }
 0x3d8   : > { %5594 = vadd.xlane.f32.xlu1 %v7958_v5  ;;  %5442 = vadd.xlane.f32.xlu0 %v5441_v10 }
 0x3dc   : > { %5618 = vadd.xlane.f32.xlu1 %v5617_v41  ;;  %5582 = vadd.xlane.f32.xlu0 %v5581_v56 }
 0x3e0   : > { %5567 = vadd.xlane.f32.xlu1 %v5566_v55  ;;  %5606 = vadd.xlane.f32.xlu0 %v5605_v17 }
 0x3e4   : > { %5591 = vadd.xlane.f32.xlu1 %v5590_v34  ;;  %5630 = vadd.xlane.f32.xlu0 %v5629_v0 }
 0x3e8   : > { %5615 = vadd.xlane.f32.xlu1 %v5614_v7  ;;  %5579 = vadd.xlane.f32.xlu0 %v5578_v29 }
 0x3ec   : > { %5639 = vadd.xlane.f32.xlu1 %v5638_v58  ;;  %5603 = vadd.xlane.f32.xlu0 %v5602_v9 }
 0x3f0   : > { %5642 = vadd.xlane.f32.xlu1 %v5641_v52  ;;  %5627 = vadd.xlane.f32.xlu0 %v5626_v30 }
 0x3f4   : > { %5651 = vadd.xlane.f32.xlu0 %v5650_v8 }
 0x3f8   : > { %5654 = vadd.xlane.f32.xlu0 %v5653_v33 }
 0x405   : > { %v5368_v48 = vpop.xlane.xlu0 %5367  ;;  %v5356_v12 = vpop.xlane.xlu1 %5355 }
 0x409   : > { %v5380_v47 = vpop.xlane.xlu0 %5379  ;;  %v5416_v44 = vpop.xlane.xlu1 %5415 }
 0x40d   : > { %v5392_v60 = vpop.xlane.xlu0 %5391  ;;  %v8018_v62 = vpop.xlane.xlu1 %5427 }
 0x411   : > { %v5404_v49 = vpop.xlane.xlu0 %5403  ;;  %v5440_v25 = vpop.xlane.xlu1 %5439 }
 0x415   : > { %v5365_v37 = vpop.xlane.xlu1 %5364  ;;  %v5353_v63 = vpop.xlane.xlu0 %5352 }
 0x416   : > { %v8020_v45 = vadd.f32 %v5356_v12, %v5353_v63  ;;  %v5456_v29 = vadd.f32 %v5368_v48, %v5365_v37 }
 0x419   : > { %v5377_v19 = vpop.xlane.xlu1 %5376  ;;  %v5413_v11 = vpop.xlane.xlu0 %5412 }
 0x41a   : > { %v8022_v21 = vadd.f32 %v5416_v44, %v5413_v11  ;;  %v5465_v9 = vadd.f32 %v5380_v47, %v5377_v19 }
 0x41d   : > { %v5389_v24 = vpop.xlane.xlu1 %5388  ;;  %v5425_v6 = vpop.xlane.xlu0 %5424 }
 0x41e   : > { %v5474_v61 = vadd.f32 %v5392_v60, %v5389_v24  ;;  %v5501_v60 = vadd.f32 %v8018_v62, %v5425_v6 }
 0x421   : > { %v5401_v5 = vpop.xlane.xlu1 %5400  ;;  %v5437_v23 = vpop.xlane.xlu0 %5436 }
 0x422   : > { %v8024_v57 = vadd.f32 %v5440_v25, %v5437_v23  ;;  %v5483_v32 = vadd.f32 %v5404_v49, %v5401_v5 }
 0x425   : > { %v5565_v46 = vpop.xlane.xlu1 %5564  ;;  %v5562_v53 = vpop.xlane.xlu0 %5561 }
 0x426   : > { %v8026_v42 = vadd.f32 %v5565_v46, %v5562_v53 }
 0x429   : > { %v5577_v40 = vpop.xlane.xlu1 %5576  ;;  %v5574_v15 = vpop.xlane.xlu0 %5573 }
 0x42a   : > { %v8028_v41 = vadd.f32 %v5577_v40, %v5574_v15 }
 0x42d   : > { %v5589_v18 = vpop.xlane.xlu1 %5588  ;;  %v5586_v1 = vpop.xlane.xlu0 %5585 }
 0x42e   : > { %v8030_v54 = vadd.f32 %v5589_v18, %v5586_v1 }
 0x431   : > { %v5601_v4 = vpop.xlane.xlu1 %5600  ;;  %v5598_v36 = vpop.xlane.xlu0 %5597 }
 0x432   : > { %v8032_v56 = vadd.f32 %v5601_v4, %v5598_v36 }
 0x435   : > { %v8034_v2 = vpop.xlane.xlu1 %5612  ;;  %v8036_v55 = vpop.xlane.xlu0 %5609 }
 0x439   : > { %v5625_v17 = vpop.xlane.xlu1 %5624  ;;  %v5622_v34 = vpop.xlane.xlu0 %5621 }
 0x43a   : > { %v8038_v20 = vadd.f32 %v5625_v17, %v5622_v34 }
 0x43d   : > { %v8040_v50 = vpop.xlane.xlu1 %5636  ;;  %v8042_v27 = vpop.xlane.xlu0 %5633 }
 0x441   : > { %v5649_v0 = vpop.xlane.xlu1 %5648  ;;  %v5646_v22 = vpop.xlane.xlu0 %5645 }
 0x442   : > { %v8044_v7 = vadd.f32 %v5649_v0, %v5646_v22 }
 0x445   : > { %v5410_v31 = vpop.xlane.xlu1 %5409  ;;  %v5362_v35 = vpop.xlane.xlu0 %5361 }
 0x449   : > { %v5434_v43 = vpop.xlane.xlu1 %5433  ;;  %v5374_v10 = vpop.xlane.xlu0 %5373 }
 0x44d   : > { %v5386_v59 = vpop.xlane.xlu0 %5385  ;;  %v5371_v3 = vpop.xlane.xlu1 %5370 }
 0x44e   : > { %v5457_v58 = vadd.f32 %v5456_v29, %v5371_v3 }
 0x450   : > { %v5458_v52 = vadd.f32 %v5457_v58, %v5374_v10 }
 0x451   : > { %v5398_v51 = vpop.xlane.xlu0 %5397  ;;  %v5383_v38 = vpop.xlane.xlu1 %5382 }
 0x452   : > { %v5459_v30 = vrot.slane %v5458_v52, 4  ;;  %v5466_v8 = vadd.f32 %v5465_v9, %v5383_v38 }
 0x454   : > { %v5460_v26 = vadd.f32 %v5459_v30, %v5458_v52  ;;  %v5467_v16 = vadd.f32 %v5466_v8, %v5386_v59 }
 0x455   : > { %v5422_v28 = vpop.xlane.xlu0 %5421  ;;  %v5395_v39 = vpop.xlane.xlu1 %5394 }
 0x456   : > { %v5461_v13 = vrot.slane %v5460_v26, 2  ;;  %v5468_v33 = vrot.slane %v5467_v16, 4  ;;  %v5475_v14 = vadd.f32 %v5474_v61, %v5395_v39 }
 0x458   : > { %v5462_v48 = vadd.f32 %v5461_v13, %v5460_v26  ;;  %v5469_v12 = vadd.f32 %v5468_v33, %v5467_v16  ;;  %v5476_v44 = vadd.f32 %v5475_v14, %v5398_v51 }
 0x459   : > { %v5446_v47 = vpop.xlane.xlu0 %5445  ;;  %v5407_v25 = vpop.xlane.xlu1 %5406 }
 0x45a   : > { %v5463_v37 = vrot.slane %v5462_v48, 1  ;;  %v5470_v63 = vrot.slane %v5469_v12, 2  ;;  %v5477_v19 = vrot.slane %v5476_v44, 4  ;;  %v5484_v11 = vadd.f32 %v5483_v32, %v5407_v25 }
 0x45c   : > { %v5464_v49 = vadd.f32 %v5463_v37, %v5462_v48  ;;  %v5471_v24 = vadd.f32 %v5470_v63, %v5469_v12  ;;  %v5478_v5 = vadd.f32 %v5477_v19, %v5476_v44  ;;  %v5485_v23 = vadd.f32 %v5484_v11, %v5410_v31 }
 0x45d   : > { %v5431_v46 = vpop.xlane.xlu1 %5430  ;;  %v5359_v53 = vpop.xlane.xlu0 %5358 }
 0x45e   : > { %5521 = vst.msk [vmem:[%s8052_s11 + $0x1] sm:$0x1] %vm5519_vm2, %v5464_v49  ;;  %v5472_v40 = vrot.slane %v5471_v24, 1  ;;  %v5479_v15 = vrot.slane %v5478_v5, 2  ;;  %v5486_v18 = vrot.slane %v5485_v23, 4  ;;  %v5502_v1 = vadd.f32 %v5501_v60, %v5431_v46 }
 0x45f   : > { %v5448_v4 = vadd.f32 %v8020_v45, %v5359_v53 }
 0x460   : > { %v5473_v36 = vadd.f32 %v5472_v40, %v5471_v24  ;;  %v5480_v17 = vadd.f32 %v5479_v15, %v5478_v5  ;;  %v5487_v34 = vadd.f32 %v5486_v18, %v5485_v23  ;;  %v5503_v62 = vadd.f32 %v5502_v1, %v5434_v43 }
 0x461   : > { %v5449_v6 = vadd.f32 %v5448_v4, %v5362_v35  ;;  %v5571_v0 = vpop.xlane.xlu1 %5570  ;;  %v5419_v22 = vpop.xlane.xlu0 %5418  ;;  %v5692_v1 = vadd.f32 %v8034_v2, %v8036_v55  ;;  %v5710_v2 = vadd.f32 %v8040_v50, %v8042_v27 }
 0x462   : > { %5522 = vst.msk [vmem:[%s8052_s11 + $0x2] sm:$0x1] %vm5519_vm2, %v5473_v36  ;;  %v5481_v31 = vrot.slane %v5480_v17, 1  ;;  %v5488_v10 = vrot.slane %v5487_v34, 2  ;;  %v5504_v29 = vrot.slane %v5503_v62, 4  ;;  %v5493_v59 = vadd.f32 %v8022_v21, %v5419_v22 }
 0x463   : > { %v5450_v3 = vrot.slane %v5449_v6, 4 }
 0x464   : > { %v5482_v58 = vadd.f32 %v5481_v31, %v5480_v17  ;;  %v5489_v9 = vadd.f32 %v5488_v10, %v5487_v34  ;;  %v5505_v52 = vadd.f32 %v5504_v29, %v5503_v62  ;;  %v5494_v45 = vadd.f32 %v5493_v59, %v5422_v28 }
 0x465   : > { %v5451_v51 = vadd.f32 %v5450_v3, %v5449_v6  ;;  %v5595_v38 = vpop.xlane.xlu1 %5594  ;;  %v5443_v43 = vpop.xlane.xlu0 %5442 }
 0x466   : > { %5523 = vst.msk [vmem:[%s8052_s11 + $0x3] sm:$0x1] %vm5519_vm2, %v5482_v58  ;;  %v5490_v35 = vrot.slane %v5489_v9, 1  ;;  %v5506_v30 = vrot.slane %v5505_v52, 2  ;;  %v5495_v8 = vrot.slane %v5494_v45, 4  ;;  %v5511_v61 = vadd.f32 %v8024_v57, %v5443_v43 }
 0x467   : > { %v5452_v26 = vrot.slane %v5451_v51, 2 }
 0x468   : > { %v5491_v16 = vadd.f32 %v5490_v35, %v5489_v9  ;;  %v5507_v39 = vadd.f32 %v5506_v30, %v5505_v52  ;;  %v5496_v21 = vadd.f32 %v5495_v8, %v5494_v45  ;;  %v5512_v13 = vadd.f32 %v5511_v61, %v5446_v47 }
 0x469   : > { %v5453_v33 = vadd.f32 %v5452_v26, %v5451_v51  ;;  %v5619_v14 = vpop.xlane.xlu1 %5618  ;;  %v5583_v28 = vpop.xlane.xlu0 %5582 }
 0x46a   : > { %5524 = vst.msk [vmem:[%s8052_s11 + $0x4] sm:$0x1] %vm5519_vm2, %v5491_v16  ;;  %v5508_v32 = vrot.slane %v5507_v39, 1  ;;  %v5497_v48 = vrot.slane %v5496_v21, 2  ;;  %v5513_v12 = vrot.slane %v5512_v13, 4 }
 0x46b   : > { %v5454_v44 = vrot.slane %v5453_v33, 1 }
 0x46c   : > { %v5509_v25 = vadd.f32 %v5508_v32, %v5507_v39  ;;  %v5498_v37 = vadd.f32 %v5497_v48, %v5496_v21  ;;  %v5514_v57 = vadd.f32 %v5513_v12, %v5512_v13 }
 0x46d   : > { %v5455_v63 = vadd.f32 %v5454_v44, %v5453_v33  ;;  %v5568_v19 = vpop.xlane.xlu1 %5567  ;;  %v5607_v11 = vpop.xlane.xlu0 %5606 }
 0x46e   : > { %5526 = vst.msk [vmem:[%s8052_s11 + $0x6] sm:$0x1] %vm5519_vm2, %v5509_v25  ;;  %v5499_v47 = vrot.slane %v5498_v37, 1  ;;  %v5515_v60 = vrot.slane %v5514_v57, 2  ;;  %v5657_v49 = vadd.f32 %v8026_v42, %v5568_v19 }
 0x46f   : > { %5520 = vst.msk [vmem:[%s8052_s11] sm:$0x1] %vm5519_vm2, %v5455_v63 }
 0x470   : > { %v5500_v24 = vadd.f32 %v5499_v47, %v5498_v37  ;;  %v5516_v5 = vadd.f32 %v5515_v60, %v5514_v57  ;;  %v5658_v23 = vadd.f32 %v5657_v49, %v5571_v0 }
 0x471   : > { %v5592_v46 = vpop.xlane.xlu1 %5591  ;;  %v5631_v53 = vpop.xlane.xlu0 %5630 }
 0x472   : > { %5525 = vst.msk [vmem:[%s8052_s11 + $0x5] sm:$0x1] %vm5519_vm2, %v5500_v24  ;;  %v5517_v40 = vrot.slane %v5516_v5, 1  ;;  %v5659_v15 = vrot.slane %v5658_v23, 4  ;;  %v5675_v18 = vadd.f32 %v8030_v54, %v5592_v46 }
 0x474   : > { %v5518_v4 = vadd.f32 %v5517_v40, %v5516_v5  ;;  %v5660_v36 = vadd.f32 %v5659_v15, %v5658_v23  ;;  %v5676_v42 = vadd.f32 %v5675_v18, %v5595_v38 }
 0x475   : > { %v5616_v17 = vpop.xlane.xlu1 %5615  ;;  %v5580_v34 = vpop.xlane.xlu0 %5579 }
 0x476   : > { %5527 = vst.msk [vmem:[%s8052_s11 + $0x7] sm:$0x1] %vm5519_vm2, %v5518_v4  ;;  %v5661_v62 = vrot.slane %v5660_v36, 2  ;;  %v5677_v6 = vrot.slane %v5676_v42, 4  ;;  %v5693_v0 = vadd.f32 %v5692_v1, %v5616_v17  ;;  %v5666_v22 = vadd.f32 %v8028_v41, %v5580_v34 }
 0x478   : > { %v5662_v31 = vadd.f32 %v5661_v62, %v5660_v36  ;;  %v5678_v10 = vadd.f32 %v5677_v6, %v5676_v42  ;;  %v5694_v29 = vadd.f32 %v5693_v0, %v5619_v14  ;;  %v5667_v54 = vadd.f32 %v5666_v22, %v5583_v28 }
 0x479   : > { %v5640_v55 = vpop.xlane.xlu1 %5639  ;;  %v5604_v59 = vpop.xlane.xlu0 %5603 }
 0x47a   : > { %v5663_v3 = vrot.slane %v5662_v31, 1  ;;  %v5679_v58 = vrot.slane %v5678_v10, 2  ;;  %v5695_v9 = vrot.slane %v5694_v29, 4  ;;  %v5668_v52 = vrot.slane %v5667_v54, 4 }
 0x47b   : > { %v5711_v41 = vadd.f32 %v5710_v2, %v5640_v55  ;;  %v5684_v45 = vadd.f32 %v8032_v56, %v5604_v59 }
 0x47c   : > { %v5664_v51 = vadd.f32 %v5663_v3, %v5662_v31  ;;  %v5680_v38 = vadd.f32 %v5679_v58, %v5678_v10  ;;  %v5696_v43 = vadd.f32 %v5695_v9, %v5694_v29  ;;  %v5669_v50 = vadd.f32 %v5668_v52, %v5667_v54 }
 0x47d   : > { %v5685_v27 = vadd.f32 %v5684_v45, %v5607_v11  ;;  %v5643_v35 = vpop.xlane.xlu1 %5642  ;;  %v5628_v30 = vpop.xlane.xlu0 %5627 }
 0x47e   : > { %5728 = vst.msk [vmem:[%s8086_s14] sm:$0x1] %vm5519_vm2, %v5664_v51  ;;  %v5681_v8 = vrot.slane %v5680_v38, 1  ;;  %v5697_v61 = vrot.slane %v5696_v43, 2  ;;  %v5670_v26 = vrot.slane %v5669_v50, 2  ;;  %v5712_v16 = vadd.f32 %v5711_v41, %v5643_v35 }
 0x47f   : > { %v5686_v39 = vrot.slane %v5685_v27, 4  ;;  %v5702_v21 = vadd.f32 %v8038_v20, %v5628_v30 }
 0x480   : > { %v5682_v13 = vadd.f32 %v5681_v8, %v5680_v38  ;;  %v5698_v33 = vadd.f32 %v5697_v61, %v5696_v43  ;;  %v5671_v56 = vadd.f32 %v5670_v26, %v5669_v50  ;;  %v5713_v14 = vrot.slane %v5712_v16, 4 }
 0x481   : > { %v5687_v28 = vadd.f32 %v5686_v39, %v5685_v27  ;;  %v5703_v32 = vadd.f32 %v5702_v21, %v5631_v53  ;;  %v5652_v48 = vpop.xlane.xlu0 %5651 }
 0x482   : > { %5730 = vst.msk [vmem:[%s8086_s14 + $0x2] sm:$0x1] %vm5519_vm2, %v5682_v13  ;;  %v5699_v12 = vrot.slane %v5698_v33, 1  ;;  %v5672_v44 = vrot.slane %v5671_v56, 1  ;;  %v5714_v25 = vadd.f32 %v5713_v14, %v5712_v16  ;;  %v5720_v20 = vadd.f32 %v8044_v7, %v5652_v48 }
 0x483   : > { %v5688_v37 = vrot.slane %v5687_v28, 2  ;;  %v5704_v57 = vrot.slane %v5703_v32, 4 }
 0x484   : > { %v5700_v63 = vadd.f32 %v5699_v12, %v5698_v33  ;;  %v5673_v19 = vadd.f32 %v5672_v44, %v5671_v56  ;;  %v5715_v11 = vrot.slane %v5714_v25, 2 }
 0x485   : > { %v5689_v47 = vadd.f32 %v5688_v37, %v5687_v28  ;;  %v5705_v60 = vadd.f32 %v5704_v57, %v5703_v32  ;;  %v5655_v49 = vpop.xlane.xlu0 %5654 }
 0x486   : > { %5732 = vst.msk [vmem:[%s8086_s14 + $0x4] sm:$0x1] %vm5519_vm2, %v5700_v63  ;;  %5729 = vst.msk [vmem:[%s8086_s14 + $0x1] sm:$0x1] %vm5519_vm2, %v5673_v19  ;;  %v5716_v24 = vadd.f32 %v5715_v11, %v5714_v25  ;;  %v5721_v5 = vadd.f32 %v5720_v20, %v5655_v49 }
 0x487   : > { %v5690_v23 = vrot.slane %v5689_v47, 1  ;;  %v5706_v46 = vrot.slane %v5705_v60, 2 }
 0x488   : > { %v5717_v53 = vrot.slane %v5716_v24, 1  ;;  %v5722_v40 = vrot.slane %v5721_v5, 4 }
 0x489   : > { %v5691_v15 = vadd.f32 %v5690_v23, %v5689_v47  ;;  %v5707_v18 = vadd.f32 %v5706_v46, %v5705_v60 }
 0x48a   : > { %v5718_v7 = vadd.f32 %v5717_v53, %v5716_v24  ;;  %v5723_v1 = vadd.f32 %v5722_v40, %v5721_v5 }
 0x48b   : > { %5731 = vst.msk [vmem:[%s8086_s14 + $0x3] sm:$0x1] %vm5519_vm2, %v5691_v15  ;;  %v5708_v4 = vrot.slane %v5707_v18, 1 }
 0x48c   : > { %5734 = vst.msk [vmem:[%s8086_s14 + $0x6] sm:$0x1] %vm5519_vm2, %v5718_v7  ;;  %v5724_v36 = vrot.slane %v5723_v1, 2 }
 0x48d   : > { %v5709_v42 = vadd.f32 %v5708_v4, %v5707_v18 }
 0x48e   : > { %v5725_v17 = vadd.f32 %v5724_v36, %v5723_v1 }
 0x48f   : > { %5733 = vst.msk [vmem:[%s8086_s14 + $0x5] sm:$0x1] %vm5519_vm2, %v5709_v42 }
 0x490   : > { %v5726_v34 = vrot.slane %v5725_v17, 1 }
 0x492   : > { %v5727_v62 = vadd.f32 %v5726_v34, %v5725_v17 }
 0x494   : > { %5735 = vst.msk [vmem:[%s8086_s14 + $0x7] sm:$0x1] %vm5519_vm2, %v5727_v62 }
 0x495 PF: > { %s17_s21 = sadd.s32 1, %s6879_s21  }
 0x496   : > { %p14_p4 = scmp.ge.s32.totalorder %s17_s21, 4  }
 0x498   :  { %16 = sbr.rel (!%p14_p4) target bundleno = 1 (0x1), region = 88 }

</bundles_post_ra>
